<compile_context>
chip_gen: v6e
topology: v6e:2x2x1
jax: 0.10.0
libtpu: 0.0.40
codegen_flags: <defaults>
</compile_context>

<pallas_src>
import jax
import jax.numpy as jnp
from jax import lax
from jax.experimental import pallas as pl
from jax.experimental.pallas import tpu as pltpu

BIG = 1e30        # "empty" depth value (finite to avoid inf*0 = nan)
EPS_VIS = 1e-3    # depth tolerance for the visibility test
EPS_AREA = 1e-6   # degenerate-triangle threshold (on 2*area in pixel^2)


def _round_up(x, m):
    return ((x + m - 1) // m) * m


# ---------------------------------------------------------------------------
# Pass 1: rasterize min-depth buffer.
# ---------------------------------------------------------------------------
def _make_raster_kernel(Hp, Wp, H, W, RT, TB):
    n_row_tiles = Hp // RT

    def kernel(tri_ref, vflat_ref, depth_ref, px_ref, py_ref):
        tb = pl.program_id(0)

        # Init depth buffer + pixel-center grids once.
        @pl.when(tb == 0)
        def _():
            depth_ref[...] = jnp.full((Hp, Wp), BIG, jnp.float32)
            px_ref[...] = (
                lax.broadcasted_iota(jnp.int32, (RT, Wp), 1).astype(jnp.float32) + 0.5)
            py_ref[...] = (
                lax.broadcasted_iota(jnp.int32, (RT, Wp), 0).astype(jnp.float32) + 0.5)

        # TB triangles per grid step (unrolled; scalar math on the scalar unit).
        for u in range(TB):
            t = tb * TB + u
            i0 = tri_ref[3 * t + 0]
            i1 = tri_ref[3 * t + 1]
            i2 = tri_ref[3 * t + 2]

            x0 = vflat_ref[3 * i0 + 0]; y0 = vflat_ref[3 * i0 + 1]; z0 = vflat_ref[3 * i0 + 2]
            x1 = vflat_ref[3 * i1 + 0]; y1 = vflat_ref[3 * i1 + 1]; z1 = vflat_ref[3 * i1 + 2]
            x2 = vflat_ref[3 * i2 + 0]; y2 = vflat_ref[3 * i2 + 1]; z2 = vflat_ref[3 * i2 + 2]

            # Affine edge planes  w_i(p) = A_i*px + B_i*py + C_i
            A0 = y2 - y1; B0 = x1 - x2; C0 = y1 * x2 - x1 * y2
            A1 = y0 - y2; B1 = x2 - x0; C1 = y2 * x0 - x2 * y0
            A2 = y1 - y0; B2 = x0 - x1; C2 = y0 * x1 - x0 * y1
            area = C0 + C1 + C2                      # 2 * signed area
            aabs = jnp.abs(area)
            nondegen = aabs > EPS_AREA
            s = jnp.where(area >= 0.0, 1.0, -1.0)    # fold orientation into coeffs
            inv_abs = jnp.where(nondegen, 1.0 / jnp.where(nondegen, aabs, 1.0), 0.0)

            A0s = s * A0; B0s = s * B0; C0s = s * C0
            A1s = s * A1; B1s = s * B1; C1s = s * C1
            A2s = s * A2; B2s = s * B2; C2s = s * C2

            # Single interpolated-depth plane  z(p) = Zx*px + Zy*py + Zc
            Zx = (A0s * z0 + A1s * z1 + A2s * z2) * inv_abs
            Zy = (B0s * z0 + B1s * z1 + B2s * z2) * inv_abs
            Zc = (C0s * z0 + C1s * z1 + C2s * z2) * inv_abs

            # Scalar bounding box -> skip off-image / degenerate triangles and
            # untouched row tiles entirely.
            xmin = jnp.minimum(jnp.minimum(x0, x1), x2)
            xmax = jnp.maximum(jnp.maximum(x0, x1), x2)
            ymin = jnp.minimum(jnp.minimum(y0, y1), y2)
            ymax = jnp.maximum(jnp.maximum(y0, y1), y2)
            tri_active = (nondegen
                          & (xmax >= 0.0) & (xmin <= float(W))
                          & (ymax >= 0.0) & (ymin <= float(H)))

            for r in range(n_row_tiles):
                y_lo = r * RT
                hit = (tri_active
                       & (ymax >= float(y_lo)) & (ymin <= float(y_lo + RT)))

                @pl.when(hit)
                def _(y_lo=y_lo):
                    off = float(y_lo)
                    # Fold the row-tile offset into the scalar constants.
                    c0 = C0s + B0s * off
                    c1 = C1s + B1s * off
                    c2 = C2s + B2s * off
                    zc = Zc + Zy * off

                    px = px_ref[...]                      # (RT, Wp)
                    py = py_ref[...]
                    w0 = A0s * px + B0s * py + c0
                    w1 = A1s * px + B1s * py + c1
                    w2 = A2s * px + B2s * py + c2
                    zt = Zx * px + Zy * py + zc
                    inside = (w0 >= 0.0) & (w1 >= 0.0) & (w2 >= 0.0)
                    cand = jnp.where(inside, zt, BIG)

                    cur = depth_ref[pl.ds(y_lo, RT), :]
                    depth_ref[pl.ds(y_lo, RT), :] = jnp.minimum(cur, cand)

    return kernel


# ---------------------------------------------------------------------------
# Pass 2: per-vertex visibility test (V-tiled one-hot gather of the depth map).
# ---------------------------------------------------------------------------
def _make_visibility_kernel(Hp, Wp, H, W, VT):
    def kernel(verts_ref, depth_ref, out_ref):
        vx = verts_ref[0:1, :]                            # (1, VT), lane-dense
        vy = verts_ref[1:2, :]
        vz = verts_ref[2:3, :]

        in_b = (vx >= 0.0) & (vx < float(W)) & (vy >= 0.0) & (vy < float(H))
        pxi = jnp.clip(jnp.floor(vx), 0.0, float(W - 1)).astype(jnp.int32)   # (1, VT)
        pyi = jnp.clip(jnp.floor(vy), 0.0, float(H - 1)).astype(jnp.int32)

        # depth[:, pxi[v]] via one-hot column matmul, keeping vertices on lanes.
        col_iota = lax.broadcasted_iota(jnp.int32, (Wp, VT), 0)
        onehot_c = (col_iota == pxi).astype(jnp.float32)                     # (Wp, VT)
        d_cols = jnp.dot(depth_ref[...], onehot_c,
                         preferred_element_type=jnp.float32)                 # (Hp, VT)
        # then select the row with an elementwise one-hot + sublane reduction.
        row_iota = lax.broadcasted_iota(jnp.int32, (Hp, VT), 0)
        onehot_r = (row_iota == pyi).astype(jnp.float32)                     # (Hp, VT)
        depth_at = jnp.sum(d_cols * onehot_r, axis=0, keepdims=True)         # (1, VT)

        visible = in_b & (vz <= depth_at + EPS_VIS)
        out_ref[...] = visible.astype(jnp.float32)

    return kernel


# ---------------------------------------------------------------------------
# Wrapper
# ---------------------------------------------------------------------------
def mesh_mask_pallas(vertices, triangles, image_size):
    """vertices: (V, 3) f32 (x, y, z-depth); triangles: (T, 3) int.

    Returns (V,) f32 mask (1.0 = visible, 0.0 = hidden).
    """
    H, W = int(image_size[0]), int(image_size[1])
    V = int(vertices.shape[0])
    T = int(triangles.shape[0])

    Hp = _round_up(max(H, 1), 8)
    Wp = _round_up(max(W, 1), 128)
    Vp = _round_up(max(V, 1), 128)

    TB = 8                                                  # triangles per grid step
    Tp = _round_up(max(T, 1), TB)                           # pad with degenerate tris
    RT = next(r for r in (64, 32, 16, 8) if Hp % r == 0)    # row-tile height
    VT = next(v for v in (512, 256, 128) if Vp % v == 0)    # vertex tile (lanes)

    verts_f32 = vertices.astype(jnp.float32)
    verts_flat = verts_f32.reshape(-1)                      # (3V,)  -> SMEM
    tri_flat = jnp.zeros((3 * Tp,), jnp.int32)              # pad = (0,0,0) degenerate
    if T > 0:
        tri_flat = tri_flat.at[: 3 * T].set(triangles.astype(jnp.int32).reshape(-1))
    verts_T = jnp.full((3, Vp), -1.0, jnp.float32)          # padded verts out-of-bounds
    if V > 0:
        verts_T = verts_T.at[:, :V].set(verts_f32.T)

    depth_bytes = Hp * Wp * 4

    # --- pass 1: depth buffer --------------------------------------------
    raster_vmem = int(min(64 * 2**20,
                          max(16 * 2**20, 2 * (2 * depth_bytes + 2 * RT * Wp * 4))))
    depth = pl.pallas_call(
        _make_raster_kernel(Hp, Wp, H, W, RT, TB),
        out_shape=jax.ShapeDtypeStruct((Hp, Wp), jnp.float32),
        grid_spec=pltpu.PrefetchScalarGridSpec(
            num_scalar_prefetch=0,
            grid=(Tp // TB,),
            in_specs=[
                pl.BlockSpec(memory_space=pltpu.MemorySpace.SMEM),   # tri_flat
                pl.BlockSpec(memory_space=pltpu.MemorySpace.SMEM),   # verts_flat
            ],
            out_specs=pl.BlockSpec((Hp, Wp), lambda t: (0, 0)),      # resident accumulator
            scratch_shapes=[pltpu.VMEM((RT, Wp), jnp.float32),       # px pixel centers
                            pltpu.VMEM((RT, Wp), jnp.float32)],      # py pixel centers
        ),
        compiler_params=pltpu.CompilerParams(
            dimension_semantics=("arbitrary",),                      # sequential z-buffer
            vmem_limit_bytes=raster_vmem),
        cost_estimate=pl.CostEstimate(
            flops=int(25 * Tp * Hp * Wp), transcendentals=0,
            bytes_accessed=int(2 * Tp * Hp * Wp * 4 + 12 * (Tp + max(V, 1)))),
    )(tri_flat, verts_flat)

    # --- pass 2: per-vertex visibility -------------------------------------
    gather_vmem = int(min(64 * 2**20,
                          max(16 * 2**20,
                              2 * (2 * depth_bytes + 16 * VT * 4
                                   + (Wp + 2 * Hp) * VT * 4))))
    mask2d = pl.pallas_call(
        _make_visibility_kernel(Hp, Wp, H, W, VT),
        out_shape=jax.ShapeDtypeStruct((1, Vp), jnp.float32),
        grid=(Vp // VT,),
        in_specs=[
            pl.BlockSpec((3, VT), lambda v: (0, v)),                 # vertices (lane-dense)
            pl.BlockSpec((Hp, Wp), lambda v: (0, 0)),                # depth (resident)
        ],
        out_specs=pl.BlockSpec((1, VT), lambda v: (0, v)),           # lane-dense output
        compiler_params=pltpu.CompilerParams(
            dimension_semantics=("parallel",),
            vmem_limit_bytes=gather_vmem),
        cost_estimate=pl.CostEstimate(
            flops=int(2 * Hp * Wp * Vp), transcendentals=0,
            bytes_accessed=int(depth_bytes + 16 * Vp)),
    )(verts_T, depth)

    return mask2d[0, :V]


class MeshMask:
    """JAX/Pallas port of the PyTorch MeshMask module."""

    def __init__(self, image_size, triangles):
        self.image_size = image_size
        self.triangles = triangles
        self.num_triangles = triangles.shape[0]

    def __call__(self, vertices):
        return mesh_mask_pallas(vertices, self.triangles, self.image_size)


if __name__ == "__main__":
    key = jax.random.PRNGKey(0)
    V, T, H, W = 64, 32, 16, 16

    k1, k2, k3 = jax.random.split(key, 3)
    xy = jax.random.uniform(k1, (V, 2), minval=0.0, maxval=float(W))
    z = jax.random.uniform(k2, (V, 1), minval=1.0, maxval=10.0)
    vertices = jnp.concatenate([xy, z], axis=1).astype(jnp.float32)    # (V, 3)
    triangles = jax.random.randint(k3, (T, 3), 0, V, dtype=jnp.int32)  # (T, 3)

    module = MeshMask((H, W), triangles)
    mask = module(vertices)
    mask = jax.block_until_ready(mask)

    assert mask.shape == (V,), mask.shape
    assert mask.dtype == jnp.float32
    assert bool(jnp.all((mask == 0.0) | (mask == 1.0)))
    print("KERNEL_OK")
</pallas_src>

<mosaic_0001>
module attributes {stable_mosaic.version = 11 : i64} {
  func.func @kernel(%arg0: i32, %arg1: memref<96xi32, #tpu.memory_space<smem>>, %arg2: memref<192xf32, #tpu.memory_space<smem>>, %arg3: memref<16x128xf32, #tpu.memory_space<vmem>>, %arg4: memref<16x128xf32, #tpu.memory_space<vmem>>, %arg5: memref<16x128xf32, #tpu.memory_space<vmem>>) attributes {dimension_semantics = [#tpu.dimension_semantics<arbitrary>], iteration_bounds = array<i64: 4>, scalar_prefetch = 0 : i64, scratch_operands = 2 : i64, tpu.core_type = #tpu.core_type<tc>, window_params = [{transform_indices = @transform_0, window_bounds = array<i64: 96>}, {transform_indices = @transform_1, window_bounds = array<i64: 192>}, {pipeline_mode = #tpu.pipeline_mode<synchronous>, transform_indices = @transform_2, window_bounds = array<i64: 16, 128>}]} {
    %c0_i32 = arith.constant 0 : i32
    %0 = arith.cmpi eq, %arg0, %c0_i32 : i32
    %1 = arith.extui %0 : i1 to i32
    %c0_i32_0 = arith.constant 0 : i32
    %2 = arith.cmpi ne, %1, %c0_i32_0 : i32
    scf.if %2 {
      %cst_312 = arith.constant 1.000000e+30 : f32
      %987 = vector.broadcast %cst_312 : f32 to vector<16x128xf32>
      %c0 = arith.constant 0 : index
      %c0_313 = arith.constant 0 : index
      %988 = vector.load %arg3[%c0, %c0_313] : memref<16x128xf32, #tpu.memory_space<vmem>>, vector<16x128xf32>
      tpu.vector_store %arg3[%c0, %c0_313], %987 {strides = array<i32>} : memref<16x128xf32, #tpu.memory_space<vmem>>, vector<16x128xf32>,
      %989 = tpu.iota {dimensions = array<i32: 1>} : vector<16x128xi32>
      %990 = arith.sitofp %989 : vector<16x128xi32> to vector<16x128xf32>
      %cst_314 = arith.constant 5.000000e-01 : f32
      %991 = vector.broadcast %cst_314 : f32 to vector<16x128xf32>
      %992 = arith.addf %990, %991 : vector<16x128xf32>
      %c0_315 = arith.constant 0 : index
      %c0_316 = arith.constant 0 : index
      %993 = vector.load %arg4[%c0_315, %c0_316] : memref<16x128xf32, #tpu.memory_space<vmem>>, vector<16x128xf32>
      tpu.vector_store %arg4[%c0_315, %c0_316], %992 {strides = array<i32>} : memref<16x128xf32, #tpu.memory_space<vmem>>, vector<16x128xf32>,
      %994 = tpu.iota {dimensions = array<i32: 0>} : vector<16x128xi32>
      %995 = arith.sitofp %994 : vector<16x128xi32> to vector<16x128xf32>
      %cst_317 = arith.constant 5.000000e-01 : f32
      %996 = vector.broadcast %cst_317 : f32 to vector<16x128xf32>
      %997 = arith.addf %995, %996 : vector<16x128xf32>
      %c0_318 = arith.constant 0 : index
      %c0_319 = arith.constant 0 : index
      %998 = vector.load %arg5[%c0_318, %c0_319] : memref<16x128xf32, #tpu.memory_space<vmem>>, vector<16x128xf32>
      tpu.vector_store %arg5[%c0_318, %c0_319], %997 {strides = array<i32>} : memref<16x128xf32, #tpu.memory_space<vmem>>, vector<16x128xf32>,
    } else {
    }
    %c8_i32 = arith.constant 8 : i32
    %3 = arith.muli %arg0, %c8_i32 : i32
    %c0_i32_1 = arith.constant 0 : i32
    %4 = arith.addi %3, %c0_i32_1 : i32
    %c3_i32 = arith.constant 3 : i32
    %5 = arith.muli %c3_i32, %4 : i32
    %c0_i32_2 = arith.constant 0 : i32
    %6 = arith.addi %5, %c0_i32_2 : i32
    %7 = arith.index_cast %6 : i32 to index
    %8 = memref.load %arg1[%7] : memref<96xi32, #tpu.memory_space<smem>>
    %c3_i32_3 = arith.constant 3 : i32
    %9 = arith.muli %c3_i32_3, %4 : i32
    %c1_i32 = arith.constant 1 : i32
    %10 = arith.addi %9, %c1_i32 : i32
    %11 = arith.index_cast %10 : i32 to index
    %12 = memref.load %arg1[%11] : memref<96xi32, #tpu.memory_space<smem>>
    %c3_i32_4 = arith.constant 3 : i32
    %13 = arith.muli %c3_i32_4, %4 : i32
    %c2_i32 = arith.constant 2 : i32
    %14 = arith.addi %13, %c2_i32 : i32
    %15 = arith.index_cast %14 : i32 to index
    %16 = memref.load %arg1[%15] : memref<96xi32, #tpu.memory_space<smem>>
    %c3_i32_5 = arith.constant 3 : i32
    %17 = arith.muli %c3_i32_5, %8 : i32
    %c0_i32_6 = arith.constant 0 : i32
    %18 = arith.addi %17, %c0_i32_6 : i32
    %19 = arith.index_cast %18 : i32 to index
    %20 = memref.load %arg2[%19] : memref<192xf32, #tpu.memory_space<smem>>
    %c3_i32_7 = arith.constant 3 : i32
    %21 = arith.muli %c3_i32_7, %8 : i32
    %c1_i32_8 = arith.constant 1 : i32
    %22 = arith.addi %21, %c1_i32_8 : i32
    %23 = arith.index_cast %22 : i32 to index
    %24 = memref.load %arg2[%23] : memref<192xf32, #tpu.memory_space<smem>>
    %c3_i32_9 = arith.constant 3 : i32
    %25 = arith.muli %c3_i32_9, %8 : i32
    %c2_i32_10 = arith.constant 2 : i32
    %26 = arith.addi %25, %c2_i32_10 : i32
    %27 = arith.index_cast %26 : i32 to index
    %28 = memref.load %arg2[%27] : memref<192xf32, #tpu.memory_space<smem>>
    %c3_i32_11 = arith.constant 3 : i32
    %29 = arith.muli %c3_i32_11, %12 : i32
    %c0_i32_12 = arith.constant 0 : i32
    %30 = arith.addi %29, %c0_i32_12 : i32
    %31 = arith.index_cast %30 : i32 to index
    %32 = memref.load %arg2[%31] : memref<192xf32, #tpu.memory_space<smem>>
    %c3_i32_13 = arith.constant 3 : i32
    %33 = arith.muli %c3_i32_13, %12 : i32
    %c1_i32_14 = arith.constant 1 : i32
    %34 = arith.addi %33, %c1_i32_14 : i32
    %35 = arith.index_cast %34 : i32 to index
    %36 = memref.load %arg2[%35] : memref<192xf32, #tpu.memory_space<smem>>
    %c3_i32_15 = arith.constant 3 : i32
    %37 = arith.muli %c3_i32_15, %12 : i32
    %c2_i32_16 = arith.constant 2 : i32
    %38 = arith.addi %37, %c2_i32_16 : i32
    %39 = arith.index_cast %38 : i32 to index
    %40 = memref.load %arg2[%39] : memref<192xf32, #tpu.memory_space<smem>>
    %c3_i32_17 = arith.constant 3 : i32
    %41 = arith.muli %c3_i32_17, %16 : i32
    %c0_i32_18 = arith.constant 0 : i32
    %42 = arith.addi %41, %c0_i32_18 : i32
    %43 = arith.index_cast %42 : i32 to index
    %44 = memref.load %arg2[%43] : memref<192xf32, #tpu.memory_space<smem>>
    %c3_i32_19 = arith.constant 3 : i32
    %45 = arith.muli %c3_i32_19, %16 : i32
    %c1_i32_20 = arith.constant 1 : i32
    %46 = arith.addi %45, %c1_i32_20 : i32
    %47 = arith.index_cast %46 : i32 to index
    %48 = memref.load %arg2[%47] : memref<192xf32, #tpu.memory_space<smem>>
    %c3_i32_21 = arith.constant 3 : i32
    %49 = arith.muli %c3_i32_21, %16 : i32
    %c2_i32_22 = arith.constant 2 : i32
    %50 = arith.addi %49, %c2_i32_22 : i32
    %51 = arith.index_cast %50 : i32 to index
    %52 = memref.load %arg2[%51] : memref<192xf32, #tpu.memory_space<smem>>
    %53 = arith.subf %48, %36 : f32
    %54 = arith.subf %32, %44 : f32
    %55 = arith.mulf %36, %44 : f32
    %56 = arith.mulf %32, %48 : f32
    %57 = arith.subf %55, %56 : f32
    %58 = arith.subf %24, %48 : f32
    %59 = arith.subf %44, %20 : f32
    %60 = arith.mulf %48, %20 : f32
    %61 = arith.mulf %44, %24 : f32
    %62 = arith.subf %60, %61 : f32
    %63 = arith.subf %36, %24 : f32
    %64 = arith.subf %20, %32 : f32
    %65 = arith.mulf %24, %32 : f32
    %66 = arith.mulf %20, %36 : f32
    %67 = arith.subf %65, %66 : f32
    %68 = arith.addf %57, %62 : f32
    %69 = arith.addf %68, %67 : f32
    %70 = math.absf %69 : f32
    %cst = arith.constant 9.99999997E-7 : f32
    %71 = arith.cmpf ogt, %70, %cst : f32
    %cst_23 = arith.constant 0.000000e+00 : f32
    %72 = arith.cmpf oge, %69, %cst_23 : f32
    %cst_24 = arith.constant 1.000000e+00 : f32
    %cst_25 = arith.constant -1.000000e+00 : f32
    %73 = arith.select %72, %cst_24, %cst_25 : f32
    %cst_26 = arith.constant 1.000000e+00 : f32
    %74 = arith.select %71, %70, %cst_26 : f32
    %cst_27 = arith.constant 1.000000e+00 : f32
    %75 = arith.divf %cst_27, %74 : f32
    %cst_28 = arith.constant 0.000000e+00 : f32
    %76 = arith.select %71, %75, %cst_28 : f32
    %77 = arith.mulf %73, %53 : f32
    %78 = arith.mulf %73, %54 : f32
    %79 = arith.mulf %73, %57 : f32
    %80 = arith.mulf %73, %58 : f32
    %81 = arith.mulf %73, %59 : f32
    %82 = arith.mulf %73, %62 : f32
    %83 = arith.mulf %73, %63 : f32
    %84 = arith.mulf %73, %64 : f32
    %85 = arith.mulf %73, %67 : f32
    %86 = arith.mulf %77, %28 : f32
    %87 = arith.mulf %80, %40 : f32
    %88 = arith.addf %86, %87 : f32
    %89 = arith.mulf %83, %52 : f32
    %90 = arith.addf %88, %89 : f32
    %91 = arith.mulf %90, %76 : f32
    %92 = arith.mulf %78, %28 : f32
    %93 = arith.mulf %81, %40 : f32
    %94 = arith.addf %92, %93 : f32
    %95 = arith.mulf %84, %52 : f32
    %96 = arith.addf %94, %95 : f32
    %97 = arith.mulf %96, %76 : f32
    %98 = arith.mulf %79, %28 : f32
    %99 = arith.mulf %82, %40 : f32
    %100 = arith.addf %98, %99 : f32
    %101 = arith.mulf %85, %52 : f32
    %102 = arith.addf %100, %101 : f32
    %103 = arith.mulf %102, %76 : f32
    %104 = arith.minimumf %20, %32 : f32
    %105 = arith.minimumf %104, %44 : f32
    %106 = arith.maximumf %20, %32 : f32
    %107 = arith.maximumf %106, %44 : f32
    %108 = arith.minimumf %24, %36 : f32
    %109 = arith.minimumf %108, %48 : f32
    %110 = arith.maximumf %24, %36 : f32
    %111 = arith.maximumf %110, %48 : f32
    %cst_29 = arith.constant 0.000000e+00 : f32
    %112 = arith.cmpf oge, %107, %cst_29 : f32
    %113 = arith.andi %71, %112 : i1
    %cst_30 = arith.constant 1.600000e+01 : f32
    %114 = arith.cmpf ole, %105, %cst_30 : f32
    %115 = arith.andi %113, %114 : i1
    %cst_31 = arith.constant 0.000000e+00 : f32
    %116 = arith.cmpf oge, %111, %cst_31 : f32
    %117 = arith.andi %115, %116 : i1
    %cst_32 = arith.constant 1.600000e+01 : f32
    %118 = arith.cmpf ole, %109, %cst_32 : f32
    %119 = arith.andi %117, %118 : i1
    %cst_33 = arith.constant 0.000000e+00 : f32
    %120 = arith.cmpf oge, %111, %cst_33 : f32
    %121 = arith.andi %119, %120 : i1
    %cst_34 = arith.constant 1.600000e+01 : f32
    %122 = arith.cmpf ole, %109, %cst_34 : f32
    %123 = arith.andi %121, %122 : i1
    %124 = arith.extui %123 : i1 to i32
    %c0_i32_35 = arith.constant 0 : i32
    %125 = arith.cmpi ne, %124, %c0_i32_35 : i32
    scf.if %125 {
      %cst_312 = arith.constant 0.000000e+00 : f32
      %987 = arith.mulf %78, %cst_312 : f32
      %988 = arith.addf %79, %987 : f32
      %cst_313 = arith.constant 0.000000e+00 : f32
      %989 = arith.mulf %81, %cst_313 : f32
      %990 = arith.addf %82, %989 : f32
      %cst_314 = arith.constant 0.000000e+00 : f32
      %991 = arith.mulf %84, %cst_314 : f32
      %992 = arith.addf %85, %991 : f32
      %cst_315 = arith.constant 0.000000e+00 : f32
      %993 = arith.mulf %97, %cst_315 : f32
      %994 = arith.addf %103, %993 : f32
      %c0 = arith.constant 0 : index
      %c0_316 = arith.constant 0 : index
      %995 = vector.load %arg4[%c0, %c0_316] : memref<16x128xf32, #tpu.memory_space<vmem>>, vector<16x128xf32>
      %c0_317 = arith.constant 0 : index
      %c0_318 = arith.constant 0 : index
      %996 = vector.load %arg5[%c0_317, %c0_318] : memref<16x128xf32, #tpu.memory_space<vmem>>, vector<16x128xf32>
      %997 = vector.broadcast %77 : f32 to vector<16x128xf32>
      %998 = arith.mulf %997, %995 : vector<16x128xf32>
      %999 = vector.broadcast %78 : f32 to vector<16x128xf32>
      %1000 = arith.mulf %999, %996 : vector<16x128xf32>
      %1001 = arith.addf %998, %1000 : vector<16x128xf32>
      %1002 = vector.broadcast %988 : f32 to vector<16x128xf32>
      %1003 = arith.addf %1001, %1002 : vector<16x128xf32>
      %1004 = vector.broadcast %80 : f32 to vector<16x128xf32>
      %1005 = arith.mulf %1004, %995 : vector<16x128xf32>
      %1006 = vector.broadcast %81 : f32 to vector<16x128xf32>
      %1007 = arith.mulf %1006, %996 : vector<16x128xf32>
      %1008 = arith.addf %1005, %1007 : vector<16x128xf32>
      %1009 = vector.broadcast %990 : f32 to vector<16x128xf32>
      %1010 = arith.addf %1008, %1009 : vector<16x128xf32>
      %1011 = vector.broadcast %83 : f32 to vector<16x128xf32>
      %1012 = arith.mulf %1011, %995 : vector<16x128xf32>
      %1013 = vector.broadcast %84 : f32 to vector<16x128xf32>
      %1014 = arith.mulf %1013, %996 : vector<16x128xf32>
      %1015 = arith.addf %1012, %1014 : vector<16x128xf32>
      %1016 = vector.broadcast %992 : f32 to vector<16x128xf32>
      %1017 = arith.addf %1015, %1016 : vector<16x128xf32>
      %1018 = vector.broadcast %91 : f32 to vector<16x128xf32>
      %1019 = arith.mulf %1018, %995 : vector<16x128xf32>
      %1020 = vector.broadcast %97 : f32 to vector<16x128xf32>
      %1021 = arith.mulf %1020, %996 : vector<16x128xf32>
      %1022 = arith.addf %1019, %1021 : vector<16x128xf32>
      %1023 = vector.broadcast %994 : f32 to vector<16x128xf32>
      %1024 = arith.addf %1022, %1023 : vector<16x128xf32>
      %cst_319 = arith.constant 0.000000e+00 : f32
      %1025 = vector.broadcast %cst_319 : f32 to vector<16x128xf32>
      %1026 = arith.cmpf oge, %1003, %1025 : vector<16x128xf32>
      %cst_320 = arith.constant 0.000000e+00 : f32
      %1027 = vector.broadcast %cst_320 : f32 to vector<16x128xf32>
      %1028 = arith.cmpf oge, %1010, %1027 : vector<16x128xf32>
      %1029 = arith.andi %1026, %1028 : vector<16x128xi1>
      %cst_321 = arith.constant 0.000000e+00 : f32
      %1030 = vector.broadcast %cst_321 : f32 to vector<16x128xf32>
      %1031 = arith.cmpf oge, %1017, %1030 : vector<16x128xf32>
      %1032 = arith.andi %1029, %1031 : vector<16x128xi1>
      %cst_322 = arith.constant 1.000000e+30 : f32
      %1033 = vector.broadcast %cst_322 : f32 to vector<16x128xf32>
      %1034 = arith.select %1032, %1024, %1033 : vector<16x128xi1>, vector<16x128xf32>
      %c0_323 = arith.constant 0 : index
      %c0_324 = arith.constant 0 : index
      %1035 = vector.load %arg3[%c0_323, %c0_324] : memref<16x128xf32, #tpu.memory_space<vmem>>, vector<16x128xf32>
      %1036 = arith.minimumf %1035, %1034 : vector<16x128xf32>
      %c0_325 = arith.constant 0 : index
      %c0_326 = arith.constant 0 : index
      %1037 = vector.load %arg3[%c0_325, %c0_326] : memref<16x128xf32, #tpu.memory_space<vmem>>, vector<16x128xf32>
      tpu.vector_store %arg3[%c0_325, %c0_326], %1036 {strides = array<i32>} : memref<16x128xf32, #tpu.memory_space<vmem>>, vector<16x128xf32>,
    } else {
    }
    %c8_i32_36 = arith.constant 8 : i32
    %126 = arith.muli %arg0, %c8_i32_36 : i32
    %c1_i32_37 = arith.constant 1 : i32
    %127 = arith.addi %126, %c1_i32_37 : i32
    %c3_i32_38 = arith.constant 3 : i32
    %128 = arith.muli %c3_i32_38, %127 : i32
    %c0_i32_39 = arith.constant 0 : i32
    %129 = arith.addi %128, %c0_i32_39 : i32
    %130 = arith.index_cast %129 : i32 to index
    %131 = memref.load %arg1[%130] : memref<96xi32, #tpu.memory_space<smem>>
    %c3_i32_40 = arith.constant 3 : i32
    %132 = arith.muli %c3_i32_40, %127 : i32
    %c1_i32_41 = arith.constant 1 : i32
    %133 = arith.addi %132, %c1_i32_41 : i32
    %134 = arith.index_cast %133 : i32 to index
    %135 = memref.load %arg1[%134] : memref<96xi32, #tpu.memory_space<smem>>
    %c3_i32_42 = arith.constant 3 : i32
    %136 = arith.muli %c3_i32_42, %127 : i32
    %c2_i32_43 = arith.constant 2 : i32
    %137 = arith.addi %136, %c2_i32_43 : i32
    %138 = arith.index_cast %137 : i32 to index
    %139 = memref.load %arg1[%138] : memref<96xi32, #tpu.memory_space<smem>>
    %c3_i32_44 = arith.constant 3 : i32
    %140 = arith.muli %c3_i32_44, %131 : i32
    %c0_i32_45 = arith.constant 0 : i32
    %141 = arith.addi %140, %c0_i32_45 : i32
    %142 = arith.index_cast %141 : i32 to index
    %143 = memref.load %arg2[%142] : memref<192xf32, #tpu.memory_space<smem>>
    %c3_i32_46 = arith.constant 3 : i32
    %144 = arith.muli %c3_i32_46, %131 : i32
    %c1_i32_47 = arith.constant 1 : i32
    %145 = arith.addi %144, %c1_i32_47 : i32
    %146 = arith.index_cast %145 : i32 to index
    %147 = memref.load %arg2[%146] : memref<192xf32, #tpu.memory_space<smem>>
    %c3_i32_48 = arith.constant 3 : i32
    %148 = arith.muli %c3_i32_48, %131 : i32
    %c2_i32_49 = arith.constant 2 : i32
    %149 = arith.addi %148, %c2_i32_49 : i32
    %150 = arith.index_cast %149 : i32 to index
    %151 = memref.load %arg2[%150] : memref<192xf32, #tpu.memory_space<smem>>
    %c3_i32_50 = arith.constant 3 : i32
    %152 = arith.muli %c3_i32_50, %135 : i32
    %c0_i32_51 = arith.constant 0 : i32
    %153 = arith.addi %152, %c0_i32_51 : i32
    %154 = arith.index_cast %153 : i32 to index
    %155 = memref.load %arg2[%154] : memref<192xf32, #tpu.memory_space<smem>>
    %c3_i32_52 = arith.constant 3 : i32
    %156 = arith.muli %c3_i32_52, %135 : i32
    %c1_i32_53 = arith.constant 1 : i32
    %157 = arith.addi %156, %c1_i32_53 : i32
    %158 = arith.index_cast %157 : i32 to index
    %159 = memref.load %arg2[%158] : memref<192xf32, #tpu.memory_space<smem>>
    %c3_i32_54 = arith.constant 3 : i32
    %160 = arith.muli %c3_i32_54, %135 : i32
    %c2_i32_55 = arith.constant 2 : i32
    %161 = arith.addi %160, %c2_i32_55 : i32
    %162 = arith.index_cast %161 : i32 to index
    %163 = memref.load %arg2[%162] : memref<192xf32, #tpu.memory_space<smem>>
    %c3_i32_56 = arith.constant 3 : i32
    %164 = arith.muli %c3_i32_56, %139 : i32
    %c0_i32_57 = arith.constant 0 : i32
    %165 = arith.addi %164, %c0_i32_57 : i32
    %166 = arith.index_cast %165 : i32 to index
    %167 = memref.load %arg2[%166] : memref<192xf32, #tpu.memory_space<smem>>
    %c3_i32_58 = arith.constant 3 : i32
    %168 = arith.muli %c3_i32_58, %139 : i32
    %c1_i32_59 = arith.constant 1 : i32
    %169 = arith.addi %168, %c1_i32_59 : i32
    %170 = arith.index_cast %169 : i32 to index
    %171 = memref.load %arg2[%170] : memref<192xf32, #tpu.memory_space<smem>>
    %c3_i32_60 = arith.constant 3 : i32
    %172 = arith.muli %c3_i32_60, %139 : i32
    %c2_i32_61 = arith.constant 2 : i32
    %173 = arith.addi %172, %c2_i32_61 : i32
    %174 = arith.index_cast %173 : i32 to index
    %175 = memref.load %arg2[%174] : memref<192xf32, #tpu.memory_space<smem>>
    %176 = arith.subf %171, %159 : f32
    %177 = arith.subf %155, %167 : f32
    %178 = arith.mulf %159, %167 : f32
    %179 = arith.mulf %155, %171 : f32
    %180 = arith.subf %178, %179 : f32
    %181 = arith.subf %147, %171 : f32
    %182 = arith.subf %167, %143 : f32
    %183 = arith.mulf %171, %143 : f32
    %184 = arith.mulf %167, %147 : f32
    %185 = arith.subf %183, %184 : f32
    %186 = arith.subf %159, %147 : f32
    %187 = arith.subf %143, %155 : f32
    %188 = arith.mulf %147, %155 : f32
    %189 = arith.mulf %143, %159 : f32
    %190 = arith.subf %188, %189 : f32
    %191 = arith.addf %180, %185 : f32
    %192 = arith.addf %191, %190 : f32
    %193 = math.absf %192 : f32
    %cst_62 = arith.constant 9.99999997E-7 : f32
    %194 = arith.cmpf ogt, %193, %cst_62 : f32
    %cst_63 = arith.constant 0.000000e+00 : f32
    %195 = arith.cmpf oge, %192, %cst_63 : f32
    %cst_64 = arith.constant 1.000000e+00 : f32
    %cst_65 = arith.constant -1.000000e+00 : f32
    %196 = arith.select %195, %cst_64, %cst_65 : f32
    %cst_66 = arith.constant 1.000000e+00 : f32
    %197 = arith.select %194, %193, %cst_66 : f32
    %cst_67 = arith.constant 1.000000e+00 : f32
    %198 = arith.divf %cst_67, %197 : f32
    %cst_68 = arith.constant 0.000000e+00 : f32
    %199 = arith.select %194, %198, %cst_68 : f32
    %200 = arith.mulf %196, %176 : f32
    %201 = arith.mulf %196, %177 : f32
    %202 = arith.mulf %196, %180 : f32
    %203 = arith.mulf %196, %181 : f32
    %204 = arith.mulf %196, %182 : f32
    %205 = arith.mulf %196, %185 : f32
    %206 = arith.mulf %196, %186 : f32
    %207 = arith.mulf %196, %187 : f32
    %208 = arith.mulf %196, %190 : f32
    %209 = arith.mulf %200, %151 : f32
    %210 = arith.mulf %203, %163 : f32
    %211 = arith.addf %209, %210 : f32
    %212 = arith.mulf %206, %175 : f32
    %213 = arith.addf %211, %212 : f32
    %214 = arith.mulf %213, %199 : f32
    %215 = arith.mulf %201, %151 : f32
    %216 = arith.mulf %204, %163 : f32
    %217 = arith.addf %215, %216 : f32
    %218 = arith.mulf %207, %175 : f32
    %219 = arith.addf %217, %218 : f32
    %220 = arith.mulf %219, %199 : f32
    %221 = arith.mulf %202, %151 : f32
    %222 = arith.mulf %205, %163 : f32
    %223 = arith.addf %221, %222 : f32
    %224 = arith.mulf %208, %175 : f32
    %225 = arith.addf %223, %224 : f32
    %226 = arith.mulf %225, %199 : f32
    %227 = arith.minimumf %143, %155 : f32
    %228 = arith.minimumf %227, %167 : f32
    %229 = arith.maximumf %143, %155 : f32
    %230 = arith.maximumf %229, %167 : f32
    %231 = arith.minimumf %147, %159 : f32
    %232 = arith.minimumf %231, %171 : f32
    %233 = arith.maximumf %147, %159 : f32
    %234 = arith.maximumf %233, %171 : f32
    %cst_69 = arith.constant 0.000000e+00 : f32
    %235 = arith.cmpf oge, %230, %cst_69 : f32
    %236 = arith.andi %194, %235 : i1
    %cst_70 = arith.constant 1.600000e+01 : f32
    %237 = arith.cmpf ole, %228, %cst_70 : f32
    %238 = arith.andi %236, %237 : i1
    %cst_71 = arith.constant 0.000000e+00 : f32
    %239 = arith.cmpf oge, %234, %cst_71 : f32
    %240 = arith.andi %238, %239 : i1
    %cst_72 = arith.constant 1.600000e+01 : f32
    %241 = arith.cmpf ole, %232, %cst_72 : f32
    %242 = arith.andi %240, %241 : i1
    %cst_73 = arith.constant 0.000000e+00 : f32
    %243 = arith.cmpf oge, %234, %cst_73 : f32
    %244 = arith.andi %242, %243 : i1
    %cst_74 = arith.constant 1.600000e+01 : f32
    %245 = arith.cmpf ole, %232, %cst_74 : f32
    %246 = arith.andi %244, %245 : i1
    %247 = arith.extui %246 : i1 to i32
    %c0_i32_75 = arith.constant 0 : i32
    %248 = arith.cmpi ne, %247, %c0_i32_75 : i32
    scf.if %248 {
      %cst_312 = arith.constant 0.000000e+00 : f32
      %987 = arith.mulf %201, %cst_312 : f32
      %988 = arith.addf %202, %987 : f32
      %cst_313 = arith.constant 0.000000e+00 : f32
      %989 = arith.mulf %204, %cst_313 : f32
      %990 = arith.addf %205, %989 : f32
      %cst_314 = arith.constant 0.000000e+00 : f32
      %991 = arith.mulf %207, %cst_314 : f32
      %992 = arith.addf %208, %991 : f32
      %cst_315 = arith.constant 0.000000e+00 : f32
      %993 = arith.mulf %220, %cst_315 : f32
      %994 = arith.addf %226, %993 : f32
      %c0 = arith.constant 0 : index
      %c0_316 = arith.constant 0 : index
      %995 = vector.load %arg4[%c0, %c0_316] : memref<16x128xf32, #tpu.memory_space<vmem>>, vector<16x128xf32>
      %c0_317 = arith.constant 0 : index
      %c0_318 = arith.constant 0 : index
      %996 = vector.load %arg5[%c0_317, %c0_318] : memref<16x128xf32, #tpu.memory_space<vmem>>, vector<16x128xf32>
      %997 = vector.broadcast %200 : f32 to vector<16x128xf32>
      %998 = arith.mulf %997, %995 : vector<16x128xf32>
      %999 = vector.broadcast %201 : f32 to vector<16x128xf32>
      %1000 = arith.mulf %999, %996 : vector<16x128xf32>
      %1001 = arith.addf %998, %1000 : vector<16x128xf32>
      %1002 = vector.broadcast %988 : f32 to vector<16x128xf32>
      %1003 = arith.addf %1001, %1002 : vector<16x128xf32>
      %1004 = vector.broadcast %203 : f32 to vector<16x128xf32>
      %1005 = arith.mulf %1004, %995 : vector<16x128xf32>
      %1006 = vector.broadcast %204 : f32 to vector<16x128xf32>
      %1007 = arith.mulf %1006, %996 : vector<16x128xf32>
      %1008 = arith.addf %1005, %1007 : vector<16x128xf32>
      %1009 = vector.broadcast %990 : f32 to vector<16x128xf32>
      %1010 = arith.addf %1008, %1009 : vector<16x128xf32>
      %1011 = vector.broadcast %206 : f32 to vector<16x128xf32>
      %1012 = arith.mulf %1011, %995 : vector<16x128xf32>
      %1013 = vector.broadcast %207 : f32 to vector<16x128xf32>
      %1014 = arith.mulf %1013, %996 : vector<16x128xf32>
      %1015 = arith.addf %1012, %1014 : vector<16x128xf32>
      %1016 = vector.broadcast %992 : f32 to vector<16x128xf32>
      %1017 = arith.addf %1015, %1016 : vector<16x128xf32>
      %1018 = vector.broadcast %214 : f32 to vector<16x128xf32>
      %1019 = arith.mulf %1018, %995 : vector<16x128xf32>
      %1020 = vector.broadcast %220 : f32 to vector<16x128xf32>
      %1021 = arith.mulf %1020, %996 : vector<16x128xf32>
      %1022 = arith.addf %1019, %1021 : vector<16x128xf32>
      %1023 = vector.broadcast %994 : f32 to vector<16x128xf32>
      %1024 = arith.addf %1022, %1023 : vector<16x128xf32>
      %cst_319 = arith.constant 0.000000e+00 : f32
      %1025 = vector.broadcast %cst_319 : f32 to vector<16x128xf32>
      %1026 = arith.cmpf oge, %1003, %1025 : vector<16x128xf32>
      %cst_320 = arith.constant 0.000000e+00 : f32
      %1027 = vector.broadcast %cst_320 : f32 to vector<16x128xf32>
      %1028 = arith.cmpf oge, %1010, %1027 : vector<16x128xf32>
      %1029 = arith.andi %1026, %1028 : vector<16x128xi1>
      %cst_321 = arith.constant 0.000000e+00 : f32
      %1030 = vector.broadcast %cst_321 : f32 to vector<16x128xf32>
      %1031 = arith.cmpf oge, %1017, %1030 : vector<16x128xf32>
      %1032 = arith.andi %1029, %1031 : vector<16x128xi1>
      %cst_322 = arith.constant 1.000000e+30 : f32
      %1033 = vector.broadcast %cst_322 : f32 to vector<16x128xf32>
      %1034 = arith.select %1032, %1024, %1033 : vector<16x128xi1>, vector<16x128xf32>
      %c0_323 = arith.constant 0 : index
      %c0_324 = arith.constant 0 : index
      %1035 = vector.load %arg3[%c0_323, %c0_324] : memref<16x128xf32, #tpu.memory_space<vmem>>, vector<16x128xf32>
      %1036 = arith.minimumf %1035, %1034 : vector<16x128xf32>
      %c0_325 = arith.constant 0 : index
      %c0_326 = arith.constant 0 : index
      %1037 = vector.load %arg3[%c0_325, %c0_326] : memref<16x128xf32, #tpu.memory_space<vmem>>, vector<16x128xf32>
      tpu.vector_store %arg3[%c0_325, %c0_326], %1036 {strides = array<i32>} : memref<16x128xf32, #tpu.memory_space<vmem>>, vector<16x128xf32>,
    } else {
    }
    %c8_i32_76 = arith.constant 8 : i32
    %249 = arith.muli %arg0, %c8_i32_76 : i32
    %c2_i32_77 = arith.constant 2 : i32
    %250 = arith.addi %249, %c2_i32_77 : i32
    %c3_i32_78 = arith.constant 3 : i32
    %251 = arith.muli %c3_i32_78, %250 : i32
    %c0_i32_79 = arith.constant 0 : i32
    %252 = arith.addi %251, %c0_i32_79 : i32
    %253 = arith.index_cast %252 : i32 to index
    %254 = memref.load %arg1[%253] : memref<96xi32, #tpu.memory_space<smem>>
    %c3_i32_80 = arith.constant 3 : i32
    %255 = arith.muli %c3_i32_80, %250 : i32
    %c1_i32_81 = arith.constant 1 : i32
    %256 = arith.addi %255, %c1_i32_81 : i32
    %257 = arith.index_cast %256 : i32 to index
    %258 = memref.load %arg1[%257] : memref<96xi32, #tpu.memory_space<smem>>
    %c3_i32_82 = arith.constant 3 : i32
    %259 = arith.muli %c3_i32_82, %250 : i32
    %c2_i32_83 = arith.constant 2 : i32
    %260 = arith.addi %259, %c2_i32_83 : i32
    %261 = arith.index_cast %260 : i32 to index
    %262 = memref.load %arg1[%261] : memref<96xi32, #tpu.memory_space<smem>>
    %c3_i32_84 = arith.constant 3 : i32
    %263 = arith.muli %c3_i32_84, %254 : i32
    %c0_i32_85 = arith.constant 0 : i32
    %264 = arith.addi %263, %c0_i32_85 : i32
    %265 = arith.index_cast %264 : i32 to index
    %266 = memref.load %arg2[%265] : memref<192xf32, #tpu.memory_space<smem>>
    %c3_i32_86 = arith.constant 3 : i32
    %267 = arith.muli %c3_i32_86, %254 : i32
    %c1_i32_87 = arith.constant 1 : i32
    %268 = arith.addi %267, %c1_i32_87 : i32
    %269 = arith.index_cast %268 : i32 to index
    %270 = memref.load %arg2[%269] : memref<192xf32, #tpu.memory_space<smem>>
    %c3_i32_88 = arith.constant 3 : i32
    %271 = arith.muli %c3_i32_88, %254 : i32
    %c2_i32_89 = arith.constant 2 : i32
    %272 = arith.addi %271, %c2_i32_89 : i32
    %273 = arith.index_cast %272 : i32 to index
    %274 = memref.load %arg2[%273] : memref<192xf32, #tpu.memory_space<smem>>
    %c3_i32_90 = arith.constant 3 : i32
    %275 = arith.muli %c3_i32_90, %258 : i32
    %c0_i32_91 = arith.constant 0 : i32
    %276 = arith.addi %275, %c0_i32_91 : i32
    %277 = arith.index_cast %276 : i32 to index
    %278 = memref.load %arg2[%277] : memref<192xf32, #tpu.memory_space<smem>>
    %c3_i32_92 = arith.constant 3 : i32
    %279 = arith.muli %c3_i32_92, %258 : i32
    %c1_i32_93 = arith.constant 1 : i32
    %280 = arith.addi %279, %c1_i32_93 : i32
    %281 = arith.index_cast %280 : i32 to index
    %282 = memref.load %arg2[%281] : memref<192xf32, #tpu.memory_space<smem>>
    %c3_i32_94 = arith.constant 3 : i32
    %283 = arith.muli %c3_i32_94, %258 : i32
    %c2_i32_95 = arith.constant 2 : i32
    %284 = arith.addi %283, %c2_i32_95 : i32
    %285 = arith.index_cast %284 : i32 to index
    %286 = memref.load %arg2[%285] : memref<192xf32, #tpu.memory_space<smem>>
    %c3_i32_96 = arith.constant 3 : i32
    %287 = arith.muli %c3_i32_96, %262 : i32
    %c0_i32_97 = arith.constant 0 : i32
    %288 = arith.addi %287, %c0_i32_97 : i32
    %289 = arith.index_cast %288 : i32 to index
    %290 = memref.load %arg2[%289] : memref<192xf32, #tpu.memory_space<smem>>
    %c3_i32_98 = arith.constant 3 : i32
    %291 = arith.muli %c3_i32_98, %262 : i32
    %c1_i32_99 = arith.constant 1 : i32
    %292 = arith.addi %291, %c1_i32_99 : i32
    %293 = arith.index_cast %292 : i32 to index
    %294 = memref.load %arg2[%293] : memref<192xf32, #tpu.memory_space<smem>>
    %c3_i32_100 = arith.constant 3 : i32
    %295 = arith.muli %c3_i32_100, %262 : i32
    %c2_i32_101 = arith.constant 2 : i32
    %296 = arith.addi %295, %c2_i32_101 : i32
    %297 = arith.index_cast %296 : i32 to index
    %298 = memref.load %arg2[%297] : memref<192xf32, #tpu.memory_space<smem>>
    %299 = arith.subf %294, %282 : f32
    %300 = arith.subf %278, %290 : f32
    %301 = arith.mulf %282, %290 : f32
    %302 = arith.mulf %278, %294 : f32
    %303 = arith.subf %301, %302 : f32
    %304 = arith.subf %270, %294 : f32
    %305 = arith.subf %290, %266 : f32
    %306 = arith.mulf %294, %266 : f32
    %307 = arith.mulf %290, %270 : f32
    %308 = arith.subf %306, %307 : f32
    %309 = arith.subf %282, %270 : f32
    %310 = arith.subf %266, %278 : f32
    %311 = arith.mulf %270, %278 : f32
    %312 = arith.mulf %266, %282 : f32
    %313 = arith.subf %311, %312 : f32
    %314 = arith.addf %303, %308 : f32
    %315 = arith.addf %314, %313 : f32
    %316 = math.absf %315 : f32
    %cst_102 = arith.constant 9.99999997E-7 : f32
    %317 = arith.cmpf ogt, %316, %cst_102 : f32
    %cst_103 = arith.constant 0.000000e+00 : f32
    %318 = arith.cmpf oge, %315, %cst_103 : f32
    %cst_104 = arith.constant 1.000000e+00 : f32
    %cst_105 = arith.constant -1.000000e+00 : f32
    %319 = arith.select %318, %cst_104, %cst_105 : f32
    %cst_106 = arith.constant 1.000000e+00 : f32
    %320 = arith.select %317, %316, %cst_106 : f32
    %cst_107 = arith.constant 1.000000e+00 : f32
    %321 = arith.divf %cst_107, %320 : f32
    %cst_108 = arith.constant 0.000000e+00 : f32
    %322 = arith.select %317, %321, %cst_108 : f32
    %323 = arith.mulf %319, %299 : f32
    %324 = arith.mulf %319, %300 : f32
    %325 = arith.mulf %319, %303 : f32
    %326 = arith.mulf %319, %304 : f32
    %327 = arith.mulf %319, %305 : f32
    %328 = arith.mulf %319, %308 : f32
    %329 = arith.mulf %319, %309 : f32
    %330 = arith.mulf %319, %310 : f32
    %331 = arith.mulf %319, %313 : f32
    %332 = arith.mulf %323, %274 : f32
    %333 = arith.mulf %326, %286 : f32
    %334 = arith.addf %332, %333 : f32
    %335 = arith.mulf %329, %298 : f32
    %336 = arith.addf %334, %335 : f32
    %337 = arith.mulf %336, %322 : f32
    %338 = arith.mulf %324, %274 : f32
    %339 = arith.mulf %327, %286 : f32
    %340 = arith.addf %338, %339 : f32
    %341 = arith.mulf %330, %298 : f32
    %342 = arith.addf %340, %341 : f32
    %343 = arith.mulf %342, %322 : f32
    %344 = arith.mulf %325, %274 : f32
    %345 = arith.mulf %328, %286 : f32
    %346 = arith.addf %344, %345 : f32
    %347 = arith.mulf %331, %298 : f32
    %348 = arith.addf %346, %347 : f32
    %349 = arith.mulf %348, %322 : f32
    %350 = arith.minimumf %266, %278 : f32
    %351 = arith.minimumf %350, %290 : f32
    %352 = arith.maximumf %266, %278 : f32
    %353 = arith.maximumf %352, %290 : f32
    %354 = arith.minimumf %270, %282 : f32
    %355 = arith.minimumf %354, %294 : f32
    %356 = arith.maximumf %270, %282 : f32
    %357 = arith.maximumf %356, %294 : f32
    %cst_109 = arith.constant 0.000000e+00 : f32
    %358 = arith.cmpf oge, %353, %cst_109 : f32
    %359 = arith.andi %317, %358 : i1
    %cst_110 = arith.constant 1.600000e+01 : f32
    %360 = arith.cmpf ole, %351, %cst_110 : f32
    %361 = arith.andi %359, %360 : i1
    %cst_111 = arith.constant 0.000000e+00 : f32
    %362 = arith.cmpf oge, %357, %cst_111 : f32
    %363 = arith.andi %361, %362 : i1
    %cst_112 = arith.constant 1.600000e+01 : f32
    %364 = arith.cmpf ole, %355, %cst_112 : f32
    %365 = arith.andi %363, %364 : i1
    %cst_113 = arith.constant 0.000000e+00 : f32
    %366 = arith.cmpf oge, %357, %cst_113 : f32
    %367 = arith.andi %365, %366 : i1
    %cst_114 = arith.constant 1.600000e+01 : f32
    %368 = arith.cmpf ole, %355, %cst_114 : f32
    %369 = arith.andi %367, %368 : i1
    %370 = arith.extui %369 : i1 to i32
    %c0_i32_115 = arith.constant 0 : i32
    %371 = arith.cmpi ne, %370, %c0_i32_115 : i32
    scf.if %371 {
      %cst_312 = arith.constant 0.000000e+00 : f32
      %987 = arith.mulf %324, %cst_312 : f32
      %988 = arith.addf %325, %987 : f32
      %cst_313 = arith.constant 0.000000e+00 : f32
      %989 = arith.mulf %327, %cst_313 : f32
      %990 = arith.addf %328, %989 : f32
      %cst_314 = arith.constant 0.000000e+00 : f32
      %991 = arith.mulf %330, %cst_314 : f32
      %992 = arith.addf %331, %991 : f32
      %cst_315 = arith.constant 0.000000e+00 : f32
      %993 = arith.mulf %343, %cst_315 : f32
      %994 = arith.addf %349, %993 : f32
      %c0 = arith.constant 0 : index
      %c0_316 = arith.constant 0 : index
      %995 = vector.load %arg4[%c0, %c0_316] : memref<16x128xf32, #tpu.memory_space<vmem>>, vector<16x128xf32>
      %c0_317 = arith.constant 0 : index
      %c0_318 = arith.constant 0 : index
      %996 = vector.load %arg5[%c0_317, %c0_318] : memref<16x128xf32, #tpu.memory_space<vmem>>, vector<16x128xf32>
      %997 = vector.broadcast %323 : f32 to vector<16x128xf32>
      %998 = arith.mulf %997, %995 : vector<16x128xf32>
      %999 = vector.broadcast %324 : f32 to vector<16x128xf32>
      %1000 = arith.mulf %999, %996 : vector<16x128xf32>
      %1001 = arith.addf %998, %1000 : vector<16x128xf32>
      %1002 = vector.broadcast %988 : f32 to vector<16x128xf32>
      %1003 = arith.addf %1001, %1002 : vector<16x128xf32>
      %1004 = vector.broadcast %326 : f32 to vector<16x128xf32>
      %1005 = arith.mulf %1004, %995 : vector<16x128xf32>
      %1006 = vector.broadcast %327 : f32 to vector<16x128xf32>
      %1007 = arith.mulf %1006, %996 : vector<16x128xf32>
      %1008 = arith.addf %1005, %1007 : vector<16x128xf32>
      %1009 = vector.broadcast %990 : f32 to vector<16x128xf32>
      %1010 = arith.addf %1008, %1009 : vector<16x128xf32>
      %1011 = vector.broadcast %329 : f32 to vector<16x128xf32>
      %1012 = arith.mulf %1011, %995 : vector<16x128xf32>
      %1013 = vector.broadcast %330 : f32 to vector<16x128xf32>
      %1014 = arith.mulf %1013, %996 : vector<16x128xf32>
      %1015 = arith.addf %1012, %1014 : vector<16x128xf32>
      %1016 = vector.broadcast %992 : f32 to vector<16x128xf32>
      %1017 = arith.addf %1015, %1016 : vector<16x128xf32>
      %1018 = vector.broadcast %337 : f32 to vector<16x128xf32>
      %1019 = arith.mulf %1018, %995 : vector<16x128xf32>
      %1020 = vector.broadcast %343 : f32 to vector<16x128xf32>
      %1021 = arith.mulf %1020, %996 : vector<16x128xf32>
      %1022 = arith.addf %1019, %1021 : vector<16x128xf32>
      %1023 = vector.broadcast %994 : f32 to vector<16x128xf32>
      %1024 = arith.addf %1022, %1023 : vector<16x128xf32>
      %cst_319 = arith.constant 0.000000e+00 : f32
      %1025 = vector.broadcast %cst_319 : f32 to vector<16x128xf32>
      %1026 = arith.cmpf oge, %1003, %1025 : vector<16x128xf32>
      %cst_320 = arith.constant 0.000000e+00 : f32
      %1027 = vector.broadcast %cst_320 : f32 to vector<16x128xf32>
      %1028 = arith.cmpf oge, %1010, %1027 : vector<16x128xf32>
      %1029 = arith.andi %1026, %1028 : vector<16x128xi1>
      %cst_321 = arith.constant 0.000000e+00 : f32
      %1030 = vector.broadcast %cst_321 : f32 to vector<16x128xf32>
      %1031 = arith.cmpf oge, %1017, %1030 : vector<16x128xf32>
      %1032 = arith.andi %1029, %1031 : vector<16x128xi1>
      %cst_322 = arith.constant 1.000000e+30 : f32
      %1033 = vector.broadcast %cst_322 : f32 to vector<16x128xf32>
      %1034 = arith.select %1032, %1024, %1033 : vector<16x128xi1>, vector<16x128xf32>
      %c0_323 = arith.constant 0 : index
      %c0_324 = arith.constant 0 : index
      %1035 = vector.load %arg3[%c0_323, %c0_324] : memref<16x128xf32, #tpu.memory_space<vmem>>, vector<16x128xf32>
      %1036 = arith.minimumf %1035, %1034 : vector<16x128xf32>
      %c0_325 = arith.constant 0 : index
      %c0_326 = arith.constant 0 : index
      %1037 = vector.load %arg3[%c0_325, %c0_326] : memref<16x128xf32, #tpu.memory_space<vmem>>, vector<16x128xf32>
      tpu.vector_store %arg3[%c0_325, %c0_326], %1036 {strides = array<i32>} : memref<16x128xf32, #tpu.memory_space<vmem>>, vector<16x128xf32>,
    } else {
    }
    %c8_i32_116 = arith.constant 8 : i32
    %372 = arith.muli %arg0, %c8_i32_116 : i32
    %c3_i32_117 = arith.constant 3 : i32
    %373 = arith.addi %372, %c3_i32_117 : i32
    %c3_i32_118 = arith.constant 3 : i32
    %374 = arith.muli %c3_i32_118, %373 : i32
    %c0_i32_119 = arith.constant 0 : i32
    %375 = arith.addi %374, %c0_i32_119 : i32
    %376 = arith.index_cast %375 : i32 to index
    %377 = memref.load %arg1[%376] : memref<96xi32, #tpu.memory_space<smem>>
    %c3_i32_120 = arith.constant 3 : i32
    %378 = arith.muli %c3_i32_120, %373 : i32
    %c1_i32_121 = arith.constant 1 : i32
    %379 = arith.addi %378, %c1_i32_121 : i32
    %380 = arith.index_cast %379 : i32 to index
    %381 = memref.load %arg1[%380] : memref<96xi32, #tpu.memory_space<smem>>
    %c3_i32_122 = arith.constant 3 : i32
    %382 = arith.muli %c3_i32_122, %373 : i32
    %c2_i32_123 = arith.constant 2 : i32
    %383 = arith.addi %382, %c2_i32_123 : i32
    %384 = arith.index_cast %383 : i32 to index
    %385 = memref.load %arg1[%384] : memref<96xi32, #tpu.memory_space<smem>>
    %c3_i32_124 = arith.constant 3 : i32
    %386 = arith.muli %c3_i32_124, %377 : i32
    %c0_i32_125 = arith.constant 0 : i32
    %387 = arith.addi %386, %c0_i32_125 : i32
    %388 = arith.index_cast %387 : i32 to index
    %389 = memref.load %arg2[%388] : memref<192xf32, #tpu.memory_space<smem>>
    %c3_i32_126 = arith.constant 3 : i32
    %390 = arith.muli %c3_i32_126, %377 : i32
    %c1_i32_127 = arith.constant 1 : i32
    %391 = arith.addi %390, %c1_i32_127 : i32
    %392 = arith.index_cast %391 : i32 to index
    %393 = memref.load %arg2[%392] : memref<192xf32, #tpu.memory_space<smem>>
    %c3_i32_128 = arith.constant 3 : i32
    %394 = arith.muli %c3_i32_128, %377 : i32
    %c2_i32_129 = arith.constant 2 : i32
    %395 = arith.addi %394, %c2_i32_129 : i32
    %396 = arith.index_cast %395 : i32 to index
    %397 = memref.load %arg2[%396] : memref<192xf32, #tpu.memory_space<smem>>
    %c3_i32_130 = arith.constant 3 : i32
    %398 = arith.muli %c3_i32_130, %381 : i32
    %c0_i32_131 = arith.constant 0 : i32
    %399 = arith.addi %398, %c0_i32_131 : i32
    %400 = arith.index_cast %399 : i32 to index
    %401 = memref.load %arg2[%400] : memref<192xf32, #tpu.memory_space<smem>>
    %c3_i32_132 = arith.constant 3 : i32
    %402 = arith.muli %c3_i32_132, %381 : i32
    %c1_i32_133 = arith.constant 1 : i32
    %403 = arith.addi %402, %c1_i32_133 : i32
    %404 = arith.index_cast %403 : i32 to index
    %405 = memref.load %arg2[%404] : memref<192xf32, #tpu.memory_space<smem>>
    %c3_i32_134 = arith.constant 3 : i32
    %406 = arith.muli %c3_i32_134, %381 : i32
    %c2_i32_135 = arith.constant 2 : i32
    %407 = arith.addi %406, %c2_i32_135 : i32
    %408 = arith.index_cast %407 : i32 to index
    %409 = memref.load %arg2[%408] : memref<192xf32, #tpu.memory_space<smem>>
    %c3_i32_136 = arith.constant 3 : i32
    %410 = arith.muli %c3_i32_136, %385 : i32
    %c0_i32_137 = arith.constant 0 : i32
    %411 = arith.addi %410, %c0_i32_137 : i32
    %412 = arith.index_cast %411 : i32 to index
    %413 = memref.load %arg2[%412] : memref<192xf32, #tpu.memory_space<smem>>
    %c3_i32_138 = arith.constant 3 : i32
    %414 = arith.muli %c3_i32_138, %385 : i32
    %c1_i32_139 = arith.constant 1 : i32
    %415 = arith.addi %414, %c1_i32_139 : i32
    %416 = arith.index_cast %415 : i32 to index
    %417 = memref.load %arg2[%416] : memref<192xf32, #tpu.memory_space<smem>>
    %c3_i32_140 = arith.constant 3 : i32
    %418 = arith.muli %c3_i32_140, %385 : i32
    %c2_i32_141 = arith.constant 2 : i32
    %419 = arith.addi %418, %c2_i32_141 : i32
    %420 = arith.index_cast %419 : i32 to index
    %421 = memref.load %arg2[%420] : memref<192xf32, #tpu.memory_space<smem>>
    %422 = arith.subf %417, %405 : f32
    %423 = arith.subf %401, %413 : f32
    %424 = arith.mulf %405, %413 : f32
    %425 = arith.mulf %401, %417 : f32
    %426 = arith.subf %424, %425 : f32
    %427 = arith.subf %393, %417 : f32
    %428 = arith.subf %413, %389 : f32
    %429 = arith.mulf %417, %389 : f32
    %430 = arith.mulf %413, %393 : f32
    %431 = arith.subf %429, %430 : f32
    %432 = arith.subf %405, %393 : f32
    %433 = arith.subf %389, %401 : f32
    %434 = arith.mulf %393, %401 : f32
    %435 = arith.mulf %389, %405 : f32
    %436 = arith.subf %434, %435 : f32
    %437 = arith.addf %426, %431 : f32
    %438 = arith.addf %437, %436 : f32
    %439 = math.absf %438 : f32
    %cst_142 = arith.constant 9.99999997E-7 : f32
    %440 = arith.cmpf ogt, %439, %cst_142 : f32
    %cst_143 = arith.constant 0.000000e+00 : f32
    %441 = arith.cmpf oge, %438, %cst_143 : f32
    %cst_144 = arith.constant 1.000000e+00 : f32
    %cst_145 = arith.constant -1.000000e+00 : f32
    %442 = arith.select %441, %cst_144, %cst_145 : f32
    %cst_146 = arith.constant 1.000000e+00 : f32
    %443 = arith.select %440, %439, %cst_146 : f32
    %cst_147 = arith.constant 1.000000e+00 : f32
    %444 = arith.divf %cst_147, %443 : f32
    %cst_148 = arith.constant 0.000000e+00 : f32
    %445 = arith.select %440, %444, %cst_148 : f32
    %446 = arith.mulf %442, %422 : f32
    %447 = arith.mulf %442, %423 : f32
    %448 = arith.mulf %442, %426 : f32
    %449 = arith.mulf %442, %427 : f32
    %450 = arith.mulf %442, %428 : f32
    %451 = arith.mulf %442, %431 : f32
    %452 = arith.mulf %442, %432 : f32
    %453 = arith.mulf %442, %433 : f32
    %454 = arith.mulf %442, %436 : f32
    %455 = arith.mulf %446, %397 : f32
    %456 = arith.mulf %449, %409 : f32
    %457 = arith.addf %455, %456 : f32
    %458 = arith.mulf %452, %421 : f32
    %459 = arith.addf %457, %458 : f32
    %460 = arith.mulf %459, %445 : f32
    %461 = arith.mulf %447, %397 : f32
    %462 = arith.mulf %450, %409 : f32
    %463 = arith.addf %461, %462 : f32
    %464 = arith.mulf %453, %421 : f32
    %465 = arith.addf %463, %464 : f32
    %466 = arith.mulf %465, %445 : f32
    %467 = arith.mulf %448, %397 : f32
    %468 = arith.mulf %451, %409 : f32
    %469 = arith.addf %467, %468 : f32
    %470 = arith.mulf %454, %421 : f32
    %471 = arith.addf %469, %470 : f32
    %472 = arith.mulf %471, %445 : f32
    %473 = arith.minimumf %389, %401 : f32
    %474 = arith.minimumf %473, %413 : f32
    %475 = arith.maximumf %389, %401 : f32
    %476 = arith.maximumf %475, %413 : f32
    %477 = arith.minimumf %393, %405 : f32
    %478 = arith.minimumf %477, %417 : f32
    %479 = arith.maximumf %393, %405 : f32
    %480 = arith.maximumf %479, %417 : f32
    %cst_149 = arith.constant 0.000000e+00 : f32
    %481 = arith.cmpf oge, %476, %cst_149 : f32
    %482 = arith.andi %440, %481 : i1
    %cst_150 = arith.constant 1.600000e+01 : f32
    %483 = arith.cmpf ole, %474, %cst_150 : f32
    %484 = arith.andi %482, %483 : i1
    %cst_151 = arith.constant 0.000000e+00 : f32
    %485 = arith.cmpf oge, %480, %cst_151 : f32
    %486 = arith.andi %484, %485 : i1
    %cst_152 = arith.constant 1.600000e+01 : f32
    %487 = arith.cmpf ole, %478, %cst_152 : f32
    %488 = arith.andi %486, %487 : i1
    %cst_153 = arith.constant 0.000000e+00 : f32
    %489 = arith.cmpf oge, %480, %cst_153 : f32
    %490 = arith.andi %488, %489 : i1
    %cst_154 = arith.constant 1.600000e+01 : f32
    %491 = arith.cmpf ole, %478, %cst_154 : f32
    %492 = arith.andi %490, %491 : i1
    %493 = arith.extui %492 : i1 to i32
    %c0_i32_155 = arith.constant 0 : i32
    %494 = arith.cmpi ne, %493, %c0_i32_155 : i32
    scf.if %494 {
      %cst_312 = arith.constant 0.000000e+00 : f32
      %987 = arith.mulf %447, %cst_312 : f32
      %988 = arith.addf %448, %987 : f32
      %cst_313 = arith.constant 0.000000e+00 : f32
      %989 = arith.mulf %450, %cst_313 : f32
      %990 = arith.addf %451, %989 : f32
      %cst_314 = arith.constant 0.000000e+00 : f32
      %991 = arith.mulf %453, %cst_314 : f32
      %992 = arith.addf %454, %991 : f32
      %cst_315 = arith.constant 0.000000e+00 : f32
      %993 = arith.mulf %466, %cst_315 : f32
      %994 = arith.addf %472, %993 : f32
      %c0 = arith.constant 0 : index
      %c0_316 = arith.constant 0 : index
      %995 = vector.load %arg4[%c0, %c0_316] : memref<16x128xf32, #tpu.memory_space<vmem>>, vector<16x128xf32>
      %c0_317 = arith.constant 0 : index
      %c0_318 = arith.constant 0 : index
      %996 = vector.load %arg5[%c0_317, %c0_318] : memref<16x128xf32, #tpu.memory_space<vmem>>, vector<16x128xf32>
      %997 = vector.broadcast %446 : f32 to vector<16x128xf32>
      %998 = arith.mulf %997, %995 : vector<16x128xf32>
      %999 = vector.broadcast %447 : f32 to vector<16x128xf32>
      %1000 = arith.mulf %999, %996 : vector<16x128xf32>
      %1001 = arith.addf %998, %1000 : vector<16x128xf32>
      %1002 = vector.broadcast %988 : f32 to vector<16x128xf32>
      %1003 = arith.addf %1001, %1002 : vector<16x128xf32>
      %1004 = vector.broadcast %449 : f32 to vector<16x128xf32>
      %1005 = arith.mulf %1004, %995 : vector<16x128xf32>
      %1006 = vector.broadcast %450 : f32 to vector<16x128xf32>
      %1007 = arith.mulf %1006, %996 : vector<16x128xf32>
      %1008 = arith.addf %1005, %1007 : vector<16x128xf32>
      %1009 = vector.broadcast %990 : f32 to vector<16x128xf32>
      %1010 = arith.addf %1008, %1009 : vector<16x128xf32>
      %1011 = vector.broadcast %452 : f32 to vector<16x128xf32>
      %1012 = arith.mulf %1011, %995 : vector<16x128xf32>
      %1013 = vector.broadcast %453 : f32 to vector<16x128xf32>
      %1014 = arith.mulf %1013, %996 : vector<16x128xf32>
      %1015 = arith.addf %1012, %1014 : vector<16x128xf32>
      %1016 = vector.broadcast %992 : f32 to vector<16x128xf32>
      %1017 = arith.addf %1015, %1016 : vector<16x128xf32>
      %1018 = vector.broadcast %460 : f32 to vector<16x128xf32>
      %1019 = arith.mulf %1018, %995 : vector<16x128xf32>
      %1020 = vector.broadcast %466 : f32 to vector<16x128xf32>
      %1021 = arith.mulf %1020, %996 : vector<16x128xf32>
      %1022 = arith.addf %1019, %1021 : vector<16x128xf32>
      %1023 = vector.broadcast %994 : f32 to vector<16x128xf32>
      %1024 = arith.addf %1022, %1023 : vector<16x128xf32>
      %cst_319 = arith.constant 0.000000e+00 : f32
      %1025 = vector.broadcast %cst_319 : f32 to vector<16x128xf32>
      %1026 = arith.cmpf oge, %1003, %1025 : vector<16x128xf32>
      %cst_320 = arith.constant 0.000000e+00 : f32
      %1027 = vector.broadcast %cst_320 : f32 to vector<16x128xf32>
      %1028 = arith.cmpf oge, %1010, %1027 : vector<16x128xf32>
      %1029 = arith.andi %1026, %1028 : vector<16x128xi1>
      %cst_321 = arith.constant 0.000000e+00 : f32
      %1030 = vector.broadcast %cst_321 : f32 to vector<16x128xf32>
      %1031 = arith.cmpf oge, %1017, %1030 : vector<16x128xf32>
      %1032 = arith.andi %1029, %1031 : vector<16x128xi1>
      %cst_322 = arith.constant 1.000000e+30 : f32
      %1033 = vector.broadcast %cst_322 : f32 to vector<16x128xf32>
      %1034 = arith.select %1032, %1024, %1033 : vector<16x128xi1>, vector<16x128xf32>
      %c0_323 = arith.constant 0 : index
      %c0_324 = arith.constant 0 : index
      %1035 = vector.load %arg3[%c0_323, %c0_324] : memref<16x128xf32, #tpu.memory_space<vmem>>, vector<16x128xf32>
      %1036 = arith.minimumf %1035, %1034 : vector<16x128xf32>
      %c0_325 = arith.constant 0 : index
      %c0_326 = arith.constant 0 : index
      %1037 = vector.load %arg3[%c0_325, %c0_326] : memref<16x128xf32, #tpu.memory_space<vmem>>, vector<16x128xf32>
      tpu.vector_store %arg3[%c0_325, %c0_326], %1036 {strides = array<i32>} : memref<16x128xf32, #tpu.memory_space<vmem>>, vector<16x128xf32>,
    } else {
    }
    %c8_i32_156 = arith.constant 8 : i32
    %495 = arith.muli %arg0, %c8_i32_156 : i32
    %c4_i32 = arith.constant 4 : i32
    %496 = arith.addi %495, %c4_i32 : i32
    %c3_i32_157 = arith.constant 3 : i32
    %497 = arith.muli %c3_i32_157, %496 : i32
    %c0_i32_158 = arith.constant 0 : i32
    %498 = arith.addi %497, %c0_i32_158 : i32
    %499 = arith.index_cast %498 : i32 to index
    %500 = memref.load %arg1[%499] : memref<96xi32, #tpu.memory_space<smem>>
    %c3_i32_159 = arith.constant 3 : i32
    %501 = arith.muli %c3_i32_159, %496 : i32
    %c1_i32_160 = arith.constant 1 : i32
    %502 = arith.addi %501, %c1_i32_160 : i32
    %503 = arith.index_cast %502 : i32 to index
    %504 = memref.load %arg1[%503] : memref<96xi32, #tpu.memory_space<smem>>
    %c3_i32_161 = arith.constant 3 : i32
    %505 = arith.muli %c3_i32_161, %496 : i32
    %c2_i32_162 = arith.constant 2 : i32
    %506 = arith.addi %505, %c2_i32_162 : i32
    %507 = arith.index_cast %506 : i32 to index
    %508 = memref.load %arg1[%507] : memref<96xi32, #tpu.memory_space<smem>>
    %c3_i32_163 = arith.constant 3 : i32
    %509 = arith.muli %c3_i32_163, %500 : i32
    %c0_i32_164 = arith.constant 0 : i32
    %510 = arith.addi %509, %c0_i32_164 : i32
    %511 = arith.index_cast %510 : i32 to index
    %512 = memref.load %arg2[%511] : memref<192xf32, #tpu.memory_space<smem>>
    %c3_i32_165 = arith.constant 3 : i32
    %513 = arith.muli %c3_i32_165, %500 : i32
    %c1_i32_166 = arith.constant 1 : i32
    %514 = arith.addi %513, %c1_i32_166 : i32
    %515 = arith.index_cast %514 : i32 to index
    %516 = memref.load %arg2[%515] : memref<192xf32, #tpu.memory_space<smem>>
    %c3_i32_167 = arith.constant 3 : i32
    %517 = arith.muli %c3_i32_167, %500 : i32
    %c2_i32_168 = arith.constant 2 : i32
    %518 = arith.addi %517, %c2_i32_168 : i32
    %519 = arith.index_cast %518 : i32 to index
    %520 = memref.load %arg2[%519] : memref<192xf32, #tpu.memory_space<smem>>
    %c3_i32_169 = arith.constant 3 : i32
    %521 = arith.muli %c3_i32_169, %504 : i32
    %c0_i32_170 = arith.constant 0 : i32
    %522 = arith.addi %521, %c0_i32_170 : i32
    %523 = arith.index_cast %522 : i32 to index
    %524 = memref.load %arg2[%523] : memref<192xf32, #tpu.memory_space<smem>>
    %c3_i32_171 = arith.constant 3 : i32
    %525 = arith.muli %c3_i32_171, %504 : i32
    %c1_i32_172 = arith.constant 1 : i32
    %526 = arith.addi %525, %c1_i32_172 : i32
    %527 = arith.index_cast %526 : i32 to index
    %528 = memref.load %arg2[%527] : memref<192xf32, #tpu.memory_space<smem>>
    %c3_i32_173 = arith.constant 3 : i32
    %529 = arith.muli %c3_i32_173, %504 : i32
    %c2_i32_174 = arith.constant 2 : i32
    %530 = arith.addi %529, %c2_i32_174 : i32
    %531 = arith.index_cast %530 : i32 to index
    %532 = memref.load %arg2[%531] : memref<192xf32, #tpu.memory_space<smem>>
    %c3_i32_175 = arith.constant 3 : i32
    %533 = arith.muli %c3_i32_175, %508 : i32
    %c0_i32_176 = arith.constant 0 : i32
    %534 = arith.addi %533, %c0_i32_176 : i32
    %535 = arith.index_cast %534 : i32 to index
    %536 = memref.load %arg2[%535] : memref<192xf32, #tpu.memory_space<smem>>
    %c3_i32_177 = arith.constant 3 : i32
    %537 = arith.muli %c3_i32_177, %508 : i32
    %c1_i32_178 = arith.constant 1 : i32
    %538 = arith.addi %537, %c1_i32_178 : i32
    %539 = arith.index_cast %538 : i32 to index
    %540 = memref.load %arg2[%539] : memref<192xf32, #tpu.memory_space<smem>>
    %c3_i32_179 = arith.constant 3 : i32
    %541 = arith.muli %c3_i32_179, %508 : i32
    %c2_i32_180 = arith.constant 2 : i32
    %542 = arith.addi %541, %c2_i32_180 : i32
    %543 = arith.index_cast %542 : i32 to index
    %544 = memref.load %arg2[%543] : memref<192xf32, #tpu.memory_space<smem>>
    %545 = arith.subf %540, %528 : f32
    %546 = arith.subf %524, %536 : f32
    %547 = arith.mulf %528, %536 : f32
    %548 = arith.mulf %524, %540 : f32
    %549 = arith.subf %547, %548 : f32
    %550 = arith.subf %516, %540 : f32
    %551 = arith.subf %536, %512 : f32
    %552 = arith.mulf %540, %512 : f32
    %553 = arith.mulf %536, %516 : f32
    %554 = arith.subf %552, %553 : f32
    %555 = arith.subf %528, %516 : f32
    %556 = arith.subf %512, %524 : f32
    %557 = arith.mulf %516, %524 : f32
    %558 = arith.mulf %512, %528 : f32
    %559 = arith.subf %557, %558 : f32
    %560 = arith.addf %549, %554 : f32
    %561 = arith.addf %560, %559 : f32
    %562 = math.absf %561 : f32
    %cst_181 = arith.constant 9.99999997E-7 : f32
    %563 = arith.cmpf ogt, %562, %cst_181 : f32
    %cst_182 = arith.constant 0.000000e+00 : f32
    %564 = arith.cmpf oge, %561, %cst_182 : f32
    %cst_183 = arith.constant 1.000000e+00 : f32
    %cst_184 = arith.constant -1.000000e+00 : f32
    %565 = arith.select %564, %cst_183, %cst_184 : f32
    %cst_185 = arith.constant 1.000000e+00 : f32
    %566 = arith.select %563, %562, %cst_185 : f32
    %cst_186 = arith.constant 1.000000e+00 : f32
    %567 = arith.divf %cst_186, %566 : f32
    %cst_187 = arith.constant 0.000000e+00 : f32
    %568 = arith.select %563, %567, %cst_187 : f32
    %569 = arith.mulf %565, %545 : f32
    %570 = arith.mulf %565, %546 : f32
    %571 = arith.mulf %565, %549 : f32
    %572 = arith.mulf %565, %550 : f32
    %573 = arith.mulf %565, %551 : f32
    %574 = arith.mulf %565, %554 : f32
    %575 = arith.mulf %565, %555 : f32
    %576 = arith.mulf %565, %556 : f32
    %577 = arith.mulf %565, %559 : f32
    %578 = arith.mulf %569, %520 : f32
    %579 = arith.mulf %572, %532 : f32
    %580 = arith.addf %578, %579 : f32
    %581 = arith.mulf %575, %544 : f32
    %582 = arith.addf %580, %581 : f32
    %583 = arith.mulf %582, %568 : f32
    %584 = arith.mulf %570, %520 : f32
    %585 = arith.mulf %573, %532 : f32
    %586 = arith.addf %584, %585 : f32
    %587 = arith.mulf %576, %544 : f32
    %588 = arith.addf %586, %587 : f32
    %589 = arith.mulf %588, %568 : f32
    %590 = arith.mulf %571, %520 : f32
    %591 = arith.mulf %574, %532 : f32
    %592 = arith.addf %590, %591 : f32
    %593 = arith.mulf %577, %544 : f32
    %594 = arith.addf %592, %593 : f32
    %595 = arith.mulf %594, %568 : f32
    %596 = arith.minimumf %512, %524 : f32
    %597 = arith.minimumf %596, %536 : f32
    %598 = arith.maximumf %512, %524 : f32
    %599 = arith.maximumf %598, %536 : f32
    %600 = arith.minimumf %516, %528 : f32
    %601 = arith.minimumf %600, %540 : f32
    %602 = arith.maximumf %516, %528 : f32
    %603 = arith.maximumf %602, %540 : f32
    %cst_188 = arith.constant 0.000000e+00 : f32
    %604 = arith.cmpf oge, %599, %cst_188 : f32
    %605 = arith.andi %563, %604 : i1
    %cst_189 = arith.constant 1.600000e+01 : f32
    %606 = arith.cmpf ole, %597, %cst_189 : f32
    %607 = arith.andi %605, %606 : i1
    %cst_190 = arith.constant 0.000000e+00 : f32
    %608 = arith.cmpf oge, %603, %cst_190 : f32
    %609 = arith.andi %607, %608 : i1
    %cst_191 = arith.constant 1.600000e+01 : f32
    %610 = arith.cmpf ole, %601, %cst_191 : f32
    %611 = arith.andi %609, %610 : i1
    %cst_192 = arith.constant 0.000000e+00 : f32
    %612 = arith.cmpf oge, %603, %cst_192 : f32
    %613 = arith.andi %611, %612 : i1
    %cst_193 = arith.constant 1.600000e+01 : f32
    %614 = arith.cmpf ole, %601, %cst_193 : f32
    %615 = arith.andi %613, %614 : i1
    %616 = arith.extui %615 : i1 to i32
    %c0_i32_194 = arith.constant 0 : i32
    %617 = arith.cmpi ne, %616, %c0_i32_194 : i32
    scf.if %617 {
      %cst_312 = arith.constant 0.000000e+00 : f32
      %987 = arith.mulf %570, %cst_312 : f32
      %988 = arith.addf %571, %987 : f32
      %cst_313 = arith.constant 0.000000e+00 : f32
      %989 = arith.mulf %573, %cst_313 : f32
      %990 = arith.addf %574, %989 : f32
      %cst_314 = arith.constant 0.000000e+00 : f32
      %991 = arith.mulf %576, %cst_314 : f32
      %992 = arith.addf %577, %991 : f32
      %cst_315 = arith.constant 0.000000e+00 : f32
      %993 = arith.mulf %589, %cst_315 : f32
      %994 = arith.addf %595, %993 : f32
      %c0 = arith.constant 0 : index
      %c0_316 = arith.constant 0 : index
      %995 = vector.load %arg4[%c0, %c0_316] : memref<16x128xf32, #tpu.memory_space<vmem>>, vector<16x128xf32>
      %c0_317 = arith.constant 0 : index
      %c0_318 = arith.constant 0 : index
      %996 = vector.load %arg5[%c0_317, %c0_318] : memref<16x128xf32, #tpu.memory_space<vmem>>, vector<16x128xf32>
      %997 = vector.broadcast %569 : f32 to vector<16x128xf32>
      %998 = arith.mulf %997, %995 : vector<16x128xf32>
      %999 = vector.broadcast %570 : f32 to vector<16x128xf32>
      %1000 = arith.mulf %999, %996 : vector<16x128xf32>
      %1001 = arith.addf %998, %1000 : vector<16x128xf32>
      %1002 = vector.broadcast %988 : f32 to vector<16x128xf32>
      %1003 = arith.addf %1001, %1002 : vector<16x128xf32>
      %1004 = vector.broadcast %572 : f32 to vector<16x128xf32>
      %1005 = arith.mulf %1004, %995 : vector<16x128xf32>
      %1006 = vector.broadcast %573 : f32 to vector<16x128xf32>
      %1007 = arith.mulf %1006, %996 : vector<16x128xf32>
      %1008 = arith.addf %1005, %1007 : vector<16x128xf32>
      %1009 = vector.broadcast %990 : f32 to vector<16x128xf32>
      %1010 = arith.addf %1008, %1009 : vector<16x128xf32>
      %1011 = vector.broadcast %575 : f32 to vector<16x128xf32>
      %1012 = arith.mulf %1011, %995 : vector<16x128xf32>
      %1013 = vector.broadcast %576 : f32 to vector<16x128xf32>
      %1014 = arith.mulf %1013, %996 : vector<16x128xf32>
      %1015 = arith.addf %1012, %1014 : vector<16x128xf32>
      %1016 = vector.broadcast %992 : f32 to vector<16x128xf32>
      %1017 = arith.addf %1015, %1016 : vector<16x128xf32>
      %1018 = vector.broadcast %583 : f32 to vector<16x128xf32>
      %1019 = arith.mulf %1018, %995 : vector<16x128xf32>
      %1020 = vector.broadcast %589 : f32 to vector<16x128xf32>
      %1021 = arith.mulf %1020, %996 : vector<16x128xf32>
      %1022 = arith.addf %1019, %1021 : vector<16x128xf32>
      %1023 = vector.broadcast %994 : f32 to vector<16x128xf32>
      %1024 = arith.addf %1022, %1023 : vector<16x128xf32>
      %cst_319 = arith.constant 0.000000e+00 : f32
      %1025 = vector.broadcast %cst_319 : f32 to vector<16x128xf32>
      %1026 = arith.cmpf oge, %1003, %1025 : vector<16x128xf32>
      %cst_320 = arith.constant 0.000000e+00 : f32
      %1027 = vector.broadcast %cst_320 : f32 to vector<16x128xf32>
      %1028 = arith.cmpf oge, %1010, %1027 : vector<16x128xf32>
      %1029 = arith.andi %1026, %1028 : vector<16x128xi1>
      %cst_321 = arith.constant 0.000000e+00 : f32
      %1030 = vector.broadcast %cst_321 : f32 to vector<16x128xf32>
      %1031 = arith.cmpf oge, %1017, %1030 : vector<16x128xf32>
      %1032 = arith.andi %1029, %1031 : vector<16x128xi1>
      %cst_322 = arith.constant 1.000000e+30 : f32
      %1033 = vector.broadcast %cst_322 : f32 to vector<16x128xf32>
      %1034 = arith.select %1032, %1024, %1033 : vector<16x128xi1>, vector<16x128xf32>
      %c0_323 = arith.constant 0 : index
      %c0_324 = arith.constant 0 : index
      %1035 = vector.load %arg3[%c0_323, %c0_324] : memref<16x128xf32, #tpu.memory_space<vmem>>, vector<16x128xf32>
      %1036 = arith.minimumf %1035, %1034 : vector<16x128xf32>
      %c0_325 = arith.constant 0 : index
      %c0_326 = arith.constant 0 : index
      %1037 = vector.load %arg3[%c0_325, %c0_326] : memref<16x128xf32, #tpu.memory_space<vmem>>, vector<16x128xf32>
      tpu.vector_store %arg3[%c0_325, %c0_326], %1036 {strides = array<i32>} : memref<16x128xf32, #tpu.memory_space<vmem>>, vector<16x128xf32>,
    } else {
    }
    %c8_i32_195 = arith.constant 8 : i32
    %618 = arith.muli %arg0, %c8_i32_195 : i32
    %c5_i32 = arith.constant 5 : i32
    %619 = arith.addi %618, %c5_i32 : i32
    %c3_i32_196 = arith.constant 3 : i32
    %620 = arith.muli %c3_i32_196, %619 : i32
    %c0_i32_197 = arith.constant 0 : i32
    %621 = arith.addi %620, %c0_i32_197 : i32
    %622 = arith.index_cast %621 : i32 to index
    %623 = memref.load %arg1[%622] : memref<96xi32, #tpu.memory_space<smem>>
    %c3_i32_198 = arith.constant 3 : i32
    %624 = arith.muli %c3_i32_198, %619 : i32
    %c1_i32_199 = arith.constant 1 : i32
    %625 = arith.addi %624, %c1_i32_199 : i32
    %626 = arith.index_cast %625 : i32 to index
    %627 = memref.load %arg1[%626] : memref<96xi32, #tpu.memory_space<smem>>
    %c3_i32_200 = arith.constant 3 : i32
    %628 = arith.muli %c3_i32_200, %619 : i32
    %c2_i32_201 = arith.constant 2 : i32
    %629 = arith.addi %628, %c2_i32_201 : i32
    %630 = arith.index_cast %629 : i32 to index
    %631 = memref.load %arg1[%630] : memref<96xi32, #tpu.memory_space<smem>>
    %c3_i32_202 = arith.constant 3 : i32
    %632 = arith.muli %c3_i32_202, %623 : i32
    %c0_i32_203 = arith.constant 0 : i32
    %633 = arith.addi %632, %c0_i32_203 : i32
    %634 = arith.index_cast %633 : i32 to index
    %635 = memref.load %arg2[%634] : memref<192xf32, #tpu.memory_space<smem>>
    %c3_i32_204 = arith.constant 3 : i32
    %636 = arith.muli %c3_i32_204, %623 : i32
    %c1_i32_205 = arith.constant 1 : i32
    %637 = arith.addi %636, %c1_i32_205 : i32
    %638 = arith.index_cast %637 : i32 to index
    %639 = memref.load %arg2[%638] : memref<192xf32, #tpu.memory_space<smem>>
    %c3_i32_206 = arith.constant 3 : i32
    %640 = arith.muli %c3_i32_206, %623 : i32
    %c2_i32_207 = arith.constant 2 : i32
    %641 = arith.addi %640, %c2_i32_207 : i32
    %642 = arith.index_cast %641 : i32 to index
    %643 = memref.load %arg2[%642] : memref<192xf32, #tpu.memory_space<smem>>
    %c3_i32_208 = arith.constant 3 : i32
    %644 = arith.muli %c3_i32_208, %627 : i32
    %c0_i32_209 = arith.constant 0 : i32
    %645 = arith.addi %644, %c0_i32_209 : i32
    %646 = arith.index_cast %645 : i32 to index
    %647 = memref.load %arg2[%646] : memref<192xf32, #tpu.memory_space<smem>>
    %c3_i32_210 = arith.constant 3 : i32
    %648 = arith.muli %c3_i32_210, %627 : i32
    %c1_i32_211 = arith.constant 1 : i32
    %649 = arith.addi %648, %c1_i32_211 : i32
    %650 = arith.index_cast %649 : i32 to index
    %651 = memref.load %arg2[%650] : memref<192xf32, #tpu.memory_space<smem>>
    %c3_i32_212 = arith.constant 3 : i32
    %652 = arith.muli %c3_i32_212, %627 : i32
    %c2_i32_213 = arith.constant 2 : i32
    %653 = arith.addi %652, %c2_i32_213 : i32
    %654 = arith.index_cast %653 : i32 to index
    %655 = memref.load %arg2[%654] : memref<192xf32, #tpu.memory_space<smem>>
    %c3_i32_214 = arith.constant 3 : i32
    %656 = arith.muli %c3_i32_214, %631 : i32
    %c0_i32_215 = arith.constant 0 : i32
    %657 = arith.addi %656, %c0_i32_215 : i32
    %658 = arith.index_cast %657 : i32 to index
    %659 = memref.load %arg2[%658] : memref<192xf32, #tpu.memory_space<smem>>
    %c3_i32_216 = arith.constant 3 : i32
    %660 = arith.muli %c3_i32_216, %631 : i32
    %c1_i32_217 = arith.constant 1 : i32
    %661 = arith.addi %660, %c1_i32_217 : i32
    %662 = arith.index_cast %661 : i32 to index
    %663 = memref.load %arg2[%662] : memref<192xf32, #tpu.memory_space<smem>>
    %c3_i32_218 = arith.constant 3 : i32
    %664 = arith.muli %c3_i32_218, %631 : i32
    %c2_i32_219 = arith.constant 2 : i32
    %665 = arith.addi %664, %c2_i32_219 : i32
    %666 = arith.index_cast %665 : i32 to index
    %667 = memref.load %arg2[%666] : memref<192xf32, #tpu.memory_space<smem>>
    %668 = arith.subf %663, %651 : f32
    %669 = arith.subf %647, %659 : f32
    %670 = arith.mulf %651, %659 : f32
    %671 = arith.mulf %647, %663 : f32
    %672 = arith.subf %670, %671 : f32
    %673 = arith.subf %639, %663 : f32
    %674 = arith.subf %659, %635 : f32
    %675 = arith.mulf %663, %635 : f32
    %676 = arith.mulf %659, %639 : f32
    %677 = arith.subf %675, %676 : f32
    %678 = arith.subf %651, %639 : f32
    %679 = arith.subf %635, %647 : f32
    %680 = arith.mulf %639, %647 : f32
    %681 = arith.mulf %635, %651 : f32
    %682 = arith.subf %680, %681 : f32
    %683 = arith.addf %672, %677 : f32
    %684 = arith.addf %683, %682 : f32
    %685 = math.absf %684 : f32
    %cst_220 = arith.constant 9.99999997E-7 : f32
    %686 = arith.cmpf ogt, %685, %cst_220 : f32
    %cst_221 = arith.constant 0.000000e+00 : f32
    %687 = arith.cmpf oge, %684, %cst_221 : f32
    %cst_222 = arith.constant 1.000000e+00 : f32
    %cst_223 = arith.constant -1.000000e+00 : f32
    %688 = arith.select %687, %cst_222, %cst_223 : f32
    %cst_224 = arith.constant 1.000000e+00 : f32
    %689 = arith.select %686, %685, %cst_224 : f32
    %cst_225 = arith.constant 1.000000e+00 : f32
    %690 = arith.divf %cst_225, %689 : f32
    %cst_226 = arith.constant 0.000000e+00 : f32
    %691 = arith.select %686, %690, %cst_226 : f32
    %692 = arith.mulf %688, %668 : f32
    %693 = arith.mulf %688, %669 : f32
    %694 = arith.mulf %688, %672 : f32
    %695 = arith.mulf %688, %673 : f32
    %696 = arith.mulf %688, %674 : f32
    %697 = arith.mulf %688, %677 : f32
    %698 = arith.mulf %688, %678 : f32
    %699 = arith.mulf %688, %679 : f32
    %700 = arith.mulf %688, %682 : f32
    %701 = arith.mulf %692, %643 : f32
    %702 = arith.mulf %695, %655 : f32
    %703 = arith.addf %701, %702 : f32
    %704 = arith.mulf %698, %667 : f32
    %705 = arith.addf %703, %704 : f32
    %706 = arith.mulf %705, %691 : f32
    %707 = arith.mulf %693, %643 : f32
    %708 = arith.mulf %696, %655 : f32
    %709 = arith.addf %707, %708 : f32
    %710 = arith.mulf %699, %667 : f32
    %711 = arith.addf %709, %710 : f32
    %712 = arith.mulf %711, %691 : f32
    %713 = arith.mulf %694, %643 : f32
    %714 = arith.mulf %697, %655 : f32
    %715 = arith.addf %713, %714 : f32
    %716 = arith.mulf %700, %667 : f32
    %717 = arith.addf %715, %716 : f32
    %718 = arith.mulf %717, %691 : f32
    %719 = arith.minimumf %635, %647 : f32
    %720 = arith.minimumf %719, %659 : f32
    %721 = arith.maximumf %635, %647 : f32
    %722 = arith.maximumf %721, %659 : f32
    %723 = arith.minimumf %639, %651 : f32
    %724 = arith.minimumf %723, %663 : f32
    %725 = arith.maximumf %639, %651 : f32
    %726 = arith.maximumf %725, %663 : f32
    %cst_227 = arith.constant 0.000000e+00 : f32
    %727 = arith.cmpf oge, %722, %cst_227 : f32
    %728 = arith.andi %686, %727 : i1
    %cst_228 = arith.constant 1.600000e+01 : f32
    %729 = arith.cmpf ole, %720, %cst_228 : f32
    %730 = arith.andi %728, %729 : i1
    %cst_229 = arith.constant 0.000000e+00 : f32
    %731 = arith.cmpf oge, %726, %cst_229 : f32
    %732 = arith.andi %730, %731 : i1
    %cst_230 = arith.constant 1.600000e+01 : f32
    %733 = arith.cmpf ole, %724, %cst_230 : f32
    %734 = arith.andi %732, %733 : i1
    %cst_231 = arith.constant 0.000000e+00 : f32
    %735 = arith.cmpf oge, %726, %cst_231 : f32
    %736 = arith.andi %734, %735 : i1
    %cst_232 = arith.constant 1.600000e+01 : f32
    %737 = arith.cmpf ole, %724, %cst_232 : f32
    %738 = arith.andi %736, %737 : i1
    %739 = arith.extui %738 : i1 to i32
    %c0_i32_233 = arith.constant 0 : i32
    %740 = arith.cmpi ne, %739, %c0_i32_233 : i32
    scf.if %740 {
      %cst_312 = arith.constant 0.000000e+00 : f32
      %987 = arith.mulf %693, %cst_312 : f32
      %988 = arith.addf %694, %987 : f32
      %cst_313 = arith.constant 0.000000e+00 : f32
      %989 = arith.mulf %696, %cst_313 : f32
      %990 = arith.addf %697, %989 : f32
      %cst_314 = arith.constant 0.000000e+00 : f32
      %991 = arith.mulf %699, %cst_314 : f32
      %992 = arith.addf %700, %991 : f32
      %cst_315 = arith.constant 0.000000e+00 : f32
      %993 = arith.mulf %712, %cst_315 : f32
      %994 = arith.addf %718, %993 : f32
      %c0 = arith.constant 0 : index
      %c0_316 = arith.constant 0 : index
      %995 = vector.load %arg4[%c0, %c0_316] : memref<16x128xf32, #tpu.memory_space<vmem>>, vector<16x128xf32>
      %c0_317 = arith.constant 0 : index
      %c0_318 = arith.constant 0 : index
      %996 = vector.load %arg5[%c0_317, %c0_318] : memref<16x128xf32, #tpu.memory_space<vmem>>, vector<16x128xf32>
      %997 = vector.broadcast %692 : f32 to vector<16x128xf32>
      %998 = arith.mulf %997, %995 : vector<16x128xf32>
      %999 = vector.broadcast %693 : f32 to vector<16x128xf32>
      %1000 = arith.mulf %999, %996 : vector<16x128xf32>
      %1001 = arith.addf %998, %1000 : vector<16x128xf32>
      %1002 = vector.broadcast %988 : f32 to vector<16x128xf32>
      %1003 = arith.addf %1001, %1002 : vector<16x128xf32>
      %1004 = vector.broadcast %695 : f32 to vector<16x128xf32>
      %1005 = arith.mulf %1004, %995 : vector<16x128xf32>
      %1006 = vector.broadcast %696 : f32 to vector<16x128xf32>
      %1007 = arith.mulf %1006, %996 : vector<16x128xf32>
      %1008 = arith.addf %1005, %1007 : vector<16x128xf32>
      %1009 = vector.broadcast %990 : f32 to vector<16x128xf32>
      %1010 = arith.addf %1008, %1009 : vector<16x128xf32>
      %1011 = vector.broadcast %698 : f32 to vector<16x128xf32>
      %1012 = arith.mulf %1011, %995 : vector<16x128xf32>
      %1013 = vector.broadcast %699 : f32 to vector<16x128xf32>
      %1014 = arith.mulf %1013, %996 : vector<16x128xf32>
      %1015 = arith.addf %1012, %1014 : vector<16x128xf32>
      %1016 = vector.broadcast %992 : f32 to vector<16x128xf32>
      %1017 = arith.addf %1015, %1016 : vector<16x128xf32>
      %1018 = vector.broadcast %706 : f32 to vector<16x128xf32>
      %1019 = arith.mulf %1018, %995 : vector<16x128xf32>
      %1020 = vector.broadcast %712 : f32 to vector<16x128xf32>
      %1021 = arith.mulf %1020, %996 : vector<16x128xf32>
      %1022 = arith.addf %1019, %1021 : vector<16x128xf32>
      %1023 = vector.broadcast %994 : f32 to vector<16x128xf32>
      %1024 = arith.addf %1022, %1023 : vector<16x128xf32>
      %cst_319 = arith.constant 0.000000e+00 : f32
      %1025 = vector.broadcast %cst_319 : f32 to vector<16x128xf32>
      %1026 = arith.cmpf oge, %1003, %1025 : vector<16x128xf32>
      %cst_320 = arith.constant 0.000000e+00 : f32
      %1027 = vector.broadcast %cst_320 : f32 to vector<16x128xf32>
      %1028 = arith.cmpf oge, %1010, %1027 : vector<16x128xf32>
      %1029 = arith.andi %1026, %1028 : vector<16x128xi1>
      %cst_321 = arith.constant 0.000000e+00 : f32
      %1030 = vector.broadcast %cst_321 : f32 to vector<16x128xf32>
      %1031 = arith.cmpf oge, %1017, %1030 : vector<16x128xf32>
      %1032 = arith.andi %1029, %1031 : vector<16x128xi1>
      %cst_322 = arith.constant 1.000000e+30 : f32
      %1033 = vector.broadcast %cst_322 : f32 to vector<16x128xf32>
      %1034 = arith.select %1032, %1024, %1033 : vector<16x128xi1>, vector<16x128xf32>
      %c0_323 = arith.constant 0 : index
      %c0_324 = arith.constant 0 : index
      %1035 = vector.load %arg3[%c0_323, %c0_324] : memref<16x128xf32, #tpu.memory_space<vmem>>, vector<16x128xf32>
      %1036 = arith.minimumf %1035, %1034 : vector<16x128xf32>
      %c0_325 = arith.constant 0 : index
      %c0_326 = arith.constant 0 : index
      %1037 = vector.load %arg3[%c0_325, %c0_326] : memref<16x128xf32, #tpu.memory_space<vmem>>, vector<16x128xf32>
      tpu.vector_store %arg3[%c0_325, %c0_326], %1036 {strides = array<i32>} : memref<16x128xf32, #tpu.memory_space<vmem>>, vector<16x128xf32>,
    } else {
    }
    %c8_i32_234 = arith.constant 8 : i32
    %741 = arith.muli %arg0, %c8_i32_234 : i32
    %c6_i32 = arith.constant 6 : i32
    %742 = arith.addi %741, %c6_i32 : i32
    %c3_i32_235 = arith.constant 3 : i32
    %743 = arith.muli %c3_i32_235, %742 : i32
    %c0_i32_236 = arith.constant 0 : i32
    %744 = arith.addi %743, %c0_i32_236 : i32
    %745 = arith.index_cast %744 : i32 to index
    %746 = memref.load %arg1[%745] : memref<96xi32, #tpu.memory_space<smem>>
    %c3_i32_237 = arith.constant 3 : i32
    %747 = arith.muli %c3_i32_237, %742 : i32
    %c1_i32_238 = arith.constant 1 : i32
    %748 = arith.addi %747, %c1_i32_238 : i32
    %749 = arith.index_cast %748 : i32 to index
    %750 = memref.load %arg1[%749] : memref<96xi32, #tpu.memory_space<smem>>
    %c3_i32_239 = arith.constant 3 : i32
    %751 = arith.muli %c3_i32_239, %742 : i32
    %c2_i32_240 = arith.constant 2 : i32
    %752 = arith.addi %751, %c2_i32_240 : i32
    %753 = arith.index_cast %752 : i32 to index
    %754 = memref.load %arg1[%753] : memref<96xi32, #tpu.memory_space<smem>>
    %c3_i32_241 = arith.constant 3 : i32
    %755 = arith.muli %c3_i32_241, %746 : i32
    %c0_i32_242 = arith.constant 0 : i32
    %756 = arith.addi %755, %c0_i32_242 : i32
    %757 = arith.index_cast %756 : i32 to index
    %758 = memref.load %arg2[%757] : memref<192xf32, #tpu.memory_space<smem>>
    %c3_i32_243 = arith.constant 3 : i32
    %759 = arith.muli %c3_i32_243, %746 : i32
    %c1_i32_244 = arith.constant 1 : i32
    %760 = arith.addi %759, %c1_i32_244 : i32
    %761 = arith.index_cast %760 : i32 to index
    %762 = memref.load %arg2[%761] : memref<192xf32, #tpu.memory_space<smem>>
    %c3_i32_245 = arith.constant 3 : i32
    %763 = arith.muli %c3_i32_245, %746 : i32
    %c2_i32_246 = arith.constant 2 : i32
    %764 = arith.addi %763, %c2_i32_246 : i32
    %765 = arith.index_cast %764 : i32 to index
    %766 = memref.load %arg2[%765] : memref<192xf32, #tpu.memory_space<smem>>
    %c3_i32_247 = arith.constant 3 : i32
    %767 = arith.muli %c3_i32_247, %750 : i32
    %c0_i32_248 = arith.constant 0 : i32
    %768 = arith.addi %767, %c0_i32_248 : i32
    %769 = arith.index_cast %768 : i32 to index
    %770 = memref.load %arg2[%769] : memref<192xf32, #tpu.memory_space<smem>>
    %c3_i32_249 = arith.constant 3 : i32
    %771 = arith.muli %c3_i32_249, %750 : i32
    %c1_i32_250 = arith.constant 1 : i32
    %772 = arith.addi %771, %c1_i32_250 : i32
    %773 = arith.index_cast %772 : i32 to index
    %774 = memref.load %arg2[%773] : memref<192xf32, #tpu.memory_space<smem>>
    %c3_i32_251 = arith.constant 3 : i32
    %775 = arith.muli %c3_i32_251, %750 : i32
    %c2_i32_252 = arith.constant 2 : i32
    %776 = arith.addi %775, %c2_i32_252 : i32
    %777 = arith.index_cast %776 : i32 to index
    %778 = memref.load %arg2[%777] : memref<192xf32, #tpu.memory_space<smem>>
    %c3_i32_253 = arith.constant 3 : i32
    %779 = arith.muli %c3_i32_253, %754 : i32
    %c0_i32_254 = arith.constant 0 : i32
    %780 = arith.addi %779, %c0_i32_254 : i32
    %781 = arith.index_cast %780 : i32 to index
    %782 = memref.load %arg2[%781] : memref<192xf32, #tpu.memory_space<smem>>
    %c3_i32_255 = arith.constant 3 : i32
    %783 = arith.muli %c3_i32_255, %754 : i32
    %c1_i32_256 = arith.constant 1 : i32
    %784 = arith.addi %783, %c1_i32_256 : i32
    %785 = arith.index_cast %784 : i32 to index
    %786 = memref.load %arg2[%785] : memref<192xf32, #tpu.memory_space<smem>>
    %c3_i32_257 = arith.constant 3 : i32
    %787 = arith.muli %c3_i32_257, %754 : i32
    %c2_i32_258 = arith.constant 2 : i32
    %788 = arith.addi %787, %c2_i32_258 : i32
    %789 = arith.index_cast %788 : i32 to index
    %790 = memref.load %arg2[%789] : memref<192xf32, #tpu.memory_space<smem>>
    %791 = arith.subf %786, %774 : f32
    %792 = arith.subf %770, %782 : f32
    %793 = arith.mulf %774, %782 : f32
    %794 = arith.mulf %770, %786 : f32
    %795 = arith.subf %793, %794 : f32
    %796 = arith.subf %762, %786 : f32
    %797 = arith.subf %782, %758 : f32
    %798 = arith.mulf %786, %758 : f32
    %799 = arith.mulf %782, %762 : f32
    %800 = arith.subf %798, %799 : f32
    %801 = arith.subf %774, %762 : f32
    %802 = arith.subf %758, %770 : f32
    %803 = arith.mulf %762, %770 : f32
    %804 = arith.mulf %758, %774 : f32
    %805 = arith.subf %803, %804 : f32
    %806 = arith.addf %795, %800 : f32
    %807 = arith.addf %806, %805 : f32
    %808 = math.absf %807 : f32
    %cst_259 = arith.constant 9.99999997E-7 : f32
    %809 = arith.cmpf ogt, %808, %cst_259 : f32
    %cst_260 = arith.constant 0.000000e+00 : f32
    %810 = arith.cmpf oge, %807, %cst_260 : f32
    %cst_261 = arith.constant 1.000000e+00 : f32
    %cst_262 = arith.constant -1.000000e+00 : f32
    %811 = arith.select %810, %cst_261, %cst_262 : f32
    %cst_263 = arith.constant 1.000000e+00 : f32
    %812 = arith.select %809, %808, %cst_263 : f32
    %cst_264 = arith.constant 1.000000e+00 : f32
    %813 = arith.divf %cst_264, %812 : f32
    %cst_265 = arith.constant 0.000000e+00 : f32
    %814 = arith.select %809, %813, %cst_265 : f32
    %815 = arith.mulf %811, %791 : f32
    %816 = arith.mulf %811, %792 : f32
    %817 = arith.mulf %811, %795 : f32
    %818 = arith.mulf %811, %796 : f32
    %819 = arith.mulf %811, %797 : f32
    %820 = arith.mulf %811, %800 : f32
    %821 = arith.mulf %811, %801 : f32
    %822 = arith.mulf %811, %802 : f32
    %823 = arith.mulf %811, %805 : f32
    %824 = arith.mulf %815, %766 : f32
    %825 = arith.mulf %818, %778 : f32
    %826 = arith.addf %824, %825 : f32
    %827 = arith.mulf %821, %790 : f32
    %828 = arith.addf %826, %827 : f32
    %829 = arith.mulf %828, %814 : f32
    %830 = arith.mulf %816, %766 : f32
    %831 = arith.mulf %819, %778 : f32
    %832 = arith.addf %830, %831 : f32
    %833 = arith.mulf %822, %790 : f32
    %834 = arith.addf %832, %833 : f32
    %835 = arith.mulf %834, %814 : f32
    %836 = arith.mulf %817, %766 : f32
    %837 = arith.mulf %820, %778 : f32
    %838 = arith.addf %836, %837 : f32
    %839 = arith.mulf %823, %790 : f32
    %840 = arith.addf %838, %839 : f32
    %841 = arith.mulf %840, %814 : f32
    %842 = arith.minimumf %758, %770 : f32
    %843 = arith.minimumf %842, %782 : f32
    %844 = arith.maximumf %758, %770 : f32
    %845 = arith.maximumf %844, %782 : f32
    %846 = arith.minimumf %762, %774 : f32
    %847 = arith.minimumf %846, %786 : f32
    %848 = arith.maximumf %762, %774 : f32
    %849 = arith.maximumf %848, %786 : f32
    %cst_266 = arith.constant 0.000000e+00 : f32
    %850 = arith.cmpf oge, %845, %cst_266 : f32
    %851 = arith.andi %809, %850 : i1
    %cst_267 = arith.constant 1.600000e+01 : f32
    %852 = arith.cmpf ole, %843, %cst_267 : f32
    %853 = arith.andi %851, %852 : i1
    %cst_268 = arith.constant 0.000000e+00 : f32
    %854 = arith.cmpf oge, %849, %cst_268 : f32
    %855 = arith.andi %853, %854 : i1
    %cst_269 = arith.constant 1.600000e+01 : f32
    %856 = arith.cmpf ole, %847, %cst_269 : f32
    %857 = arith.andi %855, %856 : i1
    %cst_270 = arith.constant 0.000000e+00 : f32
    %858 = arith.cmpf oge, %849, %cst_270 : f32
    %859 = arith.andi %857, %858 : i1
    %cst_271 = arith.constant 1.600000e+01 : f32
    %860 = arith.cmpf ole, %847, %cst_271 : f32
    %861 = arith.andi %859, %860 : i1
    %862 = arith.extui %861 : i1 to i32
    %c0_i32_272 = arith.constant 0 : i32
    %863 = arith.cmpi ne, %862, %c0_i32_272 : i32
    scf.if %863 {
      %cst_312 = arith.constant 0.000000e+00 : f32
      %987 = arith.mulf %816, %cst_312 : f32
      %988 = arith.addf %817, %987 : f32
      %cst_313 = arith.constant 0.000000e+00 : f32
      %989 = arith.mulf %819, %cst_313 : f32
      %990 = arith.addf %820, %989 : f32
      %cst_314 = arith.constant 0.000000e+00 : f32
      %991 = arith.mulf %822, %cst_314 : f32
      %992 = arith.addf %823, %991 : f32
      %cst_315 = arith.constant 0.000000e+00 : f32
      %993 = arith.mulf %835, %cst_315 : f32
      %994 = arith.addf %841, %993 : f32
      %c0 = arith.constant 0 : index
      %c0_316 = arith.constant 0 : index
      %995 = vector.load %arg4[%c0, %c0_316] : memref<16x128xf32, #tpu.memory_space<vmem>>, vector<16x128xf32>
      %c0_317 = arith.constant 0 : index
      %c0_318 = arith.constant 0 : index
      %996 = vector.load %arg5[%c0_317, %c0_318] : memref<16x128xf32, #tpu.memory_space<vmem>>, vector<16x128xf32>
      %997 = vector.broadcast %815 : f32 to vector<16x128xf32>
      %998 = arith.mulf %997, %995 : vector<16x128xf32>
      %999 = vector.broadcast %816 : f32 to vector<16x128xf32>
      %1000 = arith.mulf %999, %996 : vector<16x128xf32>
      %1001 = arith.addf %998, %1000 : vector<16x128xf32>
      %1002 = vector.broadcast %988 : f32 to vector<16x128xf32>
      %1003 = arith.addf %1001, %1002 : vector<16x128xf32>
      %1004 = vector.broadcast %818 : f32 to vector<16x128xf32>
      %1005 = arith.mulf %1004, %995 : vector<16x128xf32>
      %1006 = vector.broadcast %819 : f32 to vector<16x128xf32>
      %1007 = arith.mulf %1006, %996 : vector<16x128xf32>
      %1008 = arith.addf %1005, %1007 : vector<16x128xf32>
      %1009 = vector.broadcast %990 : f32 to vector<16x128xf32>
      %1010 = arith.addf %1008, %1009 : vector<16x128xf32>
      %1011 = vector.broadcast %821 : f32 to vector<16x128xf32>
      %1012 = arith.mulf %1011, %995 : vector<16x128xf32>
      %1013 = vector.broadcast %822 : f32 to vector<16x128xf32>
      %1014 = arith.mulf %1013, %996 : vector<16x128xf32>
      %1015 = arith.addf %1012, %1014 : vector<16x128xf32>
      %1016 = vector.broadcast %992 : f32 to vector<16x128xf32>
      %1017 = arith.addf %1015, %1016 : vector<16x128xf32>
      %1018 = vector.broadcast %829 : f32 to vector<16x128xf32>
      %1019 = arith.mulf %1018, %995 : vector<16x128xf32>
      %1020 = vector.broadcast %835 : f32 to vector<16x128xf32>
      %1021 = arith.mulf %1020, %996 : vector<16x128xf32>
      %1022 = arith.addf %1019, %1021 : vector<16x128xf32>
      %1023 = vector.broadcast %994 : f32 to vector<16x128xf32>
      %1024 = arith.addf %1022, %1023 : vector<16x128xf32>
      %cst_319 = arith.constant 0.000000e+00 : f32
      %1025 = vector.broadcast %cst_319 : f32 to vector<16x128xf32>
      %1026 = arith.cmpf oge, %1003, %1025 : vector<16x128xf32>
      %cst_320 = arith.constant 0.000000e+00 : f32
      %1027 = vector.broadcast %cst_320 : f32 to vector<16x128xf32>
      %1028 = arith.cmpf oge, %1010, %1027 : vector<16x128xf32>
      %1029 = arith.andi %1026, %1028 : vector<16x128xi1>
      %cst_321 = arith.constant 0.000000e+00 : f32
      %1030 = vector.broadcast %cst_321 : f32 to vector<16x128xf32>
      %1031 = arith.cmpf oge, %1017, %1030 : vector<16x128xf32>
      %1032 = arith.andi %1029, %1031 : vector<16x128xi1>
      %cst_322 = arith.constant 1.000000e+30 : f32
      %1033 = vector.broadcast %cst_322 : f32 to vector<16x128xf32>
      %1034 = arith.select %1032, %1024, %1033 : vector<16x128xi1>, vector<16x128xf32>
      %c0_323 = arith.constant 0 : index
      %c0_324 = arith.constant 0 : index
      %1035 = vector.load %arg3[%c0_323, %c0_324] : memref<16x128xf32, #tpu.memory_space<vmem>>, vector<16x128xf32>
      %1036 = arith.minimumf %1035, %1034 : vector<16x128xf32>
      %c0_325 = arith.constant 0 : index
      %c0_326 = arith.constant 0 : index
      %1037 = vector.load %arg3[%c0_325, %c0_326] : memref<16x128xf32, #tpu.memory_space<vmem>>, vector<16x128xf32>
      tpu.vector_store %arg3[%c0_325, %c0_326], %1036 {strides = array<i32>} : memref<16x128xf32, #tpu.memory_space<vmem>>, vector<16x128xf32>,
    } else {
    }
    %c8_i32_273 = arith.constant 8 : i32
    %864 = arith.muli %arg0, %c8_i32_273 : i32
    %c7_i32 = arith.constant 7 : i32
    %865 = arith.addi %864, %c7_i32 : i32
    %c3_i32_274 = arith.constant 3 : i32
    %866 = arith.muli %c3_i32_274, %865 : i32
    %c0_i32_275 = arith.constant 0 : i32
    %867 = arith.addi %866, %c0_i32_275 : i32
    %868 = arith.index_cast %867 : i32 to index
    %869 = memref.load %arg1[%868] : memref<96xi32, #tpu.memory_space<smem>>
    %c3_i32_276 = arith.constant 3 : i32
    %870 = arith.muli %c3_i32_276, %865 : i32
    %c1_i32_277 = arith.constant 1 : i32
    %871 = arith.addi %870, %c1_i32_277 : i32
    %872 = arith.index_cast %871 : i32 to index
    %873 = memref.load %arg1[%872] : memref<96xi32, #tpu.memory_space<smem>>
    %c3_i32_278 = arith.constant 3 : i32
    %874 = arith.muli %c3_i32_278, %865 : i32
    %c2_i32_279 = arith.constant 2 : i32
    %875 = arith.addi %874, %c2_i32_279 : i32
    %876 = arith.index_cast %875 : i32 to index
    %877 = memref.load %arg1[%876] : memref<96xi32, #tpu.memory_space<smem>>
    %c3_i32_280 = arith.constant 3 : i32
    %878 = arith.muli %c3_i32_280, %869 : i32
    %c0_i32_281 = arith.constant 0 : i32
    %879 = arith.addi %878, %c0_i32_281 : i32
    %880 = arith.index_cast %879 : i32 to index
    %881 = memref.load %arg2[%880] : memref<192xf32, #tpu.memory_space<smem>>
    %c3_i32_282 = arith.constant 3 : i32
    %882 = arith.muli %c3_i32_282, %869 : i32
    %c1_i32_283 = arith.constant 1 : i32
    %883 = arith.addi %882, %c1_i32_283 : i32
    %884 = arith.index_cast %883 : i32 to index
    %885 = memref.load %arg2[%884] : memref<192xf32, #tpu.memory_space<smem>>
    %c3_i32_284 = arith.constant 3 : i32
    %886 = arith.muli %c3_i32_284, %869 : i32
    %c2_i32_285 = arith.constant 2 : i32
    %887 = arith.addi %886, %c2_i32_285 : i32
    %888 = arith.index_cast %887 : i32 to index
    %889 = memref.load %arg2[%888] : memref<192xf32, #tpu.memory_space<smem>>
    %c3_i32_286 = arith.constant 3 : i32
    %890 = arith.muli %c3_i32_286, %873 : i32
    %c0_i32_287 = arith.constant 0 : i32
    %891 = arith.addi %890, %c0_i32_287 : i32
    %892 = arith.index_cast %891 : i32 to index
    %893 = memref.load %arg2[%892] : memref<192xf32, #tpu.memory_space<smem>>
    %c3_i32_288 = arith.constant 3 : i32
    %894 = arith.muli %c3_i32_288, %873 : i32
    %c1_i32_289 = arith.constant 1 : i32
    %895 = arith.addi %894, %c1_i32_289 : i32
    %896 = arith.index_cast %895 : i32 to index
    %897 = memref.load %arg2[%896] : memref<192xf32, #tpu.memory_space<smem>>
    %c3_i32_290 = arith.constant 3 : i32
    %898 = arith.muli %c3_i32_290, %873 : i32
    %c2_i32_291 = arith.constant 2 : i32
    %899 = arith.addi %898, %c2_i32_291 : i32
    %900 = arith.index_cast %899 : i32 to index
    %901 = memref.load %arg2[%900] : memref<192xf32, #tpu.memory_space<smem>>
    %c3_i32_292 = arith.constant 3 : i32
    %902 = arith.muli %c3_i32_292, %877 : i32
    %c0_i32_293 = arith.constant 0 : i32
    %903 = arith.addi %902, %c0_i32_293 : i32
    %904 = arith.index_cast %903 : i32 to index
    %905 = memref.load %arg2[%904] : memref<192xf32, #tpu.memory_space<smem>>
    %c3_i32_294 = arith.constant 3 : i32
    %906 = arith.muli %c3_i32_294, %877 : i32
    %c1_i32_295 = arith.constant 1 : i32
    %907 = arith.addi %906, %c1_i32_295 : i32
    %908 = arith.index_cast %907 : i32 to index
    %909 = memref.load %arg2[%908] : memref<192xf32, #tpu.memory_space<smem>>
    %c3_i32_296 = arith.constant 3 : i32
    %910 = arith.muli %c3_i32_296, %877 : i32
    %c2_i32_297 = arith.constant 2 : i32
    %911 = arith.addi %910, %c2_i32_297 : i32
    %912 = arith.index_cast %911 : i32 to index
    %913 = memref.load %arg2[%912] : memref<192xf32, #tpu.memory_space<smem>>
    %914 = arith.subf %909, %897 : f32
    %915 = arith.subf %893, %905 : f32
    %916 = arith.mulf %897, %905 : f32
    %917 = arith.mulf %893, %909 : f32
    %918 = arith.subf %916, %917 : f32
    %919 = arith.subf %885, %909 : f32
    %920 = arith.subf %905, %881 : f32
    %921 = arith.mulf %909, %881 : f32
    %922 = arith.mulf %905, %885 : f32
    %923 = arith.subf %921, %922 : f32
    %924 = arith.subf %897, %885 : f32
    %925 = arith.subf %881, %893 : f32
    %926 = arith.mulf %885, %893 : f32
    %927 = arith.mulf %881, %897 : f32
    %928 = arith.subf %926, %927 : f32
    %929 = arith.addf %918, %923 : f32
    %930 = arith.addf %929, %928 : f32
    %931 = math.absf %930 : f32
    %cst_298 = arith.constant 9.99999997E-7 : f32
    %932 = arith.cmpf ogt, %931, %cst_298 : f32
    %cst_299 = arith.constant 0.000000e+00 : f32
    %933 = arith.cmpf oge, %930, %cst_299 : f32
    %cst_300 = arith.constant 1.000000e+00 : f32
    %cst_301 = arith.constant -1.000000e+00 : f32
    %934 = arith.select %933, %cst_300, %cst_301 : f32
    %cst_302 = arith.constant 1.000000e+00 : f32
    %935 = arith.select %932, %931, %cst_302 : f32
    %cst_303 = arith.constant 1.000000e+00 : f32
    %936 = arith.divf %cst_303, %935 : f32
    %cst_304 = arith.constant 0.000000e+00 : f32
    %937 = arith.select %932, %936, %cst_304 : f32
    %938 = arith.mulf %934, %914 : f32
    %939 = arith.mulf %934, %915 : f32
    %940 = arith.mulf %934, %918 : f32
    %941 = arith.mulf %934, %919 : f32
    %942 = arith.mulf %934, %920 : f32
    %943 = arith.mulf %934, %923 : f32
    %944 = arith.mulf %934, %924 : f32
    %945 = arith.mulf %934, %925 : f32
    %946 = arith.mulf %934, %928 : f32
    %947 = arith.mulf %938, %889 : f32
    %948 = arith.mulf %941, %901 : f32
    %949 = arith.addf %947, %948 : f32
    %950 = arith.mulf %944, %913 : f32
    %951 = arith.addf %949, %950 : f32
    %952 = arith.mulf %951, %937 : f32
    %953 = arith.mulf %939, %889 : f32
    %954 = arith.mulf %942, %901 : f32
    %955 = arith.addf %953, %954 : f32
    %956 = arith.mulf %945, %913 : f32
    %957 = arith.addf %955, %956 : f32
    %958 = arith.mulf %957, %937 : f32
    %959 = arith.mulf %940, %889 : f32
    %960 = arith.mulf %943, %901 : f32
    %961 = arith.addf %959, %960 : f32
    %962 = arith.mulf %946, %913 : f32
    %963 = arith.addf %961, %962 : f32
    %964 = arith.mulf %963, %937 : f32
    %965 = arith.minimumf %881, %893 : f32
    %966 = arith.minimumf %965, %905 : f32
    %967 = arith.maximumf %881, %893 : f32
    %968 = arith.maximumf %967, %905 : f32
    %969 = arith.minimumf %885, %897 : f32
    %970 = arith.minimumf %969, %909 : f32
    %971 = arith.maximumf %885, %897 : f32
    %972 = arith.maximumf %971, %909 : f32
    %cst_305 = arith.constant 0.000000e+00 : f32
    %973 = arith.cmpf oge, %968, %cst_305 : f32
    %974 = arith.andi %932, %973 : i1
    %cst_306 = arith.constant 1.600000e+01 : f32
    %975 = arith.cmpf ole, %966, %cst_306 : f32
    %976 = arith.andi %974, %975 : i1
    %cst_307 = arith.constant 0.000000e+00 : f32
    %977 = arith.cmpf oge, %972, %cst_307 : f32
    %978 = arith.andi %976, %977 : i1
    %cst_308 = arith.constant 1.600000e+01 : f32
    %979 = arith.cmpf ole, %970, %cst_308 : f32
    %980 = arith.andi %978, %979 : i1
    %cst_309 = arith.constant 0.000000e+00 : f32
    %981 = arith.cmpf oge, %972, %cst_309 : f32
    %982 = arith.andi %980, %981 : i1
    %cst_310 = arith.constant 1.600000e+01 : f32
    %983 = arith.cmpf ole, %970, %cst_310 : f32
    %984 = arith.andi %982, %983 : i1
    %985 = arith.extui %984 : i1 to i32
    %c0_i32_311 = arith.constant 0 : i32
    %986 = arith.cmpi ne, %985, %c0_i32_311 : i32
    scf.if %986 {
      %cst_312 = arith.constant 0.000000e+00 : f32
      %987 = arith.mulf %939, %cst_312 : f32
      %988 = arith.addf %940, %987 : f32
      %cst_313 = arith.constant 0.000000e+00 : f32
      %989 = arith.mulf %942, %cst_313 : f32
      %990 = arith.addf %943, %989 : f32
      %cst_314 = arith.constant 0.000000e+00 : f32
      %991 = arith.mulf %945, %cst_314 : f32
      %992 = arith.addf %946, %991 : f32
      %cst_315 = arith.constant 0.000000e+00 : f32
      %993 = arith.mulf %958, %cst_315 : f32
      %994 = arith.addf %964, %993 : f32
      %c0 = arith.constant 0 : index
      %c0_316 = arith.constant 0 : index
      %995 = vector.load %arg4[%c0, %c0_316] : memref<16x128xf32, #tpu.memory_space<vmem>>, vector<16x128xf32>
      %c0_317 = arith.constant 0 : index
      %c0_318 = arith.constant 0 : index
      %996 = vector.load %arg5[%c0_317, %c0_318] : memref<16x128xf32, #tpu.memory_space<vmem>>, vector<16x128xf32>
      %997 = vector.broadcast %938 : f32 to vector<16x128xf32>
      %998 = arith.mulf %997, %995 : vector<16x128xf32>
      %999 = vector.broadcast %939 : f32 to vector<16x128xf32>
      %1000 = arith.mulf %999, %996 : vector<16x128xf32>
      %1001 = arith.addf %998, %1000 : vector<16x128xf32>
      %1002 = vector.broadcast %988 : f32 to vector<16x128xf32>
      %1003 = arith.addf %1001, %1002 : vector<16x128xf32>
      %1004 = vector.broadcast %941 : f32 to vector<16x128xf32>
      %1005 = arith.mulf %1004, %995 : vector<16x128xf32>
      %1006 = vector.broadcast %942 : f32 to vector<16x128xf32>
      %1007 = arith.mulf %1006, %996 : vector<16x128xf32>
      %1008 = arith.addf %1005, %1007 : vector<16x128xf32>
      %1009 = vector.broadcast %990 : f32 to vector<16x128xf32>
      %1010 = arith.addf %1008, %1009 : vector<16x128xf32>
      %1011 = vector.broadcast %944 : f32 to vector<16x128xf32>
      %1012 = arith.mulf %1011, %995 : vector<16x128xf32>
      %1013 = vector.broadcast %945 : f32 to vector<16x128xf32>
      %1014 = arith.mulf %1013, %996 : vector<16x128xf32>
      %1015 = arith.addf %1012, %1014 : vector<16x128xf32>
      %1016 = vector.broadcast %992 : f32 to vector<16x128xf32>
      %1017 = arith.addf %1015, %1016 : vector<16x128xf32>
      %1018 = vector.broadcast %952 : f32 to vector<16x128xf32>
      %1019 = arith.mulf %1018, %995 : vector<16x128xf32>
      %1020 = vector.broadcast %958 : f32 to vector<16x128xf32>
      %1021 = arith.mulf %1020, %996 : vector<16x128xf32>
      %1022 = arith.addf %1019, %1021 : vector<16x128xf32>
      %1023 = vector.broadcast %994 : f32 to vector<16x128xf32>
      %1024 = arith.addf %1022, %1023 : vector<16x128xf32>
      %cst_319 = arith.constant 0.000000e+00 : f32
      %1025 = vector.broadcast %cst_319 : f32 to vector<16x128xf32>
      %1026 = arith.cmpf oge, %1003, %1025 : vector<16x128xf32>
      %cst_320 = arith.constant 0.000000e+00 : f32
      %1027 = vector.broadcast %cst_320 : f32 to vector<16x128xf32>
      %1028 = arith.cmpf oge, %1010, %1027 : vector<16x128xf32>
      %1029 = arith.andi %1026, %1028 : vector<16x128xi1>
      %cst_321 = arith.constant 0.000000e+00 : f32
      %1030 = vector.broadcast %cst_321 : f32 to vector<16x128xf32>
      %1031 = arith.cmpf oge, %1017, %1030 : vector<16x128xf32>
      %1032 = arith.andi %1029, %1031 : vector<16x128xi1>
      %cst_322 = arith.constant 1.000000e+30 : f32
      %1033 = vector.broadcast %cst_322 : f32 to vector<16x128xf32>
      %1034 = arith.select %1032, %1024, %1033 : vector<16x128xi1>, vector<16x128xf32>
      %c0_323 = arith.constant 0 : index
      %c0_324 = arith.constant 0 : index
      %1035 = vector.load %arg3[%c0_323, %c0_324] : memref<16x128xf32, #tpu.memory_space<vmem>>, vector<16x128xf32>
      %1036 = arith.minimumf %1035, %1034 : vector<16x128xf32>
      %c0_325 = arith.constant 0 : index
      %c0_326 = arith.constant 0 : index
      %1037 = vector.load %arg3[%c0_325, %c0_326] : memref<16x128xf32, #tpu.memory_space<vmem>>, vector<16x128xf32>
      tpu.vector_store %arg3[%c0_325, %c0_326], %1036 {strides = array<i32>} : memref<16x128xf32, #tpu.memory_space<vmem>>, vector<16x128xf32>,
    } else {
    }
    return
  }
  func.func @transform_0(%arg0: i32) -> i32 {
    %c0_i32 = arith.constant 0 : i32
    %c0_i32_0 = arith.constant 0 : i32
    return %c0_i32 : i32
  }
  func.func @transform_1(%arg0: i32) -> i32 {
    %c0_i32 = arith.constant 0 : i32
    %c0_i32_0 = arith.constant 0 : i32
    return %c0_i32 : i32
  }
  func.func @transform_2(%arg0: i32) -> (i32, i32) {
    %c0_i32 = arith.constant 0 : i32
    %c0_i32_0 = arith.constant 0 : i32
    %c0_i32_1 = arith.constant 0 : i32
    return %c0_i32, %c0_i32_0 : i32, i32
  }
}

</mosaic_0001>

<bundles_post_ra>
// kernel: tpu_custom_call.1
= control target key start
LH: loop header
LB: loop body
LE: loop exit
PB: predicated region body
PF: predicated region fallthrough
CT: control target
= control target key end

     0   :  { %s3301_s0 = inlined_call_operand.hbm [shape: s32[96], index: 0, kind: input, shape index: {}]   ;;  %s3302_s1 = inlined_call_operand.hbm [shape: f32[192], index: 1, kind: input, shape index: {}]   ;;  %s3303_s2 = inlined_call_operand.hbm [shape: f32[16,128], index: 2, kind: output, shape index: {}]  }
   0x1   :  { %3305 = sst [smem:[#allocation14_spill]] %s3301_s0 }
   0x2   :  { %3306 = sst [smem:[#allocation15_spill]] %s3302_s1 }
   0x3   :  { %3307 = sst [smem:[#allocation16_spill]] %s3303_s2 }
   0x4   :  { %7 = vsyncpa [#allocation6], 0 }
   0x5   :  { %8 = vsyncpa [#allocation8], 0 }
   0x6   :  { %9 = vsyncpa [#allocation5], 0  ;;  %s1807_s9 = smov 0  }
   0x7 LB: > { %3308 = sst [smem:[#allocation13_spill]] %s1784_s9  ;;  %s1813_s10 = sadd.s32 4294967295, %s1784_s9   ;;  %s1784_s9 = sphi %s1807_s9, %s15_s9  }
   0x8   : > { %p1637_p0 = scmp.ge.s32.totalorder %s1784_s9, 1  ;;  %p83_p1 = scmp.lt.s32.totalorder %s1784_s9, 5 }
   0x9   : > { %p1638_p2 = scmp.ne.s32.totalorder %s1813_s10, 0  ;;  %p1684_p4 = scmp.eq.s32.totalorder %s1813_s10, 0 }
   0xa   : > { %p84_p3 = pnand %p1637_p0, %p83_p1  ;;  %s1786_s11 = smov [#allocation4]  }
   0xb   : > { %s3309_s0 = sld [smem:[#allocation14_spill]]  ;;  %s1787_s14 = smov [#allocation7]  }
   0xc   : > { %p1677_p5 = pneg %p84_p3  ;;  %s3310_s1 = sld [smem:[#allocation15_spill]] }
   0xe   : > { %p1678_p6 = pnand %p1684_p4, %p1677_p5  ;;  %116 = sbr.rel (%p84_p3) target bundleno = 1070 (0x42e), region = 28 }
  0x11   : > { %1680 = dma.hbm_to_smem (!%p1678_p6), %s3309_s0, 16, %s1786_s11, [#allocation6]  }
  0x12   : > { %1683 = dma.hbm_to_smem (!%p1678_p6), %s3310_s1, 32, %s1787_s14, [#allocation8]  }
  0x13   : > { %1771 = dma.done.wait (%p1684_p4), [#allocation6], 16  }
  0x14   : > { %1773 = vsyncadd (%p1684_p4), [#allocation6], 4294967280 }
  0x15   : > { %1775 = dma.done.wait (%p1684_p4), [#allocation8], 32  }
  0x16   : > { %1777 = vsyncadd (%p1684_p4), [#allocation8], 4294967264 }
  0x17   : > { %126 = sfence }
  0x18   : > { %136 = sbr.rel (%p1638_p2) target bundleno = 40 (0x28), region = 40 }
  0x1d   : > { %v139_v0 = vlaneseq  ;;  %v1788_v1 = vmov 1e+30  }
  0x1e   : > { %137 = vst [vmem:[#allocation9] sm:$0xff] %v1788_v1  ;;  %138 = vst [vmem:[#allocation9 + $0x8] sm:$0xff] %v1788_v1 }
  0x1f   : > { %v140_v2 = vand.u32 127, %v139_v0  ;;  %v146_v3 = vshrl.u32 %v139_v0, 7 }
  0x21   : > { %v141_v4 = vcvt.s32.f32 %v140_v2  ;;  %v148_v5 = vcvt.s32.f32 %v146_v3  ;;  %v147_v6 = vadd.s32 8, %v146_v3 }
  0x23   : > { %v142_v7 = vadd.f32 0.5, %v141_v4  ;;  %v150_v8 = vadd.f32 0.5, %v148_v5  ;;  %v149_v9 = vcvt.s32.f32 %v147_v6 }
  0x25   : > { %143 = vst [vmem:[#allocation2] sm:$0xff] %v142_v7  ;;  %144 = vst [vmem:[#allocation2 + $0x8] sm:$0xff] %v142_v7  ;;  %v151_v10 = vadd.f32 0.5, %v149_v9 }
  0x26   : > { %152 = vst [vmem:[#allocation3 + $0x8] sm:$0xff] %v150_v8 }
  0x27   : > { %153 = vst [vmem:[#allocation3] sm:$0xff] %v151_v10 }
  0x28 PF: > { %s154_s17 = smul.u32 24, %s1813_s10 }
  0x2a   : > { %s155_s18 = sld [smem:[#allocation4 + %s154_s17]]  ;;  %s156_s19 = sadd.s32 1, %s154_s17 }
  0x2b   : > { %s157_s20 = sld [smem:[#allocation4 + %s156_s19]]  ;;  %s158_s21 = sadd.s32 2, %s154_s17 }
  0x2c   : > { %s159_s22 = sld [smem:[#allocation4 + %s158_s21]] }
  0x30   : > { %s1828_s23 = smul.u32 3, %s155_s18 }
  0x31   : > { %s1830_s24 = smul.u32 3, %s157_s20 }
  0x32   : > { %s1833_s25 = sld [smem:[#allocation7 + %s1828_s23]]  ;;  %s162_s26 = sadd.s32 1, %s1828_s23 }
  0x33   : > { %s1836_s27 = sld [smem:[#allocation7 + %s162_s26]]  ;;  %s168_s28 = sadd.s32 1, %s1830_s24 }
  0x34   : > { %s1840_s29 = sld [smem:[#allocation7 + %s1830_s24]]  ;;  %s1842_s30 = smul.u32 3, %s159_s22 }
  0x35   : > { %s1844_s3 = sld [smem:[#allocation7 + %s168_s28]]  ;;  %s164_s7 = sadd.s32 2, %s1828_s23 }
  0x36   : > { %s1847_s4 = sld [smem:[#allocation7 + %s1842_s30]]  ;;  %s174_s5 = sadd.s32 1, %s1842_s30 }
  0x37   : > { %s1850_s6 = sld [smem:[#allocation7 + %s174_s5]]  ;;  %s170_s8 = sadd.s32 2, %s1830_s24 }
  0x3a   : > { %s190_s11 = smul.f32 %s1840_s29, %s1836_s27  ;;  %s231_s12 = smin.f32 %s1840_s29, %s1833_s25 }
  0x3b   : > { %s191_s13 = smul.f32 %s1844_s3, %s1833_s25  ;;  %s233_s14 = smax.f32 %s1840_s29, %s1833_s25 }
  0x3c   : > { %s180_s15 = smul.f32 %s1847_s4, %s1844_s3  ;;  %s1865_s16 = smin.f32 %s231_s12, %s1847_s4 }
  0x3d   : > { %s181_s17 = smul.f32 %s1850_s6, %s1840_s29  ;;  %s1869_s18 = ssub.f32 %s190_s11, %s191_s13 }
  0x3e   : > { %s185_s19 = smul.f32 %s1850_s6, %s1833_s25  ;;  %s234_s20 = smax.f32 %s233_s14, %s1847_s4 }
  0x3f   : > { %s182_s21 = ssub.f32 %s180_s15, %s181_s17  ;;  %s186_s22 = smul.f32 %s1847_s4, %s1836_s27 }
  0x40   : > { %s235_s23 = smin.f32 %s1844_s3, %s1836_s27  ;;  %s237_s24 = smax.f32 %s1844_s3, %s1836_s27 }
  0x41   : > { %s187_s26 = ssub.f32 %s185_s19, %s186_s22  ;;  %s1881_s28 = smin.f32 %s235_s23, %s1850_s6 }
  0x42   : > { %s1884_s5 = smax.f32 %s237_s24, %s1850_s6  ;;  %s1886_s12 = sld [smem:[#allocation7 + %s164_s7]] }
  0x43   : > { %s193_s11 = sadd.f32 %s187_s26, %s182_s21  ;;  %s176_s13 = sadd.s32 2, %s1842_s30 }
  0x44   : > { %p239_p7 = scmp.ge.f32.partialorder %s234_s20, 0.0  ;;  %s1889_s14 = sld [smem:[#allocation7 + %s170_s8]] }
  0x45   : > { %s194_s15 = sadd.f32 %s193_s11, %s1869_s18  ;;  %p242_p8 = scmp.le.f32.partialorder %s1865_s16, 16.0 }
  0x46   : > { %p245_p9 = scmp.ge.f32.partialorder %s1884_s5, 0.0  ;;  %s1894_s17 = sld [smem:[#allocation7 + %s176_s13]] }
  0x47   : > { %s195_s19 = sand.u32 2147483647, %s194_s15  ;;  %p197_p10 = scmp.ge.f32.partialorder %s194_s15, 0.0 }
  0x48   : > { %p1896_p11 = scmp.gt.f32.partialorder %s195_s19, 1e-06  ;;  %s178_s7 = ssub.f32 %s1850_s6, %s1844_s3 }
  0x49   : > { %s198_s8 = scalar_select %p197_p10, 1.0, -1.0 }
  0x4a   : > { %s3322_s19 = smov (!%p1896_p11, %s195_s19), 1.0  ;;  %p240_p12 = pnand %p239_p7, %p1896_p11 }
  0x4b   : > { %s1904_s22 = smul.f32 %s198_s8, %s182_s21  ;;  %v200_v11 = vstv %s3322_s19  ;;  %s179_s24 = ssub.f32 %s1840_s29, %s1847_s4 }
  0x4c   : > { %s1909_s23 = smul.f32 %s198_s8, %s187_s26  ;;  %1704 = vrcp.f32 %v200_v11  ;;  %p241_p13 = pneg %p240_p12 }
  0x4d   : > { %s1914_s11 = smul.f32 %s198_s8, %s1869_s18  ;;  %s183_s13 = ssub.f32 %s1836_s27, %s1850_s6 }
  0x4e   : > { %s1918_s15 = smul.f32 %s198_s8, %s178_s7  ;;  %p243_p0 = pnand %p242_p8, %p241_p13 }
  0x4f   : > { %s184_s20 = ssub.f32 %s1847_s4, %s1833_s25  ;;  %s1926_s19 = smul.f32 %s198_s8, %s179_s24 }
  0x50   : > { %s188_s21 = ssub.f32 %s1844_s3, %s1836_s27  ;;  %p244_p1 = pneg %p243_p0 }
  0x51   : > { %s189_s18 = ssub.f32 %s1833_s25, %s1840_s29  ;;  %p248_p2 = scmp.le.f32.partialorder %s1881_s28, 16.0 }
  0x52   : > { %s1931_s26 = smul.f32 %s198_s8, %s183_s13  ;;  %p246_p3 = pnand %p245_p9, %p244_p1 }
  0x53   : > { %s1935_s6 = smul.f32 %s198_s8, %s184_s20 }
  0x54   : > { %s1937_s16 = smul.f32 %s198_s8, %s188_s21  ;;  %p247_p4 = pneg %p246_p3 }
  0x55   : > { %s1939_s27 = smul.f32 %s198_s8, %s189_s18 }
  0x56   : > { %s213_s25 = smul.f32 %s1918_s15, %s1886_s12  ;;  %p249_p5 = pnand %p248_p2, %p247_p4 }
  0x57   : > { %s214_s29 = smul.f32 %s1931_s26, %s1889_s14 }
  0x58   : > { %s216_s3 = smul.f32 %s1937_s16, %s1894_s17  ;;  %p250_p6 = pneg %p249_p5 }
  0x59   : > { %s215_s4 = sadd.f32 %s214_s29, %s213_s25  ;;  %v1705_v12 = vpop.eup %1704  ;;  %s219_s7 = smul.f32 %s1926_s19, %s1886_s12 }
  0x5a   : > { %1649 = vpush %v1705_v12  ;;  %p251_p7 = pnand %p250_p6, %p245_p9  ;;  %s220_s24 = smul.f32 %s1935_s6, %s1889_s14 }
  0x5b   : > { %s1953_s8 = sadd.f32 %s216_s3, %s215_s4  ;;  %s222_s13 = smul.f32 %s1939_s27, %s1894_s17 }
  0x5c   : > { %p252_p8 = pneg %p251_p7  ;;  %s221_s20 = sadd.f32 %s220_s24, %s219_s7 }
  0x5d   : > { %s225_s21 = smul.f32 %s1904_s22, %s1886_s12 }
  0x5e   : > { %p253_p10 = pnand %p252_p8, %p248_p2  ;;  %s226_s18 = smul.f32 %s1909_s23, %s1889_s14 }
  0x5f   : > { %s223_s0 = sadd.f32 %s222_s13, %s221_s20  ;;  %s228_s1 = smul.f32 %s1914_s11, %s1894_s17 }
  0x60   : > { %s227_s25 = sadd.f32 %s226_s18, %s225_s21  ;;  %s261_s14 = smul.f32 (!%p253_p10), 0.0, %s1939_s27 }
  0x62   : > { %s1967_s29 = sadd.f32 %s228_s1, %s227_s25  ;;  %s257_s1 = smul.f32 (!%p253_p10), 0.0, %s1926_s19 }
  0x64   : > { %s1987_s28 = sadd.f32 (!%p253_p10), %s257_s1, %s1904_s22 }
  0x8b   : > { %s1650_s9 = spop %1649  ;;  %256 = sbr.rel (%p253_p10) target bundleno = 165 (0xa5), region = 44 }
  0x8c   : > { %s3324_s9 = smov (!%p1896_p11, %s1650_s9), 0.0 }
  0x8d   : > { %s218_s5 = smul.f32 %s1953_s8, %s3324_s9 }
  0x8e   : > { %s1976_s3 = smul.f32 %s223_s0, %s3324_s9 }
  0x8f   : > { %s230_s12 = smul.f32 %s1967_s29, %s3324_s9 }
  0x90   : > { %v265_v13 = vld [vmem:[#allocation2] sm:$0xff]  ;;  %v267_v14 = vld [vmem:[#allocation3 + $0x8] sm:$0xff]  ;;  %v269_v15 = vstv %s1918_s15  ;;  %v272_v16 = vstv %s1926_s19  ;;  %v280_v17 = vstv %s1931_s26  ;;  %v283_v18 = vstv %s1935_s6  ;;  %s259_s0 = smul.f32 0.0, %s1935_s6  ;;  %v266_v23 = vld [vmem:[#allocation2 + $0x8] sm:$0xff]  ;;  %s1998_s15 = sadd.f32 %s261_s14, %s1914_s11 }
  0x91   : > { %v270_v19 = vmul.f32 %v269_v15, %v265_v13  ;;  %v273_v20 = vmul.f32 %v272_v16, %v267_v14  ;;  %v281_v21 = vmul.f32 %v280_v17, %v265_v13  ;;  %v284_v22 = vmul.f32 %v283_v18, %v267_v14  ;;  %v268_v28 = vld [vmem:[#allocation3] sm:$0xff]  ;;  %s263_s30 = smul.f32 0.0, %s1976_s3  ;;  %v325_v51 = vld [vmem:[#allocation9] sm:$0xff]  ;;  %v326_v0 = vld [vmem:[#allocation9 + $0x8] sm:$0xff] }
  0x92   : > { %v291_v24 = vstv %s1937_s16  ;;  %v294_v25 = vstv %s1939_s27  ;;  %v302_v26 = vstv %s218_s5  ;;  %v305_v27 = vstv %s1976_s3  ;;  %s1994_s17 = sadd.f32 %s259_s0, %s1909_s23 }
  0x93   : > { %v275_v29 = vadd.f32 %v273_v20, %v270_v19  ;;  %v286_v30 = vadd.f32 %v284_v22, %v281_v21  ;;  %v292_v31 = vmul.f32 %v291_v24, %v265_v13  ;;  %v295_v32 = vmul.f32 %v294_v25, %v267_v14  ;;  %s2004_s22 = sadd.f32 %s263_s30, %s230_s12 }
  0x94   : > { %v277_v33 = vstv %s1987_s28  ;;  %v303_v34 = vmul.f32 %v302_v26, %v265_v13  ;;  %v306_v35 = vmul.f32 %v305_v27, %v267_v14  ;;  %v271_v36 = vmul.f32 %v269_v15, %v266_v23 }
  0x95   : > { %v278_v37 = vadd.f32 %v277_v33, %v275_v29  ;;  %v288_v38 = vstv %s1994_s17  ;;  %v297_v39 = vadd.f32 %v295_v32, %v292_v31  ;;  %v274_v40 = vmul.f32 %v272_v16, %v268_v28 }
  0x96   : > { %v289_v41 = vadd.f32 %v288_v38, %v286_v30  ;;  %v299_v42 = vstv %s1998_s15  ;;  %v308_v43 = vadd.f32 %v306_v35, %v303_v34  ;;  %v282_v44 = vmul.f32 %v280_v17, %v266_v23 }
  0x97   : > { %v300_v45 = vadd.f32 %v299_v42, %v297_v39  ;;  %v310_v46 = vstv %s2004_s22  ;;  %vm313_vm0 = vcmp.ge.f32.partialorder %v278_v37, 0.0  ;;  %v276_v47 = vadd.f32 %v274_v40, %v271_v36 }
  0x98   : > { %v311_v48 = vadd.f32 %v310_v46, %v308_v43  ;;  %vm315_vm1 = vcmp.ge.f32.partialorder %v289_v41, 0.0  ;;  %v285_v49 = vmul.f32 %v283_v18, %v268_v28  ;;  %v293_v50 = vmul.f32 %v291_v24, %v266_v23 }
  0x99   : > { %vm317_vm2 = vmand %vm313_vm0, %vm315_vm1  ;;  %vm319_vm3 = vcmp.ge.f32.partialorder %v300_v45, 0.0  ;;  %v279_v52 = vadd.f32 %v277_v33, %v276_v47  ;;  %v296_v53 = vmul.f32 %v294_v25, %v268_v28  ;;  %v304_v54 = vmul.f32 %v302_v26, %v266_v23 }
  0x9a   : > { %vm321_vm4 = vmand %vm317_vm2, %vm319_vm3  ;;  %v287_v55 = vadd.f32 %v285_v49, %v282_v44  ;;  %v307_v56 = vmul.f32 %v305_v27, %v268_v28 }
  0x9b   : > { %v323_v57 = vsel %vm321_vm4, %v311_v48, 1e+30  ;;  %v298_v58 = vadd.f32 %v296_v53, %v293_v50  ;;  %vm314_vm5 = vcmp.ge.f32.partialorder %v279_v52, 0.0 }
  0x9c   : > { %v327_v59 = vmin.f32 %v325_v51, %v323_v57  ;;  %v290_v60 = vadd.f32 %v288_v38, %v287_v55  ;;  %v309_v61 = vadd.f32 %v307_v56, %v304_v54 }
  0x9d   : > { %v301_v62 = vadd.f32 %v299_v42, %v298_v58 }
  0x9e   : > { %329 = vst [vmem:[#allocation9] sm:$0xff] %v327_v59  ;;  %v312_v63 = vadd.f32 %v310_v46, %v309_v61  ;;  %vm316_vm6 = vcmp.ge.f32.partialorder %v290_v60, 0.0 }
  0x9f   : > { %vm318_vm7 = vmand %vm314_vm5, %vm316_vm6  ;;  %vm320_vm8 = vcmp.ge.f32.partialorder %v301_v62, 0.0 }
  0xa0   : > { %vm322_vm9 = vmand %vm318_vm7, %vm320_vm8 }
  0xa1   : > { %v324_v1 = vsel %vm322_vm9, %v312_v63, 1e+30 }
  0xa2   : > { %v328_v2 = vmin.f32 %v326_v0, %v324_v1 }
  0xa4   : > { %330 = vst [vmem:[#allocation9 + $0x8] sm:$0xff] %v328_v2 }
  0xa5 PF: > { %s2010_s9 = sshll.u32 %s1813_s10, 3 }
  0xa6   : > { %s332_s23 = sadd.s32 1, %s2010_s9 }
  0xa7   : > { %s333_s11 = smul.u32 3, %s332_s23 }
  0xa9   : > { %s334_s19 = sld [smem:[#allocation4 + %s333_s11]]  ;;  %s335_s26 = sadd.s32 1, %s333_s11 }
  0xaa   : > { %s336_s6 = sld [smem:[#allocation4 + %s335_s26]]  ;;  %s337_s16 = sadd.s32 2, %s333_s11 }
  0xab   : > { %s338_s27 = sld [smem:[#allocation4 + %s337_s16]] }
  0xaf   : > { %s2013_s4 = smul.u32 3, %s334_s19 }
  0xb0   : > { %s2015_s7 = smul.u32 3, %s336_s6 }
  0xb1   : > { %s2018_s8 = sld [smem:[#allocation7 + %s2013_s4]]  ;;  %s341_s24 = sadd.s32 1, %s2013_s4 }
  0xb2   : > { %s2021_s13 = sld [smem:[#allocation7 + %s341_s24]]  ;;  %s347_s20 = sadd.s32 1, %s2015_s7 }
  0xb3   : > { %s2025_s21 = sld [smem:[#allocation7 + %s2015_s7]]  ;;  %s2027_s18 = smul.u32 3, %s338_s27 }
  0xb4   : > { %s2029_s25 = sld [smem:[#allocation7 + %s347_s20]]  ;;  %s343_s12 = sadd.s32 2, %s2013_s4 }
  0xb5   : > { %s2032_s29 = sld [smem:[#allocation7 + %s2027_s18]]  ;;  %s353_s5 = sadd.s32 1, %s2027_s18 }
  0xb6   : > { %s2035_s3 = sld [smem:[#allocation7 + %s353_s5]]  ;;  %s349_s1 = sadd.s32 2, %s2015_s7 }
  0xb7   : > { %s2071_s20 = sld [smem:[#allocation7 + %s343_s12]] }
  0xb9   : > { %s369_s0 = smul.f32 %s2025_s21, %s2021_s13  ;;  %s410_s28 = smin.f32 %s2025_s21, %s2018_s8 }
  0xba   : > { %s370_s14 = smul.f32 %s2029_s25, %s2018_s8  ;;  %s412_s17 = smax.f32 %s2025_s21, %s2018_s8 }
  0xbb   : > { %s359_s30 = smul.f32 %s2032_s29, %s2029_s25  ;;  %s2050_s15 = smin.f32 %s410_s28, %s2032_s29 }
  0xbc   : > { %s360_s22 = smul.f32 %s2035_s3, %s2025_s21  ;;  %s2054_s23 = ssub.f32 %s369_s0, %s370_s14 }
  0xbd   : > { %s364_s11 = smul.f32 %s2035_s3, %s2018_s8  ;;  %s413_s19 = smax.f32 %s412_s17, %s2032_s29 }
  0xbe   : > { %s361_s26 = ssub.f32 %s359_s30, %s360_s22  ;;  %s365_s6 = smul.f32 %s2032_s29, %s2021_s13 }
  0xbf   : > { %s414_s16 = smin.f32 %s2029_s25, %s2021_s13  ;;  %s416_s27 = smax.f32 %s2029_s25, %s2021_s13 }
  0xc0   : > { %s366_s4 = ssub.f32 %s364_s11, %s365_s6  ;;  %s2066_s7 = smin.f32 %s414_s16, %s2035_s3 }
  0xc1   : > { %s2069_s24 = smax.f32 %s416_s27, %s2035_s3  ;;  %s355_s0 = sadd.s32 2, %s2027_s18 }
  0xc2   : > { %s372_s5 = sadd.f32 %s366_s4, %s361_s26  ;;  %p418_p9 = scmp.ge.f32.partialorder %s413_s19, 0.0 }
  0xc3   : > { %s2074_s28 = sld [smem:[#allocation7 + %s349_s1]]  ;;  %p421_p11 = scmp.le.f32.partialorder %s2050_s15, 16.0 }
  0xc4   : > { %s373_s14 = sadd.f32 %s372_s5, %s2054_s23  ;;  %p424_p12 = scmp.ge.f32.partialorder %s2069_s24, 0.0 }
  0xc5   : > { %s2079_s17 = sld [smem:[#allocation7 + %s355_s0]]  ;;  %p427_p5 = scmp.le.f32.partialorder %s2066_s7, 16.0 }
  0xc6   : > { %s374_s30 = sand.u32 2147483647, %s373_s14  ;;  %p376_p13 = scmp.ge.f32.partialorder %s373_s14, 0.0 }
  0xc7   : > { %p2081_p0 = scmp.gt.f32.partialorder %s374_s30, 1e-06  ;;  %s357_s12 = ssub.f32 %s2035_s3, %s2029_s25 }
  0xc8   : > { %s377_s1 = scalar_select %p376_p13, 1.0, -1.0 }
  0xc9   : > { %s3326_s30 = smov (!%p2081_p0, %s374_s30), 1.0  ;;  %p419_p1 = pnand %p418_p9, %p2081_p0 }
  0xca   : > { %s2089_s22 = smul.f32 %s377_s1, %s361_s26  ;;  %v379_v3 = vstv %s3326_s30  ;;  %s358_s6 = ssub.f32 %s2025_s21, %s2032_s29 }
  0xcb   : > { %s2094_s11 = smul.f32 %s377_s1, %s366_s4  ;;  %1706 = vrcp.f32 %v379_v3  ;;  %p420_p2 = pneg %p419_p1 }
  0xcc   : > { %s2099_s16 = smul.f32 %s377_s1, %s2054_s23  ;;  %s362_s27 = ssub.f32 %s2021_s13, %s2035_s3 }
  0xcd   : > { %s2103_s5 = smul.f32 %s377_s1, %s357_s12  ;;  %p422_p3 = pnand %p421_p11, %p420_p2 }
  0xce   : > { %s363_s19 = ssub.f32 %s2032_s29, %s2018_s8  ;;  %s2111_s0 = smul.f32 %s377_s1, %s358_s6 }
  0xcf   : > { %s367_s26 = ssub.f32 %s2029_s25, %s2021_s13  ;;  %p423_p4 = pneg %p422_p3 }
  0xd0   : > { %s368_s23 = ssub.f32 %s2018_s8, %s2025_s21  ;;  %s2116_s4 = smul.f32 %s377_s1, %s362_s27 }
  0xd1   : > { %p425_p6 = pnand %p424_p12, %p423_p4  ;;  %s2120_s3 = smul.f32 %s377_s1, %s363_s19 }
  0xd2   : > { %s2122_s15 = smul.f32 %s377_s1, %s367_s26 }
  0xd3   : > { %p426_p7 = pneg %p425_p6  ;;  %s2124_s13 = smul.f32 %s377_s1, %s368_s23 }
  0xd4   : > { %s392_s8 = smul.f32 %s2103_s5, %s2071_s20 }
  0xd5   : > { %p428_p8 = pnand %p427_p5, %p426_p7  ;;  %s393_s21 = smul.f32 %s2116_s4, %s2074_s28 }
  0xd6   : > { %s395_s25 = smul.f32 %s2122_s15, %s2079_s17 }
  0xd7   : > { %p429_p10 = pneg %p428_p8  ;;  %s394_s29 = sadd.f32 %s393_s21, %s392_s8 }
  0xd8   : > { %v1707_v4 = vpop.eup %1706  ;;  %s398_s14 = smul.f32 %s2111_s0, %s2071_s20 }
  0xd9   : > { %1651 = vpush %v1707_v4  ;;  %p430_p9 = pnand %p429_p10, %p424_p12  ;;  %s2138_s30 = sadd.f32 %s395_s25, %s394_s29 }
  0xda   : > { %s399_s12 = smul.f32 %s2120_s3, %s2074_s28 }
  0xdb   : > { %p431_p11 = pneg %p430_p9  ;;  %s401_s1 = smul.f32 %s2124_s13, %s2079_s17 }
  0xdc   : > { %s400_s6 = sadd.f32 %s399_s12, %s398_s14  ;;  %s404_s27 = smul.f32 %s2089_s22, %s2071_s20 }
  0xdd   : > { %p432_p13 = pnand %p431_p11, %p427_p5  ;;  %s405_s19 = smul.f32 %s2094_s11, %s2074_s28 }
  0xde   : > { %s402_s26 = sadd.f32 %s401_s1, %s400_s6  ;;  %s407_s23 = smul.f32 %s2099_s16, %s2079_s17 }
  0xdf   : > { %s406_s8 = sadd.f32 %s405_s19, %s404_s27  ;;  %s436_s7 = smul.f32 (!%p432_p13), 0.0, %s2111_s0 }
  0xe0   : > { %s438_s28 = smul.f32 (!%p432_p13), 0.0, %s2120_s3 }
  0xe1   : > { %s2152_s21 = sadd.f32 %s407_s23, %s406_s8  ;;  %s440_s18 = smul.f32 (!%p432_p13), 0.0, %s2124_s13 }
  0xe2   : > { %s2172_s17 = sadd.f32 (!%p432_p13), %s436_s7, %s2089_s22 }
 0x10a   : > { %s1652_s2 = spop %1651  ;;  %435 = sbr.rel (%p432_p13) target bundleno = 292 (0x124), region = 48 }
 0x10b   : > { %s3328_s2 = smov (!%p2081_p0, %s1652_s2), 0.0 }
 0x10c   : > { %s397_s24 = smul.f32 %s2138_s30, %s3328_s2 }
 0x10d   : > { %s2161_s25 = smul.f32 %s402_s26, %s3328_s2 }
 0x10e   : > { %s409_s20 = smul.f32 %s2152_s21, %s3328_s2 }
 0x10f   : > { %v444_v5 = vld [vmem:[#allocation2] sm:$0xff]  ;;  %v446_v6 = vld [vmem:[#allocation3 + $0x8] sm:$0xff]  ;;  %v448_v7 = vstv %s2103_s5  ;;  %v451_v8 = vstv %s2111_s0  ;;  %v459_v9 = vstv %s2116_s4  ;;  %v462_v10 = vstv %s2120_s3  ;;  %v445_v15 = vld [vmem:[#allocation2 + $0x8] sm:$0xff]  ;;  %s2179_s5 = sadd.f32 %s438_s28, %s2094_s11  ;;  %s442_s0 = smul.f32 0.0, %s2161_s25 }
 0x110   : > { %v449_v11 = vmul.f32 %v448_v7, %v444_v5  ;;  %v452_v12 = vmul.f32 %v451_v8, %v446_v6  ;;  %v460_v13 = vmul.f32 %v459_v9, %v444_v5  ;;  %v463_v14 = vmul.f32 %v462_v10, %v446_v6  ;;  %v447_v20 = vld [vmem:[#allocation3] sm:$0xff]  ;;  %s2183_s4 = sadd.f32 %s440_s18, %s2099_s16  ;;  %v504_v43 = vld [vmem:[#allocation9] sm:$0xff]  ;;  %v505_v56 = vld [vmem:[#allocation9 + $0x8] sm:$0xff] }
 0x111   : > { %v470_v16 = vstv %s2122_s15  ;;  %v473_v17 = vstv %s2124_s13  ;;  %v481_v18 = vstv %s397_s24  ;;  %v484_v19 = vstv %s2161_s25  ;;  %s2189_s22 = sadd.f32 %s442_s0, %s409_s20 }
 0x112   : > { %v454_v21 = vadd.f32 %v452_v12, %v449_v11  ;;  %v465_v22 = vadd.f32 %v463_v14, %v460_v13  ;;  %v471_v23 = vmul.f32 %v470_v16, %v444_v5  ;;  %v474_v24 = vmul.f32 %v473_v17, %v446_v6 }
 0x113   : > { %v456_v25 = vstv %s2172_s17  ;;  %v482_v26 = vmul.f32 %v481_v18, %v444_v5  ;;  %v485_v27 = vmul.f32 %v484_v19, %v446_v6  ;;  %v450_v28 = vmul.f32 %v448_v7, %v445_v15 }
 0x114   : > { %v457_v29 = vadd.f32 %v456_v25, %v454_v21  ;;  %v467_v30 = vstv %s2179_s5  ;;  %v476_v31 = vadd.f32 %v474_v24, %v471_v23  ;;  %v453_v32 = vmul.f32 %v451_v8, %v447_v20 }
 0x115   : > { %v468_v33 = vadd.f32 %v467_v30, %v465_v22  ;;  %v478_v34 = vstv %s2183_s4  ;;  %v487_v35 = vadd.f32 %v485_v27, %v482_v26  ;;  %v461_v36 = vmul.f32 %v459_v9, %v445_v15 }
 0x116   : > { %v479_v37 = vadd.f32 %v478_v34, %v476_v31  ;;  %v489_v38 = vstv %s2189_s22  ;;  %vm492_vm10 = vcmp.ge.f32.partialorder %v457_v29, 0.0  ;;  %v455_v39 = vadd.f32 %v453_v32, %v450_v28 }
 0x117   : > { %v490_v40 = vadd.f32 %v489_v38, %v487_v35  ;;  %vm494_vm11 = vcmp.ge.f32.partialorder %v468_v33, 0.0  ;;  %v464_v41 = vmul.f32 %v462_v10, %v447_v20  ;;  %v472_v42 = vmul.f32 %v470_v16, %v445_v15 }
 0x118   : > { %vm496_vm12 = vmand %vm492_vm10, %vm494_vm11  ;;  %vm498_vm13 = vcmp.ge.f32.partialorder %v479_v37, 0.0  ;;  %v458_v44 = vadd.f32 %v456_v25, %v455_v39  ;;  %v475_v45 = vmul.f32 %v473_v17, %v447_v20  ;;  %v483_v46 = vmul.f32 %v481_v18, %v445_v15 }
 0x119   : > { %vm500_vm14 = vmand %vm496_vm12, %vm498_vm13  ;;  %v466_v47 = vadd.f32 %v464_v41, %v461_v36  ;;  %v486_v48 = vmul.f32 %v484_v19, %v447_v20 }
 0x11a   : > { %v502_v49 = vsel %vm500_vm14, %v490_v40, 1e+30  ;;  %v477_v50 = vadd.f32 %v475_v45, %v472_v42  ;;  %vm493_vm15 = vcmp.ge.f32.partialorder %v458_v44, 0.0 }
 0x11b   : > { %v506_v51 = vmin.f32 %v504_v43, %v502_v49  ;;  %v469_v52 = vadd.f32 %v467_v30, %v466_v47  ;;  %v488_v53 = vadd.f32 %v486_v48, %v483_v46 }
 0x11c   : > { %v480_v54 = vadd.f32 %v478_v34, %v477_v50 }
 0x11d   : > { %508 = vst [vmem:[#allocation9] sm:$0xff] %v506_v51  ;;  %v491_v55 = vadd.f32 %v489_v38, %v488_v53  ;;  %vm495_vm0 = vcmp.ge.f32.partialorder %v469_v52, 0.0 }
 0x11e   : > { %vm497_vm1 = vmand %vm493_vm15, %vm495_vm0  ;;  %vm499_vm2 = vcmp.ge.f32.partialorder %v480_v54, 0.0 }
 0x11f   : > { %vm501_vm3 = vmand %vm497_vm1, %vm499_vm2 }
 0x120   : > { %v503_v57 = vsel %vm501_vm3, %v491_v55, 1e+30 }
 0x121   : > { %v507_v58 = vmin.f32 %v505_v56, %v503_v57 }
 0x123   : > { %509 = vst [vmem:[#allocation9 + $0x8] sm:$0xff] %v507_v58 }
 0x124 PF: > { %s510_s2 = sadd.s32 2, %s2010_s9 }
 0x125   : > { %s511_s11 = smul.u32 3, %s510_s2 }
 0x127   : > { %s512_s16 = sld [smem:[#allocation4 + %s511_s11]]  ;;  %s513_s3 = sadd.s32 1, %s511_s11 }
 0x128   : > { %s514_s15 = sld [smem:[#allocation4 + %s513_s3]]  ;;  %s515_s13 = sadd.s32 2, %s511_s11 }
 0x129   : > { %s516_s29 = sld [smem:[#allocation4 + %s515_s13]] }
 0x12d   : > { %s2195_s14 = smul.u32 3, %s512_s16 }
 0x12e   : > { %s2197_s30 = smul.u32 3, %s514_s15 }
 0x12f   : > { %s2200_s12 = sld [smem:[#allocation7 + %s2195_s14]]  ;;  %s519_s1 = sadd.s32 1, %s2195_s14 }
 0x130   : > { %s2203_s6 = sld [smem:[#allocation7 + %s519_s1]]  ;;  %s525_s27 = sadd.s32 1, %s2197_s30 }
 0x131   : > { %s2207_s19 = sld [smem:[#allocation7 + %s2197_s30]]  ;;  %s2209_s26 = smul.u32 3, %s516_s29 }
 0x132   : > { %s2211_s23 = sld [smem:[#allocation7 + %s525_s27]]  ;;  %s521_s25 = sadd.s32 2, %s2195_s14 }
 0x133   : > { %s2214_s8 = sld [smem:[#allocation7 + %s2209_s26]]  ;;  %s531_s21 = sadd.s32 1, %s2209_s26 }
 0x134   : > { %s2217_s24 = sld [smem:[#allocation7 + %s531_s21]]  ;;  %s527_s20 = sadd.s32 2, %s2197_s30 }
 0x135   : > { %s2253_s1 = sld [smem:[#allocation7 + %s521_s25]]  ;;  %s533_s21 = sadd.s32 2, %s2209_s26 }
 0x137   : > { %s547_s7 = smul.f32 %s2207_s19, %s2203_s6  ;;  %s588_s28 = smin.f32 %s2207_s19, %s2200_s12 }
 0x138   : > { %s548_s17 = smul.f32 %s2211_s23, %s2200_s12  ;;  %s590_s18 = smax.f32 %s2207_s19, %s2200_s12 }
 0x139   : > { %s537_s5 = smul.f32 %s2214_s8, %s2211_s23  ;;  %s2232_s0 = smin.f32 %s588_s28, %s2214_s8 }
 0x13a   : > { %s538_s4 = smul.f32 %s2217_s24, %s2207_s19  ;;  %s2236_s22 = ssub.f32 %s547_s7, %s548_s17 }
 0x13b   : > { %s542_s2 = smul.f32 %s2217_s24, %s2200_s12  ;;  %s591_s11 = smax.f32 %s590_s18, %s2214_s8 }
 0x13c   : > { %s539_s16 = ssub.f32 %s537_s5, %s538_s4  ;;  %s543_s3 = smul.f32 %s2214_s8, %s2203_s6 }
 0x13d   : > { %s592_s15 = smin.f32 %s2211_s23, %s2203_s6  ;;  %s594_s13 = smax.f32 %s2211_s23, %s2203_s6 }
 0x13e   : > { %s544_s29 = ssub.f32 %s542_s2, %s543_s3  ;;  %s2248_s14 = smin.f32 %s592_s15, %s2217_s24 }
 0x13f   : > { %s2251_s30 = smax.f32 %s594_s13, %s2217_s24  ;;  %p596_p12 = scmp.ge.f32.partialorder %s591_s11, 0.0 }
 0x140   : > { %s550_s27 = sadd.f32 %s544_s29, %s539_s16  ;;  %p599_p0 = scmp.le.f32.partialorder %s2232_s0, 16.0 }
 0x141   : > { %s2256_s7 = sld [smem:[#allocation7 + %s527_s20]]  ;;  %p602_p1 = scmp.ge.f32.partialorder %s2251_s30, 0.0 }
 0x142   : > { %s551_s28 = sadd.f32 %s550_s27, %s2236_s22  ;;  %p605_p8 = scmp.le.f32.partialorder %s2248_s14, 16.0 }
 0x143   : > { %s2261_s17 = sld [smem:[#allocation7 + %s533_s21]] }
 0x144   : > { %s552_s18 = sand.u32 2147483647, %s551_s28  ;;  %p554_p2 = scmp.ge.f32.partialorder %s551_s28, 0.0 }
 0x145   : > { %p2263_p3 = scmp.gt.f32.partialorder %s552_s18, 1e-06  ;;  %s535_s25 = ssub.f32 %s2217_s24, %s2211_s23 }
 0x146   : > { %s555_s20 = scalar_select %p554_p2, 1.0, -1.0 }
 0x147   : > { %s3330_s18 = smov (!%p2263_p3, %s552_s18), 1.0  ;;  %p597_p4 = pnand %p596_p12, %p2263_p3 }
 0x148   : > { %s2271_s5 = smul.f32 %s555_s20, %s539_s16  ;;  %v557_v59 = vstv %s3330_s18  ;;  %s536_s2 = ssub.f32 %s2207_s19, %s2214_s8 }
 0x149   : > { %s2276_s4 = smul.f32 %s555_s20, %s544_s29  ;;  %1708 = vrcp.f32 %v557_v59  ;;  %p598_p5 = pneg %p597_p4 }
 0x14a   : > { %s2281_s3 = smul.f32 %s555_s20, %s2236_s22  ;;  %s540_s15 = ssub.f32 %s2203_s6, %s2217_s24 }
 0x14b   : > { %s2285_s13 = smul.f32 %s555_s20, %s535_s25  ;;  %p600_p6 = pnand %p599_p0, %p598_p5 }
 0x14c   : > { %s541_s11 = ssub.f32 %s2214_s8, %s2200_s12  ;;  %s2293_s27 = smul.f32 %s555_s20, %s536_s2 }
 0x14d   : > { %s545_s16 = ssub.f32 %s2211_s23, %s2203_s6  ;;  %p601_p7 = pneg %p600_p6 }
 0x14e   : > { %s546_s22 = ssub.f32 %s2200_s12, %s2207_s19  ;;  %s2298_s29 = smul.f32 %s555_s20, %s540_s15 }
 0x14f   : > { %p603_p10 = pnand %p602_p1, %p601_p7  ;;  %s2302_s24 = smul.f32 %s555_s20, %s541_s11 }
 0x150   : > { %s2304_s0 = smul.f32 %s555_s20, %s545_s16 }
 0x151   : > { %p604_p9 = pneg %p603_p10  ;;  %s2306_s6 = smul.f32 %s555_s20, %s546_s22 }
 0x152   : > { %s570_s12 = smul.f32 %s2285_s13, %s2253_s1 }
 0x153   : > { %p606_p11 = pnand %p605_p8, %p604_p9  ;;  %s571_s19 = smul.f32 %s2298_s29, %s2256_s7 }
 0x154   : > { %s573_s23 = smul.f32 %s2304_s0, %s2261_s17 }
 0x155   : > { %p607_p13 = pneg %p606_p11  ;;  %s572_s8 = sadd.f32 %s571_s19, %s570_s12 }
 0x156   : > { %v1709_v60 = vpop.eup %1708  ;;  %s576_s21 = smul.f32 %s2293_s27, %s2253_s1 }
 0x157   : > { %1653 = vpush %v1709_v60  ;;  %p608_p12 = pnand %p607_p13, %p602_p1  ;;  %s2320_s28 = sadd.f32 %s573_s23, %s572_s8 }
 0x158   : > { %s577_s18 = smul.f32 %s2302_s24, %s2256_s7 }
 0x159   : > { %p609_p0 = pneg %p608_p12  ;;  %s579_s25 = smul.f32 %s2306_s6, %s2261_s17 }
 0x15a   : > { %s578_s20 = sadd.f32 %s577_s18, %s576_s21  ;;  %s582_s2 = smul.f32 %s2271_s5, %s2253_s1 }
 0x15b   : > { %p610_p2 = pnand %p609_p0, %p605_p8  ;;  %s583_s15 = smul.f32 %s2276_s4, %s2256_s7 }
 0x15c   : > { %s580_s11 = sadd.f32 %s579_s25, %s578_s20  ;;  %s585_s16 = smul.f32 %s2281_s3, %s2261_s17 }
 0x15d   : > { %s584_s22 = sadd.f32 %s583_s15, %s582_s2  ;;  %s614_s14 = smul.f32 (!%p610_p2), 0.0, %s2293_s27 }
 0x15e   : > { %s616_s7 = smul.f32 (!%p610_p2), 0.0, %s2302_s24 }
 0x15f   : > { %s2334_s12 = sadd.f32 %s585_s16, %s584_s22  ;;  %s618_s26 = smul.f32 (!%p610_p2), 0.0, %s2306_s6 }
 0x160   : > { %s2354_s17 = sadd.f32 (!%p610_p2), %s614_s14, %s2271_s5 }
 0x188   : > { %s1654_s19 = spop %1653  ;;  %613 = sbr.rel (%p610_p2) target bundleno = 418 (0x1a2), region = 52 }
 0x189   : > { %s3332_s19 = smov (!%p2263_p3, %s1654_s19), 0.0 }
 0x18a   : > { %s575_s30 = smul.f32 %s2320_s28, %s3332_s19 }
 0x18b   : > { %s2343_s23 = smul.f32 %s580_s11, %s3332_s19 }
 0x18c   : > { %s587_s1 = smul.f32 %s2334_s12, %s3332_s19 }
 0x18d   : > { %v622_v61 = vld [vmem:[#allocation2] sm:$0xff]  ;;  %v624_v62 = vld [vmem:[#allocation3 + $0x8] sm:$0xff]  ;;  %v626_v63 = vstv %s2285_s13  ;;  %v629_v0 = vstv %s2293_s27  ;;  %v637_v1 = vstv %s2298_s29  ;;  %v640_v2 = vstv %s2302_s24  ;;  %v623_v7 = vld [vmem:[#allocation2 + $0x8] sm:$0xff]  ;;  %s2361_s13 = sadd.f32 %s616_s7, %s2276_s4  ;;  %s620_s27 = smul.f32 0.0, %s2343_s23 }
 0x18e   : > { %v627_v3 = vmul.f32 %v626_v63, %v622_v61  ;;  %v630_v4 = vmul.f32 %v629_v0, %v624_v62  ;;  %v638_v5 = vmul.f32 %v637_v1, %v622_v61  ;;  %v641_v6 = vmul.f32 %v640_v2, %v624_v62  ;;  %v625_v12 = vld [vmem:[#allocation3] sm:$0xff]  ;;  %s2365_s29 = sadd.f32 %s618_s26, %s2281_s3  ;;  %v682_v35 = vld [vmem:[#allocation9] sm:$0xff]  ;;  %v683_v48 = vld [vmem:[#allocation9 + $0x8] sm:$0xff] }
 0x18f   : > { %v648_v8 = vstv %s2304_s0  ;;  %v651_v9 = vstv %s2306_s6  ;;  %v659_v10 = vstv %s575_s30  ;;  %v662_v11 = vstv %s2343_s23  ;;  %s2371_s5 = sadd.f32 %s620_s27, %s587_s1 }
 0x190   : > { %v632_v13 = vadd.f32 %v630_v4, %v627_v3  ;;  %v643_v14 = vadd.f32 %v641_v6, %v638_v5  ;;  %v649_v15 = vmul.f32 %v648_v8, %v622_v61  ;;  %v652_v16 = vmul.f32 %v651_v9, %v624_v62 }
 0x191   : > { %v634_v17 = vstv %s2354_s17  ;;  %v660_v18 = vmul.f32 %v659_v10, %v622_v61  ;;  %v663_v19 = vmul.f32 %v662_v11, %v624_v62  ;;  %v628_v20 = vmul.f32 %v626_v63, %v623_v7 }
 0x192   : > { %v635_v21 = vadd.f32 %v634_v17, %v632_v13  ;;  %v645_v22 = vstv %s2361_s13  ;;  %v654_v23 = vadd.f32 %v652_v16, %v649_v15  ;;  %v631_v24 = vmul.f32 %v629_v0, %v625_v12 }
 0x193   : > { %v646_v25 = vadd.f32 %v645_v22, %v643_v14  ;;  %v656_v26 = vstv %s2365_s29  ;;  %v665_v27 = vadd.f32 %v663_v19, %v660_v18  ;;  %v639_v28 = vmul.f32 %v637_v1, %v623_v7 }
 0x194   : > { %v657_v29 = vadd.f32 %v656_v26, %v654_v23  ;;  %v667_v30 = vstv %s2371_s5  ;;  %vm670_vm4 = vcmp.ge.f32.partialorder %v635_v21, 0.0  ;;  %v633_v31 = vadd.f32 %v631_v24, %v628_v20 }
 0x195   : > { %v668_v32 = vadd.f32 %v667_v30, %v665_v27  ;;  %vm672_vm5 = vcmp.ge.f32.partialorder %v646_v25, 0.0  ;;  %v642_v33 = vmul.f32 %v640_v2, %v625_v12  ;;  %v650_v34 = vmul.f32 %v648_v8, %v623_v7 }
 0x196   : > { %vm674_vm6 = vmand %vm670_vm4, %vm672_vm5  ;;  %vm676_vm7 = vcmp.ge.f32.partialorder %v657_v29, 0.0  ;;  %v636_v36 = vadd.f32 %v634_v17, %v633_v31  ;;  %v653_v37 = vmul.f32 %v651_v9, %v625_v12  ;;  %v661_v38 = vmul.f32 %v659_v10, %v623_v7 }
 0x197   : > { %vm678_vm8 = vmand %vm674_vm6, %vm676_vm7  ;;  %v644_v39 = vadd.f32 %v642_v33, %v639_v28  ;;  %v664_v40 = vmul.f32 %v662_v11, %v625_v12 }
 0x198   : > { %v680_v41 = vsel %vm678_vm8, %v668_v32, 1e+30  ;;  %v655_v42 = vadd.f32 %v653_v37, %v650_v34  ;;  %vm671_vm9 = vcmp.ge.f32.partialorder %v636_v36, 0.0 }
 0x199   : > { %v684_v43 = vmin.f32 %v682_v35, %v680_v41  ;;  %v647_v44 = vadd.f32 %v645_v22, %v644_v39  ;;  %v666_v45 = vadd.f32 %v664_v40, %v661_v38 }
 0x19a   : > { %v658_v46 = vadd.f32 %v656_v26, %v655_v42 }
 0x19b   : > { %686 = vst [vmem:[#allocation9] sm:$0xff] %v684_v43  ;;  %v669_v47 = vadd.f32 %v667_v30, %v666_v45  ;;  %vm673_vm10 = vcmp.ge.f32.partialorder %v647_v44, 0.0 }
 0x19c   : > { %vm675_vm11 = vmand %vm671_vm9, %vm673_vm10  ;;  %vm677_vm12 = vcmp.ge.f32.partialorder %v658_v46, 0.0 }
 0x19d   : > { %vm679_vm13 = vmand %vm675_vm11, %vm677_vm12 }
 0x19e   : > { %v681_v49 = vsel %vm679_vm13, %v669_v47, 1e+30 }
 0x19f   : > { %v685_v50 = vmin.f32 %v683_v48, %v681_v49 }
 0x1a1   : > { %687 = vst [vmem:[#allocation9 + $0x8] sm:$0xff] %v685_v50 }
 0x1a2 PF: > { %s688_s4 = sadd.s32 3, %s2010_s9 }
 0x1a3   : > { %s689_s3 = smul.u32 3, %s688_s4 }
 0x1a5   : > { %s690_s24 = sld [smem:[#allocation4 + %s689_s3]]  ;;  %s691_s0 = sadd.s32 1, %s689_s3 }
 0x1a6   : > { %s692_s6 = sld [smem:[#allocation4 + %s691_s0]]  ;;  %s693_s8 = sadd.s32 2, %s689_s3 }
 0x1a7   : > { %s694_s21 = sld [smem:[#allocation4 + %s693_s8]] }
 0x1ab   : > { %s2377_s28 = smul.u32 3, %s690_s24 }
 0x1ac   : > { %s2379_s18 = smul.u32 3, %s692_s6 }
 0x1ad   : > { %s2382_s25 = sld [smem:[#allocation7 + %s2377_s28]]  ;;  %s697_s20 = sadd.s32 1, %s2377_s28 }
 0x1ae   : > { %s2385_s2 = sld [smem:[#allocation7 + %s697_s20]]  ;;  %s703_s15 = sadd.s32 1, %s2379_s18 }
 0x1af   : > { %s2389_s11 = sld [smem:[#allocation7 + %s2379_s18]]  ;;  %s2391_s16 = smul.u32 3, %s694_s21 }
 0x1b0   : > { %s2393_s22 = sld [smem:[#allocation7 + %s703_s15]]  ;;  %s699_s23 = sadd.s32 2, %s2377_s28 }
 0x1b1   : > { %s2396_s12 = sld [smem:[#allocation7 + %s2391_s16]]  ;;  %s709_s19 = sadd.s32 1, %s2391_s16 }
 0x1b2   : > { %s2399_s30 = sld [smem:[#allocation7 + %s709_s19]]  ;;  %s705_s1 = sadd.s32 2, %s2379_s18 }
 0x1b3   : > { %s2435_s20 = sld [smem:[#allocation7 + %s699_s23]]  ;;  %s711_s19 = sadd.s32 2, %s2391_s16 }
 0x1b5   : > { %s725_s14 = smul.f32 %s2389_s11, %s2385_s2  ;;  %s766_s7 = smin.f32 %s2389_s11, %s2382_s25 }
 0x1b6   : > { %s726_s17 = smul.f32 %s2393_s22, %s2382_s25  ;;  %s768_s26 = smax.f32 %s2389_s11, %s2382_s25 }
 0x1b7   : > { %s715_s13 = smul.f32 %s2396_s12, %s2393_s22  ;;  %s2414_s27 = smin.f32 %s766_s7, %s2396_s12 }
 0x1b8   : > { %s716_s29 = smul.f32 %s2399_s30, %s2389_s11  ;;  %s2418_s5 = ssub.f32 %s725_s14, %s726_s17 }
 0x1b9   : > { %s720_s4 = smul.f32 %s2399_s30, %s2382_s25  ;;  %s769_s3 = smax.f32 %s768_s26, %s2396_s12 }
 0x1ba   : > { %s717_s24 = ssub.f32 %s715_s13, %s716_s29  ;;  %s721_s0 = smul.f32 %s2396_s12, %s2385_s2 }
 0x1bb   : > { %s770_s6 = smin.f32 %s2393_s22, %s2385_s2  ;;  %s772_s8 = smax.f32 %s2393_s22, %s2385_s2 }
 0x1bc   : > { %s722_s21 = ssub.f32 %s720_s4, %s721_s0  ;;  %s2430_s28 = smin.f32 %s770_s6, %s2399_s30 }
 0x1bd   : > { %s2433_s18 = smax.f32 %s772_s8, %s2399_s30  ;;  %p774_p1 = scmp.ge.f32.partialorder %s769_s3, 0.0 }
 0x1be   : > { %s728_s15 = sadd.f32 %s722_s21, %s717_s24  ;;  %p777_p3 = scmp.le.f32.partialorder %s2414_s27, 16.0 }
 0x1bf   : > { %s2438_s14 = sld [smem:[#allocation7 + %s705_s1]]  ;;  %p780_p4 = scmp.ge.f32.partialorder %s2433_s18, 0.0 }
 0x1c0   : > { %s729_s7 = sadd.f32 %s728_s15, %s2418_s5  ;;  %p783_p11 = scmp.le.f32.partialorder %s2430_s28, 16.0 }
 0x1c1   : > { %s2443_s17 = sld [smem:[#allocation7 + %s711_s19]] }
 0x1c2   : > { %s730_s26 = sand.u32 2147483647, %s729_s7  ;;  %p732_p5 = scmp.ge.f32.partialorder %s729_s7, 0.0 }
 0x1c3   : > { %p2445_p6 = scmp.gt.f32.partialorder %s730_s26, 1e-06  ;;  %s713_s23 = ssub.f32 %s2399_s30, %s2393_s22 }
 0x1c4   : > { %s733_s1 = scalar_select %p732_p5, 1.0, -1.0 }
 0x1c5   : > { %s3334_s26 = smov (!%p2445_p6, %s730_s26), 1.0  ;;  %p775_p7 = pnand %p774_p1, %p2445_p6 }
 0x1c6   : > { %s2453_s13 = smul.f32 %s733_s1, %s717_s24  ;;  %v735_v51 = vstv %s3334_s26  ;;  %s714_s4 = ssub.f32 %s2389_s11, %s2396_s12 }
 0x1c7   : > { %s2458_s29 = smul.f32 %s733_s1, %s722_s21  ;;  %1710 = vrcp.f32 %v735_v51  ;;  %p776_p8 = pneg %p775_p7 }
 0x1c8   : > { %s2463_s0 = smul.f32 %s733_s1, %s2418_s5  ;;  %s718_s6 = ssub.f32 %s2385_s2, %s2399_s30 }
 0x1c9   : > { %s2467_s8 = smul.f32 %s733_s1, %s713_s23  ;;  %p778_p10 = pnand %p777_p3, %p776_p8 }
 0x1ca   : > { %s719_s3 = ssub.f32 %s2396_s12, %s2382_s25  ;;  %s2475_s15 = smul.f32 %s733_s1, %s714_s4 }
 0x1cb   : > { %s723_s24 = ssub.f32 %s2393_s22, %s2385_s2  ;;  %p779_p9 = pneg %p778_p10 }
 0x1cc   : > { %s724_s5 = ssub.f32 %s2382_s25, %s2389_s11  ;;  %s2480_s21 = smul.f32 %s733_s1, %s718_s6 }
 0x1cd   : > { %p781_p13 = pnand %p780_p4, %p779_p9  ;;  %s2484_s30 = smul.f32 %s733_s1, %s719_s3 }
 0x1ce   : > { %s2486_s27 = smul.f32 %s733_s1, %s723_s24 }
 0x1cf   : > { %p782_p12 = pneg %p781_p13  ;;  %s2488_s2 = smul.f32 %s733_s1, %s724_s5 }
 0x1d0   : > { %s748_s25 = smul.f32 %s2467_s8, %s2435_s20 }
 0x1d1   : > { %p784_p0 = pnand %p783_p11, %p782_p12  ;;  %s749_s11 = smul.f32 %s2480_s21, %s2438_s14 }
 0x1d2   : > { %s751_s22 = smul.f32 %s2486_s27, %s2443_s17 }
 0x1d3   : > { %p785_p2 = pneg %p784_p0  ;;  %s750_s12 = sadd.f32 %s749_s11, %s748_s25 }
 0x1d4   : > { %v1711_v52 = vpop.eup %1710  ;;  %s754_s19 = smul.f32 %s2475_s15, %s2435_s20 }
 0x1d5   : > { %1655 = vpush %v1711_v52  ;;  %p786_p1 = pnand %p785_p2, %p780_p4  ;;  %s2502_s7 = sadd.f32 %s751_s22, %s750_s12 }
 0x1d6   : > { %s755_s26 = smul.f32 %s2484_s30, %s2438_s14 }
 0x1d7   : > { %p787_p3 = pneg %p786_p1  ;;  %s757_s23 = smul.f32 %s2488_s2, %s2443_s17 }
 0x1d8   : > { %s756_s1 = sadd.f32 %s755_s26, %s754_s19  ;;  %s760_s4 = smul.f32 %s2453_s13, %s2435_s20 }
 0x1d9   : > { %p788_p5 = pnand %p787_p3, %p783_p11  ;;  %s761_s6 = smul.f32 %s2458_s29, %s2438_s14 }
 0x1da   : > { %s758_s3 = sadd.f32 %s757_s23, %s756_s1  ;;  %s763_s24 = smul.f32 %s2463_s0, %s2443_s17 }
 0x1db   : > { %s762_s5 = sadd.f32 %s761_s6, %s760_s4  ;;  %s792_s28 = smul.f32 (!%p788_p5), 0.0, %s2475_s15 }
 0x1dc   : > { %s794_s14 = smul.f32 (!%p788_p5), 0.0, %s2484_s30 }
 0x1dd   : > { %s2516_s25 = sadd.f32 %s763_s24, %s762_s5  ;;  %s796_s16 = smul.f32 (!%p788_p5), 0.0, %s2488_s2 }
 0x1de   : > { %s2536_s17 = sadd.f32 (!%p788_p5), %s792_s28, %s2453_s13 }
 0x206   : > { %s1656_s11 = spop %1655  ;;  %791 = sbr.rel (%p788_p5) target bundleno = 544 (0x220), region = 56 }
 0x207   : > { %s3336_s11 = smov (!%p2445_p6, %s1656_s11), 0.0 }
 0x208   : > { %s753_s18 = smul.f32 %s2502_s7, %s3336_s11 }
 0x209   : > { %s2525_s22 = smul.f32 %s758_s3, %s3336_s11 }
 0x20a   : > { %s765_s20 = smul.f32 %s2516_s25, %s3336_s11 }
 0x20b   : > { %v800_v53 = vld [vmem:[#allocation2] sm:$0xff]  ;;  %v802_v54 = vld [vmem:[#allocation3 + $0x8] sm:$0xff]  ;;  %v804_v55 = vstv %s2467_s8  ;;  %v807_v56 = vstv %s2475_s15  ;;  %v815_v57 = vstv %s2480_s21  ;;  %v818_v58 = vstv %s2484_s30  ;;  %v801_v63 = vld [vmem:[#allocation2 + $0x8] sm:$0xff]  ;;  %s2543_s8 = sadd.f32 %s794_s14, %s2458_s29  ;;  %s798_s15 = smul.f32 0.0, %s2525_s22 }
 0x20c   : > { %v805_v59 = vmul.f32 %v804_v55, %v800_v53  ;;  %v808_v60 = vmul.f32 %v807_v56, %v802_v54  ;;  %v816_v61 = vmul.f32 %v815_v57, %v800_v53  ;;  %v819_v62 = vmul.f32 %v818_v58, %v802_v54  ;;  %v803_v4 = vld [vmem:[#allocation3] sm:$0xff]  ;;  %s2547_s21 = sadd.f32 %s796_s16, %s2463_s0  ;;  %v860_v27 = vld [vmem:[#allocation9] sm:$0xff]  ;;  %v861_v40 = vld [vmem:[#allocation9 + $0x8] sm:$0xff] }
 0x20d   : > { %v826_v0 = vstv %s2486_s27  ;;  %v829_v1 = vstv %s2488_s2  ;;  %v837_v2 = vstv %s753_s18  ;;  %v840_v3 = vstv %s2525_s22  ;;  %s2553_s13 = sadd.f32 %s798_s15, %s765_s20 }
 0x20e   : > { %v810_v5 = vadd.f32 %v808_v60, %v805_v59  ;;  %v821_v6 = vadd.f32 %v819_v62, %v816_v61  ;;  %v827_v7 = vmul.f32 %v826_v0, %v800_v53  ;;  %v830_v8 = vmul.f32 %v829_v1, %v802_v54 }
 0x20f   : > { %v812_v9 = vstv %s2536_s17  ;;  %v838_v10 = vmul.f32 %v837_v2, %v800_v53  ;;  %v841_v11 = vmul.f32 %v840_v3, %v802_v54  ;;  %v806_v12 = vmul.f32 %v804_v55, %v801_v63 }
 0x210   : > { %v813_v13 = vadd.f32 %v812_v9, %v810_v5  ;;  %v823_v14 = vstv %s2543_s8  ;;  %v832_v15 = vadd.f32 %v830_v8, %v827_v7  ;;  %v809_v16 = vmul.f32 %v807_v56, %v803_v4 }
 0x211   : > { %v824_v17 = vadd.f32 %v823_v14, %v821_v6  ;;  %v834_v18 = vstv %s2547_s21  ;;  %v843_v19 = vadd.f32 %v841_v11, %v838_v10  ;;  %v817_v20 = vmul.f32 %v815_v57, %v801_v63 }
 0x212   : > { %v835_v21 = vadd.f32 %v834_v18, %v832_v15  ;;  %v845_v22 = vstv %s2553_s13  ;;  %vm848_vm14 = vcmp.ge.f32.partialorder %v813_v13, 0.0  ;;  %v811_v23 = vadd.f32 %v809_v16, %v806_v12 }
 0x213   : > { %v846_v24 = vadd.f32 %v845_v22, %v843_v19  ;;  %vm850_vm15 = vcmp.ge.f32.partialorder %v824_v17, 0.0  ;;  %v820_v25 = vmul.f32 %v818_v58, %v803_v4  ;;  %v828_v26 = vmul.f32 %v826_v0, %v801_v63 }
 0x214   : > { %vm852_vm0 = vmand %vm848_vm14, %vm850_vm15  ;;  %vm854_vm1 = vcmp.ge.f32.partialorder %v835_v21, 0.0  ;;  %v814_v28 = vadd.f32 %v812_v9, %v811_v23  ;;  %v831_v29 = vmul.f32 %v829_v1, %v803_v4  ;;  %v839_v30 = vmul.f32 %v837_v2, %v801_v63 }
 0x215   : > { %vm856_vm2 = vmand %vm852_vm0, %vm854_vm1  ;;  %v822_v31 = vadd.f32 %v820_v25, %v817_v20  ;;  %v842_v32 = vmul.f32 %v840_v3, %v803_v4 }
 0x216   : > { %v858_v33 = vsel %vm856_vm2, %v846_v24, 1e+30  ;;  %v833_v34 = vadd.f32 %v831_v29, %v828_v26  ;;  %vm849_vm3 = vcmp.ge.f32.partialorder %v814_v28, 0.0 }
 0x217   : > { %v862_v35 = vmin.f32 %v860_v27, %v858_v33  ;;  %v825_v36 = vadd.f32 %v823_v14, %v822_v31  ;;  %v844_v37 = vadd.f32 %v842_v32, %v839_v30 }
 0x218   : > { %v836_v38 = vadd.f32 %v834_v18, %v833_v34 }
 0x219   : > { %864 = vst [vmem:[#allocation9] sm:$0xff] %v862_v35  ;;  %v847_v39 = vadd.f32 %v845_v22, %v844_v37  ;;  %vm851_vm4 = vcmp.ge.f32.partialorder %v825_v36, 0.0 }
 0x21a   : > { %vm853_vm5 = vmand %vm849_vm3, %vm851_vm4  ;;  %vm855_vm6 = vcmp.ge.f32.partialorder %v836_v38, 0.0 }
 0x21b   : > { %vm857_vm7 = vmand %vm853_vm5, %vm855_vm6 }
 0x21c   : > { %v859_v41 = vsel %vm857_vm7, %v847_v39, 1e+30 }
 0x21d   : > { %v863_v42 = vmin.f32 %v861_v40, %v859_v41 }
 0x21f   : > { %865 = vst [vmem:[#allocation9 + $0x8] sm:$0xff] %v863_v42 }
 0x220 PF: > { %s866_s29 = sadd.s32 4, %s2010_s9 }
 0x221   : > { %s867_s0 = smul.u32 3, %s866_s29 }
 0x223   : > { %s868_s30 = sld [smem:[#allocation4 + %s867_s0]]  ;;  %s869_s27 = sadd.s32 1, %s867_s0 }
 0x224   : > { %s870_s2 = sld [smem:[#allocation4 + %s869_s27]]  ;;  %s871_s12 = sadd.s32 2, %s867_s0 }
 0x225   : > { %s872_s19 = sld [smem:[#allocation4 + %s871_s12]] }
 0x229   : > { %s2559_s7 = smul.u32 3, %s868_s30 }
 0x22a   : > { %s2561_s26 = smul.u32 3, %s870_s2 }
 0x22b   : > { %s2564_s23 = sld [smem:[#allocation7 + %s2559_s7]]  ;;  %s875_s1 = sadd.s32 1, %s2559_s7 }
 0x22c   : > { %s2567_s4 = sld [smem:[#allocation7 + %s875_s1]]  ;;  %s881_s6 = sadd.s32 1, %s2561_s26 }
 0x22d   : > { %s2571_s3 = sld [smem:[#allocation7 + %s2561_s26]]  ;;  %s2573_s24 = smul.u32 3, %s872_s19 }
 0x22e   : > { %s2575_s5 = sld [smem:[#allocation7 + %s881_s6]]  ;;  %s877_s22 = sadd.s32 2, %s2559_s7 }
 0x22f   : > { %s2578_s25 = sld [smem:[#allocation7 + %s2573_s24]]  ;;  %s887_s11 = sadd.s32 1, %s2573_s24 }
 0x230   : > { %s2581_s18 = sld [smem:[#allocation7 + %s887_s11]]  ;;  %s883_s20 = sadd.s32 2, %s2561_s26 }
 0x231   : > { %s2617_s1 = sld [smem:[#allocation7 + %s877_s22]]  ;;  %s889_s11 = sadd.s32 2, %s2573_s24 }
 0x233   : > { %s903_s28 = smul.f32 %s2571_s3, %s2567_s4  ;;  %s944_s14 = smin.f32 %s2571_s3, %s2564_s23 }
 0x234   : > { %s904_s17 = smul.f32 %s2575_s5, %s2564_s23  ;;  %s946_s16 = smax.f32 %s2571_s3, %s2564_s23 }
 0x235   : > { %s893_s8 = smul.f32 %s2578_s25, %s2575_s5  ;;  %s2596_s15 = smin.f32 %s944_s14, %s2578_s25 }
 0x236   : > { %s894_s21 = smul.f32 %s2581_s18, %s2571_s3  ;;  %s2600_s13 = ssub.f32 %s903_s28, %s904_s17 }
 0x237   : > { %s898_s29 = smul.f32 %s2581_s18, %s2564_s23  ;;  %s947_s0 = smax.f32 %s946_s16, %s2578_s25 }
 0x238   : > { %s895_s30 = ssub.f32 %s893_s8, %s894_s21  ;;  %s899_s27 = smul.f32 %s2578_s25, %s2567_s4 }
 0x239   : > { %s948_s2 = smin.f32 %s2575_s5, %s2567_s4  ;;  %s950_s12 = smax.f32 %s2575_s5, %s2567_s4 }
 0x23a   : > { %s900_s19 = ssub.f32 %s898_s29, %s899_s27  ;;  %s2612_s7 = smin.f32 %s948_s2, %s2581_s18 }
 0x23b   : > { %s2615_s26 = smax.f32 %s950_s12, %s2581_s18  ;;  %p952_p4 = scmp.ge.f32.partialorder %s947_s0, 0.0 }
 0x23c   : > { %s906_s6 = sadd.f32 %s900_s19, %s895_s30  ;;  %p955_p6 = scmp.le.f32.partialorder %s2596_s15, 16.0 }
 0x23d   : > { %s2620_s28 = sld [smem:[#allocation7 + %s883_s20]]  ;;  %p958_p7 = scmp.ge.f32.partialorder %s2615_s26, 0.0 }
 0x23e   : > { %s907_s14 = sadd.f32 %s906_s6, %s2600_s13  ;;  %p961_p0 = scmp.le.f32.partialorder %s2612_s7, 16.0 }
 0x23f   : > { %s2625_s17 = sld [smem:[#allocation7 + %s889_s11]] }
 0x240   : > { %s908_s16 = sand.u32 2147483647, %s907_s14  ;;  %p910_p8 = scmp.ge.f32.partialorder %s907_s14, 0.0 }
 0x241   : > { %p2627_p10 = scmp.gt.f32.partialorder %s908_s16, 1e-06  ;;  %s891_s22 = ssub.f32 %s2581_s18, %s2575_s5 }
 0x242   : > { %s911_s20 = scalar_select %p910_p8, 1.0, -1.0 }
 0x243   : > { %s3338_s16 = smov (!%p2627_p10, %s908_s16), 1.0  ;;  %p953_p9 = pnand %p952_p4, %p2627_p10 }
 0x244   : > { %s2635_s8 = smul.f32 %s911_s20, %s895_s30  ;;  %v913_v43 = vstv %s3338_s16  ;;  %s892_s29 = ssub.f32 %s2571_s3, %s2578_s25 }
 0x245   : > { %s2640_s21 = smul.f32 %s911_s20, %s900_s19  ;;  %1712 = vrcp.f32 %v913_v43  ;;  %p954_p11 = pneg %p953_p9 }
 0x246   : > { %s2645_s27 = smul.f32 %s911_s20, %s2600_s13  ;;  %s896_s2 = ssub.f32 %s2567_s4, %s2581_s18 }
 0x247   : > { %s2649_s12 = smul.f32 %s911_s20, %s891_s22  ;;  %p956_p13 = pnand %p955_p6, %p954_p11 }
 0x248   : > { %s897_s0 = ssub.f32 %s2578_s25, %s2564_s23  ;;  %s2657_s6 = smul.f32 %s911_s20, %s892_s29 }
 0x249   : > { %s901_s30 = ssub.f32 %s2575_s5, %s2567_s4  ;;  %p957_p12 = pneg %p956_p13 }
 0x24a   : > { %s902_s13 = ssub.f32 %s2564_s23, %s2571_s3  ;;  %s2662_s19 = smul.f32 %s911_s20, %s896_s2 }
 0x24b   : > { %p959_p2 = pnand %p958_p7, %p957_p12  ;;  %s2666_s18 = smul.f32 %s911_s20, %s897_s0 }
 0x24c   : > { %s2668_s15 = smul.f32 %s911_s20, %s901_s30 }
 0x24d   : > { %p960_p1 = pneg %p959_p2  ;;  %s2670_s4 = smul.f32 %s911_s20, %s902_s13 }
 0x24e   : > { %s926_s23 = smul.f32 %s2649_s12, %s2617_s1 }
 0x24f   : > { %p962_p3 = pnand %p961_p0, %p960_p1  ;;  %s927_s3 = smul.f32 %s2662_s19, %s2620_s28 }
 0x250   : > { %s929_s5 = smul.f32 %s2668_s15, %s2625_s17 }
 0x251   : > { %p963_p5 = pneg %p962_p3  ;;  %s928_s25 = sadd.f32 %s927_s3, %s926_s23 }
 0x252   : > { %v1713_v44 = vpop.eup %1712  ;;  %s932_s11 = smul.f32 %s2657_s6, %s2617_s1 }
 0x253   : > { %1657 = vpush %v1713_v44  ;;  %p964_p4 = pnand %p963_p5, %p958_p7  ;;  %s2684_s14 = sadd.f32 %s929_s5, %s928_s25 }
 0x254   : > { %s933_s16 = smul.f32 %s2666_s18, %s2620_s28 }
 0x255   : > { %p965_p6 = pneg %p964_p4  ;;  %s935_s22 = smul.f32 %s2670_s4, %s2625_s17 }
 0x256   : > { %s934_s20 = sadd.f32 %s933_s16, %s932_s11  ;;  %s938_s29 = smul.f32 %s2635_s8, %s2617_s1 }
 0x257   : > { %p966_p8 = pnand %p965_p6, %p961_p0  ;;  %s939_s2 = smul.f32 %s2640_s21, %s2620_s28 }
 0x258   : > { %s936_s0 = sadd.f32 %s935_s22, %s934_s20  ;;  %s941_s30 = smul.f32 %s2645_s27, %s2625_s17 }
 0x259   : > { %s940_s13 = sadd.f32 %s939_s2, %s938_s29  ;;  %s970_s7 = smul.f32 (!%p966_p8), 0.0, %s2657_s6 }
 0x25a   : > { %s972_s28 = smul.f32 (!%p966_p8), 0.0, %s2666_s18 }
 0x25b   : > { %s2698_s23 = sadd.f32 %s941_s30, %s940_s13  ;;  %s974_s24 = smul.f32 (!%p966_p8), 0.0, %s2670_s4 }
 0x25c   : > { %s2718_s17 = sadd.f32 (!%p966_p8), %s970_s7, %s2635_s8 }
 0x284   : > { %s1658_s3 = spop %1657  ;;  %969 = sbr.rel (%p966_p8) target bundleno = 670 (0x29e), region = 60 }
 0x285   : > { %s3340_s3 = smov (!%p2627_p10, %s1658_s3), 0.0 }
 0x286   : > { %s931_s26 = smul.f32 %s2684_s14, %s3340_s3 }
 0x287   : > { %s2707_s5 = smul.f32 %s936_s0, %s3340_s3 }
 0x288   : > { %s943_s1 = smul.f32 %s2698_s23, %s3340_s3 }
 0x289   : > { %v978_v45 = vld [vmem:[#allocation2] sm:$0xff]  ;;  %v980_v46 = vld [vmem:[#allocation3 + $0x8] sm:$0xff]  ;;  %v982_v47 = vstv %s2649_s12  ;;  %v985_v48 = vstv %s2657_s6  ;;  %v993_v49 = vstv %s2662_s19  ;;  %v996_v50 = vstv %s2666_s18  ;;  %v979_v55 = vld [vmem:[#allocation2 + $0x8] sm:$0xff]  ;;  %s2725_s12 = sadd.f32 %s972_s28, %s2640_s21  ;;  %s976_s6 = smul.f32 0.0, %s2707_s5 }
 0x28a   : > { %v983_v51 = vmul.f32 %v982_v47, %v978_v45  ;;  %v986_v52 = vmul.f32 %v985_v48, %v980_v46  ;;  %v994_v53 = vmul.f32 %v993_v49, %v978_v45  ;;  %v997_v54 = vmul.f32 %v996_v50, %v980_v46  ;;  %v981_v60 = vld [vmem:[#allocation3] sm:$0xff]  ;;  %s2729_s19 = sadd.f32 %s974_s24, %s2645_s27  ;;  %v1038_v19 = vld [vmem:[#allocation9] sm:$0xff]  ;;  %v1039_v32 = vld [vmem:[#allocation9 + $0x8] sm:$0xff] }
 0x28b   : > { %v1004_v56 = vstv %s2668_s15  ;;  %v1007_v57 = vstv %s2670_s4  ;;  %v1015_v58 = vstv %s931_s26  ;;  %v1018_v59 = vstv %s2707_s5  ;;  %s2735_s8 = sadd.f32 %s976_s6, %s943_s1 }
 0x28c   : > { %v988_v61 = vadd.f32 %v986_v52, %v983_v51  ;;  %v999_v62 = vadd.f32 %v997_v54, %v994_v53  ;;  %v1005_v63 = vmul.f32 %v1004_v56, %v978_v45  ;;  %v1008_v0 = vmul.f32 %v1007_v57, %v980_v46 }
 0x28d   : > { %v990_v1 = vstv %s2718_s17  ;;  %v1016_v2 = vmul.f32 %v1015_v58, %v978_v45  ;;  %v1019_v3 = vmul.f32 %v1018_v59, %v980_v46  ;;  %v984_v4 = vmul.f32 %v982_v47, %v979_v55 }
 0x28e   : > { %v991_v5 = vadd.f32 %v990_v1, %v988_v61  ;;  %v1001_v6 = vstv %s2725_s12  ;;  %v1010_v7 = vadd.f32 %v1008_v0, %v1005_v63  ;;  %v987_v8 = vmul.f32 %v985_v48, %v981_v60 }
 0x28f   : > { %v1002_v9 = vadd.f32 %v1001_v6, %v999_v62  ;;  %v1012_v10 = vstv %s2729_s19  ;;  %v1021_v11 = vadd.f32 %v1019_v3, %v1016_v2  ;;  %v995_v12 = vmul.f32 %v993_v49, %v979_v55 }
 0x290   : > { %v1013_v13 = vadd.f32 %v1012_v10, %v1010_v7  ;;  %v1023_v14 = vstv %s2735_s8  ;;  %vm1026_vm8 = vcmp.ge.f32.partialorder %v991_v5, 0.0  ;;  %v989_v15 = vadd.f32 %v987_v8, %v984_v4 }
 0x291   : > { %v1024_v16 = vadd.f32 %v1023_v14, %v1021_v11  ;;  %vm1028_vm9 = vcmp.ge.f32.partialorder %v1002_v9, 0.0  ;;  %v998_v17 = vmul.f32 %v996_v50, %v981_v60  ;;  %v1006_v18 = vmul.f32 %v1004_v56, %v979_v55 }
 0x292   : > { %vm1030_vm10 = vmand %vm1026_vm8, %vm1028_vm9  ;;  %vm1032_vm11 = vcmp.ge.f32.partialorder %v1013_v13, 0.0  ;;  %v992_v20 = vadd.f32 %v990_v1, %v989_v15  ;;  %v1009_v21 = vmul.f32 %v1007_v57, %v981_v60  ;;  %v1017_v22 = vmul.f32 %v1015_v58, %v979_v55 }
 0x293   : > { %vm1034_vm12 = vmand %vm1030_vm10, %vm1032_vm11  ;;  %v1000_v23 = vadd.f32 %v998_v17, %v995_v12  ;;  %v1020_v24 = vmul.f32 %v1018_v59, %v981_v60 }
 0x294   : > { %v1036_v25 = vsel %vm1034_vm12, %v1024_v16, 1e+30  ;;  %v1011_v26 = vadd.f32 %v1009_v21, %v1006_v18  ;;  %vm1027_vm13 = vcmp.ge.f32.partialorder %v992_v20, 0.0 }
 0x295   : > { %v1040_v27 = vmin.f32 %v1038_v19, %v1036_v25  ;;  %v1003_v28 = vadd.f32 %v1001_v6, %v1000_v23  ;;  %v1022_v29 = vadd.f32 %v1020_v24, %v1017_v22 }
 0x296   : > { %v1014_v30 = vadd.f32 %v1012_v10, %v1011_v26 }
 0x297   : > { %1042 = vst [vmem:[#allocation9] sm:$0xff] %v1040_v27  ;;  %v1025_v31 = vadd.f32 %v1023_v14, %v1022_v29  ;;  %vm1029_vm14 = vcmp.ge.f32.partialorder %v1003_v28, 0.0 }
 0x298   : > { %vm1031_vm15 = vmand %vm1027_vm13, %vm1029_vm14  ;;  %vm1033_vm0 = vcmp.ge.f32.partialorder %v1014_v30, 0.0 }
 0x299   : > { %vm1035_vm1 = vmand %vm1031_vm15, %vm1033_vm0 }
 0x29a   : > { %v1037_v33 = vsel %vm1035_vm1, %v1025_v31, 1e+30 }
 0x29b   : > { %v1041_v34 = vmin.f32 %v1039_v32, %v1037_v33 }
 0x29d   : > { %1043 = vst [vmem:[#allocation9 + $0x8] sm:$0xff] %v1041_v34 }
 0x29e PF: > { %s1044_s21 = sadd.s32 5, %s2010_s9 }
 0x29f   : > { %s1045_s27 = smul.u32 3, %s1044_s21 }
 0x2a1   : > { %s1046_s18 = sld [smem:[#allocation4 + %s1045_s27]]  ;;  %s1047_s15 = sadd.s32 1, %s1045_s27 }
 0x2a2   : > { %s1048_s4 = sld [smem:[#allocation4 + %s1047_s15]]  ;;  %s1049_s25 = sadd.s32 2, %s1045_s27 }
 0x2a3   : > { %s1050_s11 = sld [smem:[#allocation4 + %s1049_s25]] }
 0x2a7   : > { %s2741_s14 = smul.u32 3, %s1046_s18 }
 0x2a8   : > { %s2743_s16 = smul.u32 3, %s1048_s4 }
 0x2a9   : > { %s2746_s22 = sld [smem:[#allocation7 + %s2741_s14]]  ;;  %s1053_s20 = sadd.s32 1, %s2741_s14 }
 0x2aa   : > { %s2749_s29 = sld [smem:[#allocation7 + %s1053_s20]]  ;;  %s1059_s2 = sadd.s32 1, %s2743_s16 }
 0x2ab   : > { %s2753_s0 = sld [smem:[#allocation7 + %s2743_s16]]  ;;  %s2755_s30 = smul.u32 3, %s1050_s11 }
 0x2ac   : > { %s2757_s13 = sld [smem:[#allocation7 + %s1059_s2]]  ;;  %s1055_s5 = sadd.s32 2, %s2741_s14 }
 0x2ad   : > { %s2760_s23 = sld [smem:[#allocation7 + %s2755_s30]]  ;;  %s1065_s3 = sadd.s32 1, %s2755_s30 }
 0x2ae   : > { %s2763_s26 = sld [smem:[#allocation7 + %s1065_s3]]  ;;  %s1061_s1 = sadd.s32 2, %s2743_s16 }
 0x2af   : > { %s2799_s20 = sld [smem:[#allocation7 + %s1055_s5]]  ;;  %s1067_s3 = sadd.s32 2, %s2755_s30 }
 0x2b1   : > { %s1081_s7 = smul.f32 %s2753_s0, %s2749_s29  ;;  %s1122_s28 = smin.f32 %s2753_s0, %s2746_s22 }
 0x2b2   : > { %s1082_s17 = smul.f32 %s2757_s13, %s2746_s22  ;;  %s1124_s24 = smax.f32 %s2753_s0, %s2746_s22 }
 0x2b3   : > { %s1071_s12 = smul.f32 %s2760_s23, %s2757_s13  ;;  %s2778_s6 = smin.f32 %s1122_s28, %s2760_s23 }
 0x2b4   : > { %s1072_s19 = smul.f32 %s2763_s26, %s2753_s0  ;;  %s2782_s8 = ssub.f32 %s1081_s7, %s1082_s17 }
 0x2b5   : > { %s1076_s21 = smul.f32 %s2763_s26, %s2746_s22  ;;  %s1125_s27 = smax.f32 %s1124_s24, %s2760_s23 }
 0x2b6   : > { %s1073_s18 = ssub.f32 %s1071_s12, %s1072_s19  ;;  %s1077_s15 = smul.f32 %s2760_s23, %s2749_s29 }
 0x2b7   : > { %s1126_s4 = smin.f32 %s2757_s13, %s2749_s29  ;;  %s1128_s25 = smax.f32 %s2757_s13, %s2749_s29 }
 0x2b8   : > { %s1078_s11 = ssub.f32 %s1076_s21, %s1077_s15  ;;  %s2794_s14 = smin.f32 %s1126_s4, %s2763_s26 }
 0x2b9   : > { %s2797_s16 = smax.f32 %s1128_s25, %s2763_s26  ;;  %p1130_p7 = scmp.ge.f32.partialorder %s1125_s27, 0.0 }
 0x2ba   : > { %s1084_s2 = sadd.f32 %s1078_s11, %s1073_s18  ;;  %p1133_p10 = scmp.le.f32.partialorder %s2778_s6, 16.0 }
 0x2bb   : > { %s2802_s7 = sld [smem:[#allocation7 + %s1061_s1]]  ;;  %p1136_p9 = scmp.ge.f32.partialorder %s2797_s16, 0.0 }
 0x2bc   : > { %s1085_s28 = sadd.f32 %s1084_s2, %s2782_s8  ;;  %p1139_p3 = scmp.le.f32.partialorder %s2794_s14, 16.0 }
 0x2bd   : > { %s2807_s17 = sld [smem:[#allocation7 + %s1067_s3]] }
 0x2be   : > { %s1086_s24 = sand.u32 2147483647, %s1085_s28  ;;  %p1088_p11 = scmp.ge.f32.partialorder %s1085_s28, 0.0 }
 0x2bf   : > { %p2809_p13 = scmp.gt.f32.partialorder %s1086_s24, 1e-06  ;;  %s1069_s5 = ssub.f32 %s2763_s26, %s2757_s13 }
 0x2c0   : > { %s1089_s1 = scalar_select %p1088_p11, 1.0, -1.0 }
 0x2c1   : > { %s3342_s24 = smov (!%p2809_p13, %s1086_s24), 1.0  ;;  %p1131_p12 = pnand %p1130_p7, %p2809_p13 }
 0x2c2   : > { %s2817_s12 = smul.f32 %s1089_s1, %s1073_s18  ;;  %v1091_v35 = vstv %s3342_s24  ;;  %s1070_s21 = ssub.f32 %s2753_s0, %s2760_s23 }
 0x2c3   : > { %s2822_s19 = smul.f32 %s1089_s1, %s1078_s11  ;;  %1714 = vrcp.f32 %v1091_v35  ;;  %p1132_p0 = pneg %p1131_p12 }
 0x2c4   : > { %s2827_s15 = smul.f32 %s1089_s1, %s2782_s8  ;;  %s1074_s4 = ssub.f32 %s2749_s29, %s2763_s26 }
 0x2c5   : > { %s2831_s25 = smul.f32 %s1089_s1, %s1069_s5  ;;  %p1134_p2 = pnand %p1133_p10, %p1132_p0 }
 0x2c6   : > { %s1075_s27 = ssub.f32 %s2760_s23, %s2746_s22  ;;  %s2839_s2 = smul.f32 %s1089_s1, %s1070_s21 }
 0x2c7   : > { %s1079_s18 = ssub.f32 %s2757_s13, %s2749_s29  ;;  %p1135_p1 = pneg %p1134_p2 }
 0x2c8   : > { %s1080_s8 = ssub.f32 %s2746_s22, %s2753_s0  ;;  %s2844_s11 = smul.f32 %s1089_s1, %s1074_s4 }
 0x2c9   : > { %p1137_p5 = pnand %p1136_p9, %p1135_p1  ;;  %s2848_s26 = smul.f32 %s1089_s1, %s1075_s27 }
 0x2ca   : > { %s2850_s6 = smul.f32 %s1089_s1, %s1079_s18 }
 0x2cb   : > { %p1138_p4 = pneg %p1137_p5  ;;  %s2852_s29 = smul.f32 %s1089_s1, %s1080_s8 }
 0x2cc   : > { %s1104_s22 = smul.f32 %s2831_s25, %s2799_s20 }
 0x2cd   : > { %p1140_p6 = pnand %p1139_p3, %p1138_p4  ;;  %s1105_s0 = smul.f32 %s2844_s11, %s2802_s7 }
 0x2ce   : > { %s1107_s13 = smul.f32 %s2850_s6, %s2807_s17 }
 0x2cf   : > { %p1141_p8 = pneg %p1140_p6  ;;  %s1106_s23 = sadd.f32 %s1105_s0, %s1104_s22 }
 0x2d0   : > { %v1715_v36 = vpop.eup %1714  ;;  %s1110_s3 = smul.f32 %s2839_s2, %s2799_s20 }
 0x2d1   : > { %1659 = vpush %v1715_v36  ;;  %p1142_p7 = pnand %p1141_p8, %p1136_p9  ;;  %s2866_s28 = sadd.f32 %s1107_s13, %s1106_s23 }
 0x2d2   : > { %s1111_s24 = smul.f32 %s2848_s26, %s2802_s7 }
 0x2d3   : > { %p1143_p10 = pneg %p1142_p7  ;;  %s1113_s5 = smul.f32 %s2852_s29, %s2807_s17 }
 0x2d4   : > { %s1112_s1 = sadd.f32 %s1111_s24, %s1110_s3  ;;  %s1116_s21 = smul.f32 %s2817_s12, %s2799_s20 }
 0x2d5   : > { %p1144_p11 = pnand %p1143_p10, %p1139_p3  ;;  %s1117_s4 = smul.f32 %s2822_s19, %s2802_s7 }
 0x2d6   : > { %s1114_s27 = sadd.f32 %s1113_s5, %s1112_s1  ;;  %s1119_s18 = smul.f32 %s2827_s15, %s2807_s17 }
 0x2d7   : > { %s1118_s8 = sadd.f32 %s1117_s4, %s1116_s21  ;;  %s1148_s14 = smul.f32 (!%p1144_p11), 0.0, %s2839_s2 }
 0x2d8   : > { %s1150_s7 = smul.f32 (!%p1144_p11), 0.0, %s2848_s26 }
 0x2d9   : > { %s2880_s22 = sadd.f32 %s1119_s18, %s1118_s8  ;;  %s1152_s30 = smul.f32 (!%p1144_p11), 0.0, %s2852_s29 }
 0x2da   : > { %s2900_s17 = sadd.f32 (!%p1144_p11), %s1148_s14, %s2817_s12 }
 0x302   : > { %s1660_s0 = spop %1659  ;;  %1147 = sbr.rel (%p1144_p11) target bundleno = 796 (0x31c), region = 64 }
 0x303   : > { %s3344_s0 = smov (!%p2809_p13, %s1660_s0), 0.0 }
 0x304   : > { %s1109_s16 = smul.f32 %s2866_s28, %s3344_s0 }
 0x305   : > { %s2889_s13 = smul.f32 %s1114_s27, %s3344_s0 }
 0x306   : > { %s1121_s20 = smul.f32 %s2880_s22, %s3344_s0 }
 0x307   : > { %v1156_v37 = vld [vmem:[#allocation2] sm:$0xff]  ;;  %v1158_v38 = vld [vmem:[#allocation3 + $0x8] sm:$0xff]  ;;  %v1160_v39 = vstv %s2831_s25  ;;  %v1163_v40 = vstv %s2839_s2  ;;  %v1171_v41 = vstv %s2844_s11  ;;  %v1174_v42 = vstv %s2848_s26  ;;  %v1157_v47 = vld [vmem:[#allocation2 + $0x8] sm:$0xff]  ;;  %s2907_s25 = sadd.f32 %s1150_s7, %s2822_s19  ;;  %s1154_s2 = smul.f32 0.0, %s2889_s13 }
 0x308   : > { %v1161_v43 = vmul.f32 %v1160_v39, %v1156_v37  ;;  %v1164_v44 = vmul.f32 %v1163_v40, %v1158_v38  ;;  %v1172_v45 = vmul.f32 %v1171_v41, %v1156_v37  ;;  %v1175_v46 = vmul.f32 %v1174_v42, %v1158_v38  ;;  %v1159_v52 = vld [vmem:[#allocation3] sm:$0xff]  ;;  %s2911_s11 = sadd.f32 %s1152_s30, %s2827_s15  ;;  %v1216_v11 = vld [vmem:[#allocation9] sm:$0xff]  ;;  %v1217_v24 = vld [vmem:[#allocation9 + $0x8] sm:$0xff] }
 0x309   : > { %v1182_v48 = vstv %s2850_s6  ;;  %v1185_v49 = vstv %s2852_s29  ;;  %v1193_v50 = vstv %s1109_s16  ;;  %v1196_v51 = vstv %s2889_s13  ;;  %s2917_s12 = sadd.f32 %s1154_s2, %s1121_s20 }
 0x30a   : > { %v1166_v53 = vadd.f32 %v1164_v44, %v1161_v43  ;;  %v1177_v54 = vadd.f32 %v1175_v46, %v1172_v45  ;;  %v1183_v55 = vmul.f32 %v1182_v48, %v1156_v37  ;;  %v1186_v56 = vmul.f32 %v1185_v49, %v1158_v38 }
 0x30b   : > { %v1168_v57 = vstv %s2900_s17  ;;  %v1194_v58 = vmul.f32 %v1193_v50, %v1156_v37  ;;  %v1197_v59 = vmul.f32 %v1196_v51, %v1158_v38  ;;  %v1162_v60 = vmul.f32 %v1160_v39, %v1157_v47 }
 0x30c   : > { %v1169_v61 = vadd.f32 %v1168_v57, %v1166_v53  ;;  %v1179_v62 = vstv %s2907_s25  ;;  %v1188_v63 = vadd.f32 %v1186_v56, %v1183_v55  ;;  %v1165_v0 = vmul.f32 %v1163_v40, %v1159_v52 }
 0x30d   : > { %v1180_v1 = vadd.f32 %v1179_v62, %v1177_v54  ;;  %v1190_v2 = vstv %s2911_s11  ;;  %v1199_v3 = vadd.f32 %v1197_v59, %v1194_v58  ;;  %v1173_v4 = vmul.f32 %v1171_v41, %v1157_v47 }
 0x30e   : > { %v1191_v5 = vadd.f32 %v1190_v2, %v1188_v63  ;;  %v1201_v6 = vstv %s2917_s12  ;;  %vm1204_vm2 = vcmp.ge.f32.partialorder %v1169_v61, 0.0  ;;  %v1167_v7 = vadd.f32 %v1165_v0, %v1162_v60 }
 0x30f   : > { %v1202_v8 = vadd.f32 %v1201_v6, %v1199_v3  ;;  %vm1206_vm3 = vcmp.ge.f32.partialorder %v1180_v1, 0.0  ;;  %v1176_v9 = vmul.f32 %v1174_v42, %v1159_v52  ;;  %v1184_v10 = vmul.f32 %v1182_v48, %v1157_v47 }
 0x310   : > { %vm1208_vm4 = vmand %vm1204_vm2, %vm1206_vm3  ;;  %vm1210_vm5 = vcmp.ge.f32.partialorder %v1191_v5, 0.0  ;;  %v1170_v12 = vadd.f32 %v1168_v57, %v1167_v7  ;;  %v1187_v13 = vmul.f32 %v1185_v49, %v1159_v52  ;;  %v1195_v14 = vmul.f32 %v1193_v50, %v1157_v47 }
 0x311   : > { %vm1212_vm6 = vmand %vm1208_vm4, %vm1210_vm5  ;;  %v1178_v15 = vadd.f32 %v1176_v9, %v1173_v4  ;;  %v1198_v16 = vmul.f32 %v1196_v51, %v1159_v52 }
 0x312   : > { %v1214_v17 = vsel %vm1212_vm6, %v1202_v8, 1e+30  ;;  %v1189_v18 = vadd.f32 %v1187_v13, %v1184_v10  ;;  %vm1205_vm7 = vcmp.ge.f32.partialorder %v1170_v12, 0.0 }
 0x313   : > { %v1218_v19 = vmin.f32 %v1216_v11, %v1214_v17  ;;  %v1181_v20 = vadd.f32 %v1179_v62, %v1178_v15  ;;  %v1200_v21 = vadd.f32 %v1198_v16, %v1195_v14 }
 0x314   : > { %v1192_v22 = vadd.f32 %v1190_v2, %v1189_v18 }
 0x315   : > { %1220 = vst [vmem:[#allocation9] sm:$0xff] %v1218_v19  ;;  %v1203_v23 = vadd.f32 %v1201_v6, %v1200_v21  ;;  %vm1207_vm8 = vcmp.ge.f32.partialorder %v1181_v20, 0.0 }
 0x316   : > { %vm1209_vm9 = vmand %vm1205_vm7, %vm1207_vm8  ;;  %vm1211_vm10 = vcmp.ge.f32.partialorder %v1192_v22, 0.0 }
 0x317   : > { %vm1213_vm11 = vmand %vm1209_vm9, %vm1211_vm10 }
 0x318   : > { %v1215_v25 = vsel %vm1213_vm11, %v1203_v23, 1e+30 }
 0x319   : > { %v1219_v26 = vmin.f32 %v1217_v24, %v1215_v25 }
 0x31b   : > { %1221 = vst [vmem:[#allocation9 + $0x8] sm:$0xff] %v1219_v26 }
 0x31c PF: > { %s1222_s19 = sadd.s32 6, %s2010_s9 }
 0x31d   : > { %s1223_s15 = smul.u32 3, %s1222_s19 }
 0x31f   : > { %s1224_s26 = sld [smem:[#allocation4 + %s1223_s15]]  ;;  %s1225_s6 = sadd.s32 1, %s1223_s15 }
 0x320   : > { %s1226_s29 = sld [smem:[#allocation4 + %s1225_s6]]  ;;  %s1227_s23 = sadd.s32 2, %s1223_s15 }
 0x321   : > { %s1228_s3 = sld [smem:[#allocation4 + %s1227_s23]] }
 0x325   : > { %s2923_s28 = smul.u32 3, %s1224_s26 }
 0x326   : > { %s2925_s24 = smul.u32 3, %s1226_s29 }
 0x327   : > { %s2928_s5 = sld [smem:[#allocation7 + %s2923_s28]]  ;;  %s1231_s1 = sadd.s32 1, %s2923_s28 }
 0x328   : > { %s2931_s21 = sld [smem:[#allocation7 + %s1231_s1]]  ;;  %s1237_s4 = sadd.s32 1, %s2925_s24 }
 0x329   : > { %s2935_s27 = sld [smem:[#allocation7 + %s2925_s24]]  ;;  %s2937_s18 = smul.u32 3, %s1228_s3 }
 0x32a   : > { %s2939_s8 = sld [smem:[#allocation7 + %s1237_s4]]  ;;  %s1233_s13 = sadd.s32 2, %s2923_s28 }
 0x32b   : > { %s2942_s22 = sld [smem:[#allocation7 + %s2937_s18]]  ;;  %s1243_s0 = sadd.s32 1, %s2937_s18 }
 0x32c   : > { %s2945_s16 = sld [smem:[#allocation7 + %s1243_s0]]  ;;  %s1239_s20 = sadd.s32 2, %s2925_s24 }
 0x32d   : > { %s2981_s1 = sld [smem:[#allocation7 + %s1233_s13]]  ;;  %s1245_s0 = sadd.s32 2, %s2937_s18 }
 0x32f   : > { %s1259_s14 = smul.f32 %s2935_s27, %s2931_s21  ;;  %s1300_s7 = smin.f32 %s2935_s27, %s2928_s5 }
 0x330   : > { %s1260_s17 = smul.f32 %s2939_s8, %s2928_s5  ;;  %s1302_s30 = smax.f32 %s2935_s27, %s2928_s5 }
 0x331   : > { %s1249_s25 = smul.f32 %s2942_s22, %s2939_s8  ;;  %s2960_s2 = smin.f32 %s1300_s7, %s2942_s22 }
 0x332   : > { %s1250_s11 = smul.f32 %s2945_s16, %s2935_s27  ;;  %s2964_s12 = ssub.f32 %s1259_s14, %s1260_s17 }
 0x333   : > { %s1254_s19 = smul.f32 %s2945_s16, %s2928_s5  ;;  %s1303_s15 = smax.f32 %s1302_s30, %s2942_s22 }
 0x334   : > { %s1251_s26 = ssub.f32 %s1249_s25, %s1250_s11  ;;  %s1255_s6 = smul.f32 %s2942_s22, %s2931_s21 }
 0x335   : > { %s1304_s29 = smin.f32 %s2939_s8, %s2931_s21  ;;  %s1306_s23 = smax.f32 %s2939_s8, %s2931_s21 }
 0x336   : > { %s1256_s3 = ssub.f32 %s1254_s19, %s1255_s6  ;;  %s2976_s28 = smin.f32 %s1304_s29, %s2945_s16 }
 0x337   : > { %s2979_s24 = smax.f32 %s1306_s23, %s2945_s16  ;;  %p1308_p9 = scmp.ge.f32.partialorder %s1303_s15, 0.0 }
 0x338   : > { %s1262_s4 = sadd.f32 %s1256_s3, %s1251_s26  ;;  %p1311_p13 = scmp.le.f32.partialorder %s2960_s2, 16.0 }
 0x339   : > { %s2984_s14 = sld [smem:[#allocation7 + %s1239_s20]]  ;;  %p1314_p12 = scmp.ge.f32.partialorder %s2979_s24, 0.0 }
 0x33a   : > { %s1263_s7 = sadd.f32 %s1262_s4, %s2964_s12  ;;  %p1317_p6 = scmp.le.f32.partialorder %s2976_s28, 16.0 }
 0x33b   : > { %s2989_s17 = sld [smem:[#allocation7 + %s1245_s0]] }
 0x33c   : > { %s1264_s30 = sand.u32 2147483647, %s1263_s7  ;;  %p1266_p0 = scmp.ge.f32.partialorder %s1263_s7, 0.0 }
 0x33d   : > { %p2991_p2 = scmp.gt.f32.partialorder %s1264_s30, 1e-06  ;;  %s1247_s13 = ssub.f32 %s2945_s16, %s2939_s8 }
 0x33e   : > { %s1267_s20 = scalar_select %p1266_p0, 1.0, -1.0 }
 0x33f   : > { %s3346_s30 = smov (!%p2991_p2, %s1264_s30), 1.0  ;;  %p1309_p1 = pnand %p1308_p9, %p2991_p2 }
 0x340   : > { %s2999_s25 = smul.f32 %s1267_s20, %s1251_s26  ;;  %v1269_v27 = vstv %s3346_s30  ;;  %s1248_s19 = ssub.f32 %s2935_s27, %s2942_s22 }
 0x341   : > { %s3004_s11 = smul.f32 %s1267_s20, %s1256_s3  ;;  %1716 = vrcp.f32 %v1269_v27  ;;  %p1310_p3 = pneg %p1309_p1 }
 0x342   : > { %s3009_s6 = smul.f32 %s1267_s20, %s2964_s12  ;;  %s1252_s29 = ssub.f32 %s2931_s21, %s2945_s16 }
 0x343   : > { %s3013_s23 = smul.f32 %s1267_s20, %s1247_s13  ;;  %p1312_p5 = pnand %p1311_p13, %p1310_p3 }
 0x344   : > { %s1253_s15 = ssub.f32 %s2942_s22, %s2928_s5  ;;  %s3021_s4 = smul.f32 %s1267_s20, %s1248_s19 }
 0x345   : > { %s1257_s26 = ssub.f32 %s2939_s8, %s2931_s21  ;;  %p1313_p4 = pneg %p1312_p5 }
 0x346   : > { %s1258_s12 = ssub.f32 %s2928_s5, %s2935_s27  ;;  %s3026_s3 = smul.f32 %s1267_s20, %s1252_s29 }
 0x347   : > { %p1315_p8 = pnand %p1314_p12, %p1313_p4  ;;  %s3030_s16 = smul.f32 %s1267_s20, %s1253_s15 }
 0x348   : > { %s3032_s2 = smul.f32 %s1267_s20, %s1257_s26 }
 0x349   : > { %p1316_p7 = pneg %p1315_p8  ;;  %s3034_s21 = smul.f32 %s1267_s20, %s1258_s12 }
 0x34a   : > { %s1282_s5 = smul.f32 %s3013_s23, %s2981_s1 }
 0x34b   : > { %p1318_p10 = pnand %p1317_p6, %p1316_p7  ;;  %s1283_s27 = smul.f32 %s3026_s3, %s2984_s14 }
 0x34c   : > { %s1285_s8 = smul.f32 %s3032_s2, %s2989_s17 }
 0x34d   : > { %p1319_p11 = pneg %p1318_p10  ;;  %s1284_s22 = sadd.f32 %s1283_s27, %s1282_s5 }
 0x34e   : > { %v1717_v28 = vpop.eup %1716  ;;  %s1288_s0 = smul.f32 %s3021_s4, %s2981_s1 }
 0x34f   : > { %1661 = vpush %v1717_v28  ;;  %p1320_p9 = pnand %p1319_p11, %p1314_p12  ;;  %s3048_s7 = sadd.f32 %s1285_s8, %s1284_s22 }
 0x350   : > { %s1289_s30 = smul.f32 %s3030_s16, %s2984_s14 }
 0x351   : > { %p1321_p13 = pneg %p1320_p9  ;;  %s1291_s13 = smul.f32 %s3034_s21, %s2989_s17 }
 0x352   : > { %s1290_s20 = sadd.f32 %s1289_s30, %s1288_s0  ;;  %s1294_s19 = smul.f32 %s2999_s25, %s2981_s1 }
 0x353   : > { %p1322_p0 = pnand %p1321_p13, %p1317_p6  ;;  %s1295_s29 = smul.f32 %s3004_s11, %s2984_s14 }
 0x354   : > { %s1292_s15 = sadd.f32 %s1291_s13, %s1290_s20  ;;  %s1297_s26 = smul.f32 %s3009_s6, %s2989_s17 }
 0x355   : > { %s1296_s12 = sadd.f32 %s1295_s29, %s1294_s19  ;;  %s1326_s28 = smul.f32 (!%p1322_p0), 0.0, %s3021_s4 }
 0x356   : > { %s1328_s14 = smul.f32 (!%p1322_p0), 0.0, %s3030_s16 }
 0x357   : > { %s3062_s5 = sadd.f32 %s1297_s26, %s1296_s12  ;;  %s1330_s18 = smul.f32 (!%p1322_p0), 0.0, %s3034_s21 }
 0x358   : > { %s3082_s17 = sadd.f32 (!%p1322_p0), %s1326_s28, %s2999_s25 }
 0x380   : > { %s1662_s27 = spop %1661  ;;  %1325 = sbr.rel (%p1322_p0) target bundleno = 922 (0x39a), region = 68 }
 0x381   : > { %s3348_s27 = smov (!%p2991_p2, %s1662_s27), 0.0 }
 0x382   : > { %s1287_s24 = smul.f32 %s3048_s7, %s3348_s27 }
 0x383   : > { %s3071_s8 = smul.f32 %s1292_s15, %s3348_s27 }
 0x384   : > { %s1299_s1 = smul.f32 %s3062_s5, %s3348_s27 }
 0x385   : > { %v1334_v29 = vld [vmem:[#allocation2] sm:$0xff]  ;;  %v1336_v30 = vld [vmem:[#allocation3 + $0x8] sm:$0xff]  ;;  %v1338_v31 = vstv %s3013_s23  ;;  %v1341_v32 = vstv %s3021_s4  ;;  %v1349_v33 = vstv %s3026_s3  ;;  %v1352_v34 = vstv %s3030_s16  ;;  %v1335_v39 = vld [vmem:[#allocation2 + $0x8] sm:$0xff]  ;;  %s3089_s23 = sadd.f32 %s1328_s14, %s3004_s11  ;;  %s1332_s4 = smul.f32 0.0, %s3071_s8 }
 0x386   : > { %v1339_v35 = vmul.f32 %v1338_v31, %v1334_v29  ;;  %v1342_v36 = vmul.f32 %v1341_v32, %v1336_v30  ;;  %v1350_v37 = vmul.f32 %v1349_v33, %v1334_v29  ;;  %v1353_v38 = vmul.f32 %v1352_v34, %v1336_v30  ;;  %v1337_v44 = vld [vmem:[#allocation3] sm:$0xff]  ;;  %s3093_s3 = sadd.f32 %s1330_s18, %s3009_s6  ;;  %v1394_v3 = vld [vmem:[#allocation9] sm:$0xff]  ;;  %v1395_v16 = vld [vmem:[#allocation9 + $0x8] sm:$0xff] }
 0x387   : > { %v1360_v40 = vstv %s3032_s2  ;;  %v1363_v41 = vstv %s3034_s21  ;;  %v1371_v42 = vstv %s1287_s24  ;;  %v1374_v43 = vstv %s3071_s8  ;;  %s3099_s25 = sadd.f32 %s1332_s4, %s1299_s1 }
 0x388   : > { %v1344_v45 = vadd.f32 %v1342_v36, %v1339_v35  ;;  %v1355_v46 = vadd.f32 %v1353_v38, %v1350_v37  ;;  %v1361_v47 = vmul.f32 %v1360_v40, %v1334_v29  ;;  %v1364_v48 = vmul.f32 %v1363_v41, %v1336_v30 }
 0x389   : > { %v1346_v49 = vstv %s3082_s17  ;;  %v1372_v50 = vmul.f32 %v1371_v42, %v1334_v29  ;;  %v1375_v51 = vmul.f32 %v1374_v43, %v1336_v30  ;;  %v1340_v52 = vmul.f32 %v1338_v31, %v1335_v39 }
 0x38a   : > { %v1347_v53 = vadd.f32 %v1346_v49, %v1344_v45  ;;  %v1357_v54 = vstv %s3089_s23  ;;  %v1366_v55 = vadd.f32 %v1364_v48, %v1361_v47  ;;  %v1343_v56 = vmul.f32 %v1341_v32, %v1337_v44 }
 0x38b   : > { %v1358_v57 = vadd.f32 %v1357_v54, %v1355_v46  ;;  %v1368_v58 = vstv %s3093_s3  ;;  %v1377_v59 = vadd.f32 %v1375_v51, %v1372_v50  ;;  %v1351_v60 = vmul.f32 %v1349_v33, %v1335_v39 }
 0x38c   : > { %v1369_v61 = vadd.f32 %v1368_v58, %v1366_v55  ;;  %v1379_v62 = vstv %s3099_s25  ;;  %vm1382_vm12 = vcmp.ge.f32.partialorder %v1347_v53, 0.0  ;;  %v1345_v63 = vadd.f32 %v1343_v56, %v1340_v52 }
 0x38d   : > { %v1380_v0 = vadd.f32 %v1379_v62, %v1377_v59  ;;  %vm1384_vm13 = vcmp.ge.f32.partialorder %v1358_v57, 0.0  ;;  %v1354_v1 = vmul.f32 %v1352_v34, %v1337_v44  ;;  %v1362_v2 = vmul.f32 %v1360_v40, %v1335_v39 }
 0x38e   : > { %vm1386_vm14 = vmand %vm1382_vm12, %vm1384_vm13  ;;  %vm1388_vm15 = vcmp.ge.f32.partialorder %v1369_v61, 0.0  ;;  %v1348_v4 = vadd.f32 %v1346_v49, %v1345_v63  ;;  %v1365_v5 = vmul.f32 %v1363_v41, %v1337_v44  ;;  %v1373_v6 = vmul.f32 %v1371_v42, %v1335_v39 }
 0x38f   : > { %vm1390_vm0 = vmand %vm1386_vm14, %vm1388_vm15  ;;  %v1356_v7 = vadd.f32 %v1354_v1, %v1351_v60  ;;  %v1376_v8 = vmul.f32 %v1374_v43, %v1337_v44 }
 0x390   : > { %v1392_v9 = vsel %vm1390_vm0, %v1380_v0, 1e+30  ;;  %v1367_v10 = vadd.f32 %v1365_v5, %v1362_v2  ;;  %vm1383_vm1 = vcmp.ge.f32.partialorder %v1348_v4, 0.0 }
 0x391   : > { %v1396_v11 = vmin.f32 %v1394_v3, %v1392_v9  ;;  %v1359_v12 = vadd.f32 %v1357_v54, %v1356_v7  ;;  %v1378_v13 = vadd.f32 %v1376_v8, %v1373_v6 }
 0x392   : > { %v1370_v14 = vadd.f32 %v1368_v58, %v1367_v10 }
 0x393   : > { %1398 = vst [vmem:[#allocation9] sm:$0xff] %v1396_v11  ;;  %v1381_v15 = vadd.f32 %v1379_v62, %v1378_v13  ;;  %vm1385_vm2 = vcmp.ge.f32.partialorder %v1359_v12, 0.0 }
 0x394   : > { %vm1387_vm3 = vmand %vm1383_vm1, %vm1385_vm2  ;;  %vm1389_vm4 = vcmp.ge.f32.partialorder %v1370_v14, 0.0 }
 0x395   : > { %vm1391_vm5 = vmand %vm1387_vm3, %vm1389_vm4 }
 0x396   : > { %v1393_v17 = vsel %vm1391_vm5, %v1381_v15, 1e+30 }
 0x397   : > { %v1397_v18 = vmin.f32 %v1395_v16, %v1393_v17 }
 0x399   : > { %1399 = vst [vmem:[#allocation9 + $0x8] sm:$0xff] %v1397_v18 }
 0x39a PF: > { %s1400_s11 = sadd.s32 7, %s2010_s9 }
 0x39b   : > { %s1401_s6 = smul.u32 3, %s1400_s11 }
 0x39d   : > { %s1402_s16 = sld [smem:[#allocation4 + %s1401_s6]]  ;;  %s1403_s2 = sadd.s32 1, %s1401_s6 }
 0x39e   : > { %s1404_s21 = sld [smem:[#allocation4 + %s1403_s2]]  ;;  %s1405_s22 = sadd.s32 2, %s1401_s6 }
 0x39f   : > { %s1406_s0 = sld [smem:[#allocation4 + %s1405_s22]] }
 0x3a3   : > { %s3105_s7 = smul.u32 3, %s1402_s16 }
 0x3a4   : > { %s3107_s30 = smul.u32 3, %s1404_s21 }
 0x3a5   : > { %s3110_s13 = sld [smem:[#allocation7 + %s3105_s7]]  ;;  %s1409_s9 = sadd.s32 1, %s3105_s7 }
 0x3a6   : > { %s3113_s20 = sld [smem:[#allocation7 + %s1409_s9]]  ;;  %s1415_s19 = sadd.s32 1, %s3107_s30 }
 0x3a7   : > { %s3117_s29 = sld [smem:[#allocation7 + %s3107_s30]]  ;;  %s3119_s15 = smul.u32 3, %s1406_s0 }
 0x3a8   : > { %s3121_s26 = sld [smem:[#allocation7 + %s1415_s19]]  ;;  %s1411_s24 = sadd.s32 2, %s3105_s7 }
 0x3a9   : > { %s3124_s12 = sld [smem:[#allocation7 + %s3119_s15]]  ;;  %s1421_s5 = sadd.s32 1, %s3119_s15 }
 0x3aa   : > { %s3127_s27 = sld [smem:[#allocation7 + %s1421_s5]]  ;;  %s1417_s8 = sadd.s32 2, %s3107_s30 }
 0x3ab   : > { %s3163_s30 = sld [smem:[#allocation7 + %s1411_s24]]  ;;  %s1423_s19 = sadd.s32 2, %s3119_s15 }
 0x3ac   : > { %s3166_s5 = sld [smem:[#allocation7 + %s1417_s8]] }
 0x3ad   : > { %s1437_s1 = smul.f32 %s3117_s29, %s3113_s20  ;;  %s1478_s28 = smin.f32 %s3117_s29, %s3110_s13 }
 0x3ae   : > { %s1438_s14 = smul.f32 %s3121_s26, %s3110_s13  ;;  %s1480_s17 = smax.f32 %s3117_s29, %s3110_s13 }
 0x3af   : > { %s1427_s18 = smul.f32 %s3124_s12, %s3121_s26  ;;  %s3142_s23 = smin.f32 %s1478_s28, %s3124_s12 }
 0x3b0   : > { %s1428_s4 = smul.f32 %s3127_s27, %s3117_s29  ;;  %s3146_s3 = ssub.f32 %s1437_s1, %s1438_s14 }
 0x3b1   : > { %s1432_s25 = smul.f32 %s3127_s27, %s3110_s13  ;;  %s1481_s11 = smax.f32 %s1480_s17, %s3124_s12 }
 0x3b2   : > { %s1429_s6 = ssub.f32 %s1427_s18, %s1428_s4  ;;  %s1433_s16 = smul.f32 %s3124_s12, %s3113_s20 }
 0x3b3   : > { %s1482_s2 = smin.f32 %s3121_s26, %s3113_s20  ;;  %s1484_s21 = smax.f32 %s3121_s26, %s3113_s20 }
 0x3b4   : > { %s1434_s22 = ssub.f32 %s1432_s25, %s1433_s16  ;;  %s3158_s0 = smin.f32 %s1482_s2, %s3127_s27 }
 0x3b5   : > { %s3161_s7 = smax.f32 %s1484_s21, %s3127_s27  ;;  %p1486_p12 = scmp.ge.f32.partialorder %s1481_s11, 0.0 }
 0x3b6   : > { %s1440_s9 = sadd.f32 %s1434_s22, %s1429_s6  ;;  %p1489_p2 = scmp.le.f32.partialorder %s3142_s23, 16.0 }
 0x3b7   : > { %p1492_p1 = scmp.ge.f32.partialorder %s3161_s7, 0.0  ;;  %s3171_s28 = sld [smem:[#allocation7 + %s1423_s19]] }
 0x3b8   : > { %s1441_s1 = sadd.f32 %s1440_s9, %s3146_s3  ;;  %p1495_p10 = scmp.le.f32.partialorder %s3158_s0, 16.0 }
 0x3b9   : > { %s1425_s24 = ssub.f32 %s3127_s27, %s3121_s26 }
 0x3ba   : > { %s1442_s14 = sand.u32 2147483647, %s1441_s1  ;;  %p1444_p3 = scmp.ge.f32.partialorder %s1441_s1, 0.0 }
 0x3bb   : > { %p3173_p5 = scmp.gt.f32.partialorder %s1442_s14, 1e-06  ;;  %s1426_s4 = ssub.f32 %s3117_s29, %s3124_s12 }
 0x3bc   : > { %s1445_s8 = scalar_select %p1444_p3, 1.0, -1.0 }
 0x3bd   : > { %s3350_s14 = smov (!%p3173_p5, %s1442_s14), 1.0  ;;  %p1487_p4 = pnand %p1486_p12, %p3173_p5 }
 0x3be   : > { %s3181_s17 = smul.f32 %s1445_s8, %s1429_s6  ;;  %v1447_v19 = vstv %s3350_s14  ;;  %s1430_s16 = ssub.f32 %s3113_s20, %s3127_s27 }
 0x3bf   : > { %s3186_s18 = smul.f32 %s1445_s8, %s1434_s22  ;;  %1718 = vrcp.f32 %v1447_v19  ;;  %p1488_p6 = pneg %p1487_p4 }
 0x3c0   : > { %s3191_s25 = smul.f32 %s1445_s8, %s3146_s3  ;;  %s1431_s11 = ssub.f32 %s3124_s12, %s3110_s13 }
 0x3c1   : > { %s3195_s2 = smul.f32 %s1445_s8, %s1425_s24  ;;  %p1490_p8 = pnand %p1489_p2, %p1488_p6 }
 0x3c2   : > { %s1435_s6 = ssub.f32 %s3121_s26, %s3113_s20  ;;  %s3203_s21 = smul.f32 %s1445_s8, %s1426_s4 }
 0x3c3   : > { %p1491_p7 = pneg %p1490_p8  ;;  %s1436_s3 = ssub.f32 %s3110_s13, %s3117_s29 }
 0x3c4   : > { %s3208_s22 = smul.f32 %s1445_s8, %s1430_s16 }
 0x3c5   : > { %p1493_p11 = pnand %p1492_p1, %p1491_p7  ;;  %s3212_s27 = smul.f32 %s1445_s8, %s1431_s11 }
 0x3c6   : > { %s3214_s23 = smul.f32 %s1445_s8, %s1435_s6 }
 0x3c7   : > { %p1494_p9 = pneg %p1493_p11  ;;  %s3216_s20 = smul.f32 %s1445_s8, %s1436_s3 }
 0x3c8   : > { %s1460_s13 = smul.f32 %s3195_s2, %s3163_s30 }
 0x3c9   : > { %p1496_p13 = pnand %p1495_p10, %p1494_p9  ;;  %s1461_s29 = smul.f32 %s3208_s22, %s3166_s5 }
 0x3ca   : > { %s1463_s26 = smul.f32 %s3214_s23, %s3171_s28 }
 0x3cb   : > { %p1497_p0 = pneg %p1496_p13  ;;  %s1462_s12 = sadd.f32 %s1461_s29, %s1460_s13 }
 0x3cc   : > { %v1719_v20 = vpop.eup %1718  ;;  %s1466_s9 = smul.f32 %s3203_s21, %s3163_s30 }
 0x3cd   : > { %1663 = vpush %v1719_v20  ;;  %p1498_p12 = pnand %p1497_p0, %p1492_p1  ;;  %s3230_s19 = sadd.f32 %s1463_s26, %s1462_s12 }
 0x3ce   : > { %s1467_s1 = smul.f32 %s3212_s27, %s3166_s5 }
 0x3cf   : > { %p1499_p2 = pneg %p1498_p12  ;;  %s1469_s14 = smul.f32 %s3216_s20, %s3171_s28 }
 0x3d0   : > { %s1468_s24 = sadd.f32 %s1467_s1, %s1466_s9  ;;  %s1472_s8 = smul.f32 %s3181_s17, %s3163_s30 }
 0x3d1   : > { %p1500_p3 = pnand %p1499_p2, %p1495_p10  ;;  %s1473_s4 = smul.f32 %s3186_s18, %s3166_s5 }
 0x3d2   : > { %s1470_s16 = sadd.f32 %s1469_s14, %s1468_s24  ;;  %s1475_s11 = smul.f32 %s3191_s25, %s3171_s28 }
 0x3d3   : > { %s1474_s6 = sadd.f32 %s1473_s4, %s1472_s8  ;;  %s1504_s0 = smul.f32 (!%p1500_p3), 0.0, %s3203_s21 }
 0x3d4   : > { %s1506_s5 = smul.f32 (!%p1500_p3), 0.0, %s3212_s27 }
 0x3d5   : > { %s3244_s3 = sadd.f32 %s1475_s11, %s1474_s6  ;;  %s1508_s15 = smul.f32 (!%p1500_p3), 0.0, %s3216_s20 }
 0x3d6   : > { %s3264_s28 = sadd.f32 (!%p1500_p3), %s1504_s0, %s3181_s17 }
 0x3fe   : > { %s1664_s13 = spop %1663  ;;  %1503 = sbr.rel (%p1500_p3) target bundleno = 1048 (0x418), region = 72 }
 0x3ff   : > { %s3352_s13 = smov (!%p3173_p5, %s1664_s13), 0.0 }
 0x400   : > { %s1465_s7 = smul.f32 %s3230_s19, %s3352_s13 }
 0x401   : > { %s3253_s29 = smul.f32 %s1470_s16, %s3352_s13 }
 0x402   : > { %s1477_s30 = smul.f32 %s3244_s3, %s3352_s13 }
 0x403   : > { %v1512_v21 = vld [vmem:[#allocation2] sm:$0xff]  ;;  %v1514_v22 = vld [vmem:[#allocation3 + $0x8] sm:$0xff]  ;;  %v1516_v23 = vstv %s3195_s2  ;;  %v1519_v24 = vstv %s3203_s21  ;;  %v1527_v25 = vstv %s3208_s22  ;;  %v1530_v26 = vstv %s3212_s27  ;;  %v1513_v31 = vld [vmem:[#allocation2 + $0x8] sm:$0xff]  ;;  %s3271_s2 = sadd.f32 %s1506_s5, %s3186_s18  ;;  %s1510_s21 = smul.f32 0.0, %s3253_s29 }
 0x404   : > { %v1517_v27 = vmul.f32 %v1516_v23, %v1512_v21  ;;  %v1520_v28 = vmul.f32 %v1519_v24, %v1514_v22  ;;  %v1528_v29 = vmul.f32 %v1527_v25, %v1512_v21  ;;  %v1531_v30 = vmul.f32 %v1530_v26, %v1514_v22  ;;  %v1515_v36 = vld [vmem:[#allocation3] sm:$0xff]  ;;  %s3275_s22 = sadd.f32 %s1508_s15, %s3191_s25  ;;  %v1572_v59 = vld [vmem:[#allocation9] sm:$0xff]  ;;  %v1573_v8 = vld [vmem:[#allocation9 + $0x8] sm:$0xff] }
 0x405   : > { %v1538_v32 = vstv %s3214_s23  ;;  %v1541_v33 = vstv %s3216_s20  ;;  %v1549_v34 = vstv %s1465_s7  ;;  %v1552_v35 = vstv %s3253_s29  ;;  %s3281_s17 = sadd.f32 %s1510_s21, %s1477_s30 }
 0x406   : > { %v1522_v37 = vadd.f32 %v1520_v28, %v1517_v27  ;;  %v1533_v38 = vadd.f32 %v1531_v30, %v1528_v29  ;;  %v1539_v39 = vmul.f32 %v1538_v32, %v1512_v21  ;;  %v1542_v40 = vmul.f32 %v1541_v33, %v1514_v22 }
 0x407   : > { %v1524_v41 = vstv %s3264_s28  ;;  %v1550_v42 = vmul.f32 %v1549_v34, %v1512_v21  ;;  %v1553_v43 = vmul.f32 %v1552_v35, %v1514_v22  ;;  %v1518_v44 = vmul.f32 %v1516_v23, %v1513_v31 }
 0x408   : > { %v1525_v45 = vadd.f32 %v1524_v41, %v1522_v37  ;;  %v1535_v46 = vstv %s3271_s2  ;;  %v1544_v47 = vadd.f32 %v1542_v40, %v1539_v39  ;;  %v1521_v48 = vmul.f32 %v1519_v24, %v1515_v36 }
 0x409   : > { %v1536_v49 = vadd.f32 %v1535_v46, %v1533_v38  ;;  %v1546_v50 = vstv %s3275_s22  ;;  %v1555_v51 = vadd.f32 %v1553_v43, %v1550_v42  ;;  %v1529_v52 = vmul.f32 %v1527_v25, %v1513_v31 }
 0x40a   : > { %v1547_v53 = vadd.f32 %v1546_v50, %v1544_v47  ;;  %v1557_v54 = vstv %s3281_s17  ;;  %vm1560_vm6 = vcmp.ge.f32.partialorder %v1525_v45, 0.0  ;;  %v1523_v55 = vadd.f32 %v1521_v48, %v1518_v44 }
 0x40b   : > { %v1558_v56 = vadd.f32 %v1557_v54, %v1555_v51  ;;  %vm1562_vm7 = vcmp.ge.f32.partialorder %v1536_v49, 0.0  ;;  %v1532_v57 = vmul.f32 %v1530_v26, %v1515_v36  ;;  %v1540_v58 = vmul.f32 %v1538_v32, %v1513_v31 }
 0x40c   : > { %vm1564_vm8 = vmand %vm1560_vm6, %vm1562_vm7  ;;  %vm1566_vm9 = vcmp.ge.f32.partialorder %v1547_v53, 0.0  ;;  %v1526_v60 = vadd.f32 %v1524_v41, %v1523_v55  ;;  %v1543_v61 = vmul.f32 %v1541_v33, %v1515_v36  ;;  %v1551_v62 = vmul.f32 %v1549_v34, %v1513_v31 }
 0x40d   : > { %vm1568_vm10 = vmand %vm1564_vm8, %vm1566_vm9  ;;  %v1534_v63 = vadd.f32 %v1532_v57, %v1529_v52  ;;  %v1554_v0 = vmul.f32 %v1552_v35, %v1515_v36 }
 0x40e   : > { %v1570_v1 = vsel %vm1568_vm10, %v1558_v56, 1e+30  ;;  %v1545_v2 = vadd.f32 %v1543_v61, %v1540_v58  ;;  %vm1561_vm11 = vcmp.ge.f32.partialorder %v1526_v60, 0.0 }
 0x40f   : > { %v1574_v3 = vmin.f32 %v1572_v59, %v1570_v1  ;;  %v1537_v4 = vadd.f32 %v1535_v46, %v1534_v63  ;;  %v1556_v5 = vadd.f32 %v1554_v0, %v1551_v62 }
 0x410   : > { %v1548_v6 = vadd.f32 %v1546_v50, %v1545_v2 }
 0x411   : > { %1576 = vst [vmem:[#allocation9] sm:$0xff] %v1574_v3  ;;  %v1559_v7 = vadd.f32 %v1557_v54, %v1556_v5  ;;  %vm1563_vm12 = vcmp.ge.f32.partialorder %v1537_v4, 0.0 }
 0x412   : > { %vm1565_vm13 = vmand %vm1561_vm11, %vm1563_vm12  ;;  %vm1567_vm14 = vcmp.ge.f32.partialorder %v1548_v6, 0.0 }
 0x413   : > { %vm1569_vm15 = vmand %vm1565_vm13, %vm1567_vm14 }
 0x414   : > { %v1571_v9 = vsel %vm1569_vm15, %v1559_v7, 1e+30 }
 0x415   : > { %v1575_v10 = vmin.f32 %v1573_v8, %v1571_v9 }
 0x417   : > { %1577 = vst [vmem:[#allocation9 + $0x8] sm:$0xff] %v1575_v10 }
 0x418 PF: > { %p1688_p1 = scmp.eq.s32.totalorder %s1813_s10, 3  ;;  %s1789_s18 = smov [#allocation9]  }
 0x419   : > { %s1584_s25 = sshll.u32 %s1789_s18, 4  ;;  %s1585_s25 = int_to_ptr.vmem [resolvable:$true] %s1584_s25 }
 0x41a   : > { %s1742_s27 = scalar_lea.vmem %s1585_s25, 256  ;;  %p1749_p8 = scmp.lt.s32.totalorder %s1585_s25, %s1585_s25 }
 0x41b   : > { %p1743_p5 = scmp.ne.s32.totalorder %s1585_s25, %s1742_s27  ;;  %p1750_p7 = scmp.lt.s32.totalorder %s1742_s27, %s1742_s27 }
 0x41d   : > { %p1744_p4 = pnand %p1743_p5, %p1688_p1  ;;  %p1751_p10 = por %p1750_p7, %p1749_p8 }
 0x41f   : > { %p1745_p6 = pneg %p1744_p4 }
 0x421   : > { %p1752_p11 = pnand %p1751_p10, %p1745_p6 }
 0x423   : > { %1755 = shalt.err (!%p1752_p11)
}
 0x424   : > { %s1790_s23 = smov 128   ;;  %s1791_s20 = smov 8  }
 0x425   : > { %s3319_s9 = sld [smem:[#allocation16_spill]] }
 0x42b   : > { %1674 = dma.vmem_to_hbm [thread:$0]  (%p1688_p1), %s1585_s25, 256, %s3319_s9, [#allocation5], %s1790_s23, %s1790_s23, %s1791_s20  }
 0x42c   : > { %1779 = dma.done.wait (%p1688_p1), [#allocation5], 256  }
 0x42d   : > { %1781 = vsyncadd (%p1688_p1), [#allocation5], 4294967040 }
 0x42e PF: > { %s3320_s19 = sld [smem:[#allocation13_spill]] }
 0x434   : > { %s15_s9 = sadd.s32 1, %s3320_s19  }
 0x435   : > { %p12_p9 = scmp.ge.s32.totalorder %s15_s9, 6  }
 0x437   :  { %14 = sbr.rel (!%p12_p9) target bundleno = 7 (0x7), region = 97 }
 0x43c   :  { %1600 = vsyncpa [#allocation5], 1 }
 0x43d   :  { %1602 = vsyncpa [#allocation5 + $0x1], 1 }
 0x43e   :  { %1603 = vsyncpa [#allocation6], 1 }
 0x43f   :  { %1605 = vsyncpa [#allocation6 + $0x1], 1 }
 0x440   :  { %1606 = vsyncpa [#allocation8], 1 }

</bundles_post_ra>
